<compile_context>
chip_gen: v5e
topology: v5e:2x2
jax: 0.10.0
libtpu: 0.0.40
codegen_flags: <defaults>
</compile_context>

<pallas_src>
import functools
import math

import jax
import jax.numpy as jnp
import numpy as np
from jax.experimental import pallas as pl
from jax.experimental.pallas import tpu as pltpu


def _global_filter_kernel(x_ref, wr_ref, wi_ref, kf_ref, mr_ref, mi_ref,
                          o_ref, *, abh, bb):
    f32 = jnp.float32
    bf16 = jnp.bfloat16

    wr = wr_ref[...]                      # (abh, cb) f32, resident per C-block
    wi = wi_ref[...]
    kf = kf_ref[...]                      # (2*abh, ab) bf16, rows = [Kr; Ki]
    mr = mr_ref[...]                      # (ab, abh)  bf16
    mi = mi_ref[...]

    for i in range(bb):                   # static unroll, bb <= 8
        xi = x_ref[i]                     # (ab, cb)
        if xi.dtype != bf16:
            xi = xi.astype(bf16)
        # Forward rfft2 (ortho): one stacked MXU matmul -> [zr; zi].
        z = jnp.dot(kf, xi, preferred_element_type=f32)        # (2*abh, cb)
        zr = z[:abh]
        zi = z[abh:]
        # Per-channel complex spectral filter (VPU, f32).
        ur = (zr * wr - zi * wi).astype(bf16)
        ui = (zr * wi + zi * wr).astype(bf16)
        # Inverse irfft2 (ortho; Hermitian fold baked into mr/mi).
        out = (jnp.dot(mr, ur, preferred_element_type=f32)
               + jnp.dot(mi, ui, preferred_element_type=f32))  # (ab, cb)
        o_ref[i] = out.astype(o_ref.dtype)


@functools.lru_cache(maxsize=None)
def _spectral_operators(a, b):
    """bf16 matrices implementing ortho rfft2 / irfft2 on the flattened spatial axis."""
    bh = b // 2 + 1
    jb = np.arange(b)
    kb = np.arange(bh)
    ja = np.arange(a)

    # rfft along b (ortho): F[j, k] = exp(-2pi i j k / b) / sqrt(b)
    ang_b = 2.0 * np.pi * np.outer(jb, kb) / b                  # (b, bh)
    Fr = np.cos(ang_b) / np.sqrt(b)
    Fi = -np.sin(ang_b) / np.sqrt(b)

    # full fft along a (ortho) and its inverse (conjugate).
    ang_a = 2.0 * np.pi * np.outer(ja, ja) / a                  # (a, a)
    Gr = np.cos(ang_a) / np.sqrt(a)
    Gi = -np.sin(ang_a) / np.sqrt(a)
    Hr, Hi = Gr, -Gi

    # irfft along b: double non-DC / non-Nyquist bins (Hermitian mirror).
    mult = np.full((bh,), 2.0)
    mult[0] = 1.0
    if b % 2 == 0:
        mult[-1] = 1.0
    ang_c = 2.0 * np.pi * np.outer(kb, jb) / b                  # (bh, b)
    Cr = mult[:, None] * np.cos(ang_c) / np.sqrt(b)
    Ci = -mult[:, None] * np.sin(ang_c) / np.sqrt(b)

    # Flattened-spatial operators (row-major kron matches x.view(B,a,b,C) and
    # weight.reshape(a*bh, C)).
    Kr = np.kron(Gr, Fr.T) - np.kron(Gi, Fi.T)                  # (a*bh, a*b)
    Ki = np.kron(Gr, Fi.T) + np.kron(Gi, Fr.T)
    Mr = np.kron(Hr, Cr.T) + np.kron(Hi, Ci.T)                  # (a*b, a*bh)
    Mi = np.kron(Hr, Ci.T) - np.kron(Hi, Cr.T)

    Kf = np.concatenate([Kr, Ki], axis=0)                       # (2*a*bh, a*b)
    as_bf16 = lambda m: jnp.asarray(np.ascontiguousarray(m, dtype=np.float32),
                                    dtype=jnp.bfloat16)
    return as_bf16(Kf), as_bf16(Mr), as_bf16(Mi)


def global_filter(x, complex_weight, spatial_size=None, out_dtype=jnp.float32):
    """x: (B, N, C) float; complex_weight: (h, w, C, 2) f32. Returns (B, N, C) out_dtype."""
    B, N, C = x.shape
    if spatial_size is None:
        a = b = int(math.sqrt(N))
    else:
        a, b = spatial_size
    assert a * b == N, "N must equal a*b"
    bh = b // 2 + 1
    h, w_half, dim, _two = complex_weight.shape
    assert (h, w_half, dim) == (a, bh, C), "weight shape must match (a, b//2+1, C)"
    ab, abh = a * b, a * bh
    out_dtype = jnp.dtype(out_dtype)

    # Channel blocking: keep the lane (last) dim a multiple of 128 so stores
    # are unmasked; pad C when needed.  Tiny C (<128) runs at full width.
    if C >= 128:
        Cp = ((C + 127) // 128) * 128
        cb = next(c for c in (512, 256, 128) if Cp % c == 0)
    else:
        Cp, cb = C, C   # small-channel path (masked stores only matter at tiny C)

    # Batch blocking: amortize per-step overhead, keep double-buffered x/out
    # blocks within ~8 MiB of VMEM.
    blk_bytes = ab * cb * (x.dtype.itemsize + out_dtype.itemsize)
    bb = 1
    for cand in (8, 4, 2):
        if B % cand == 0 and cand * blk_bytes <= (4 << 20):
            bb = cand
            break

    kf, mr, mi = _spectral_operators(a, b)

    # Weight real/imag as (abh, Cp) f32: frequencies on sublanes, channels on lanes.
    wr = complex_weight[..., 0].reshape(abh, C).astype(jnp.float32)
    wi = complex_weight[..., 1].reshape(abh, C).astype(jnp.float32)
    if Cp != C:
        x = jnp.pad(x, ((0, 0), (0, 0), (0, Cp - C)))
        wr = jnp.pad(wr, ((0, 0), (0, Cp - C)))
        wi = jnp.pad(wi, ((0, 0), (0, Cp - C)))

    nc, nb = Cp // cb, B // bb
    # Larger parallel extent leads so a 2-TC (v7x) chip has work for both cores.
    if nc >= nb:
        grid = (nc, nb)
        xmap = lambda ci, bi: (bi, 0, ci)
        wmap = lambda ci, bi: (0, ci)
        cmap = lambda ci, bi: (0, 0)
    else:
        grid = (nb, nc)
        xmap = lambda bi, ci: (bi, 0, ci)
        wmap = lambda bi, ci: (0, ci)
        cmap = lambda bi, ci: (0, 0)

    once = pl.Buffered(1)   # grid-invariant: fetched once, no double buffer
    in_specs = [
        pl.BlockSpec((bb, ab, cb), xmap),
        pl.BlockSpec((abh, cb), wmap),
        pl.BlockSpec((abh, cb), wmap),
        pl.BlockSpec((2 * abh, ab), cmap, pipeline_mode=once),
        pl.BlockSpec((ab, abh), cmap, pipeline_mode=once),
        pl.BlockSpec((ab, abh), cmap, pipeline_mode=once),
    ]
    out_spec = pl.BlockSpec((bb, ab, cb), xmap)

    flops = 8 * ab * abh * Cp * B
    bytes_accessed = (B * N * Cp * (x.dtype.itemsize + out_dtype.itemsize)
                      + 2 * (kf.size + mr.size + mi.size)       # bf16 operators
                      + 4 * (wr.size + wi.size))                # f32 weights

    out = pl.pallas_call(
        functools.partial(_global_filter_kernel, abh=abh, bb=bb),
        out_shape=jax.ShapeDtypeStruct((B, N, Cp), out_dtype),
        grid=grid,
        in_specs=in_specs,
        out_specs=out_spec,
        compiler_params=pltpu.CompilerParams(
            dimension_semantics=("parallel", "parallel")),
        cost_estimate=pl.CostEstimate(
            flops=flops, transcendentals=0, bytes_accessed=bytes_accessed),
    )(x, wr, wi, kf, mr, mi)

    return out[:, :, :C] if Cp != C else out


def _reference(x, complex_weight, a, b):
    B, N, C = x.shape
    xs = x.reshape(B, a, b, C).astype(jnp.float32)
    xf = jnp.fft.rfft2(xs, axes=(1, 2), norm="ortho")
    wc = complex_weight[..., 0] + 1j * complex_weight[..., 1]
    return jnp.fft.irfft2(xf * wc[None], s=(a, b), axes=(1, 2),
                          norm="ortho").reshape(B, N, C)


if __name__ == "__main__":
    key = jax.random.PRNGKey(0)
    ks = jax.random.split(key, 6)
    a = b = 16
    N = a * b
    TOL = 3e-3   # bf16 MXU operands (same as default TPU matmul precision)

    def check(xk, wk, B, C):
        x = jax.random.normal(xk, (B, N, C), dtype=jnp.float32)
        w = jax.random.normal(wk, (a, b // 2 + 1, C, 2), dtype=jnp.float32) * 0.02
        out = jax.block_until_ready(global_filter(x, w))
        assert out.shape == (B, N, C)
        ref = _reference(x, w, a, b)
        err = float(jnp.max(jnp.abs(out - ref)))
        assert jnp.allclose(out, ref, atol=TOL, rtol=TOL), f"max abs err {err}"

    # 1) tiny channel count (full-width small-C path).
    check(ks[0], ks[1], B=2, C=4)
    # 2) lane-dense channel block path (C = 128).
    check(ks[2], ks[3], B=2, C=128)
    # 3) non-128-divisible channels (zero-pad to 256, slice back).
    check(ks[4], ks[5], B=2, C=192)

    print("KERNEL_OK")
</pallas_src>

<mosaic_0001>
module attributes {stable_mosaic.version = 11 : i64} {
  func.func @_global_filter_kernel(%arg0: i32, %arg1: i32, %arg2: memref<2x256x4xf32, #tpu.memory_space<vmem>>, %arg3: memref<144x4xf32, #tpu.memory_space<vmem>>, %arg4: memref<144x4xf32, #tpu.memory_space<vmem>>, %arg5: memref<288x256xbf16, #tpu.memory_space<vmem>>, %arg6: memref<256x144xbf16, #tpu.memory_space<vmem>>, %arg7: memref<256x144xbf16, #tpu.memory_space<vmem>>, %arg8: memref<2x256x4xf32, #tpu.memory_space<vmem>>) attributes {dimension_semantics = [#tpu.dimension_semantics<parallel>, #tpu.dimension_semantics<parallel>], iteration_bounds = array<i64: 1, 1>, scalar_prefetch = 0 : i64, scratch_operands = 0 : i64, tpu.core_type = #tpu.core_type<tc>, window_params = [{transform_indices = @transform_0, window_bounds = array<i64: 2, 256, 4>}, {transform_indices = @transform_1, window_bounds = array<i64: 144, 4>}, {transform_indices = @transform_2, window_bounds = array<i64: 144, 4>}, {pipeline_mode = #tpu.pipeline_mode<synchronous>, transform_indices = @transform_3, window_bounds = array<i64: 288, 256>}, {pipeline_mode = #tpu.pipeline_mode<synchronous>, transform_indices = @transform_4, window_bounds = array<i64: 256, 144>}, {pipeline_mode = #tpu.pipeline_mode<synchronous>, transform_indices = @transform_5, window_bounds = array<i64: 256, 144>}, {transform_indices = @transform_6, window_bounds = array<i64: 2, 256, 4>}]} {
    %c0 = arith.constant 0 : index
    %c0_0 = arith.constant 0 : index
    %0 = vector.load %arg3[%c0, %c0_0] : memref<144x4xf32, #tpu.memory_space<vmem>>, vector<144x4xf32>
    %c0_1 = arith.constant 0 : index
    %c0_2 = arith.constant 0 : index
    %1 = vector.load %arg4[%c0_1, %c0_2] : memref<144x4xf32, #tpu.memory_space<vmem>>, vector<144x4xf32>
    %c0_3 = arith.constant 0 : index
    %c0_4 = arith.constant 0 : index
    %2 = vector.load %arg5[%c0_3, %c0_4] : memref<288x256xbf16, #tpu.memory_space<vmem>>, vector<288x256xbf16>
    %c0_5 = arith.constant 0 : index
    %c0_6 = arith.constant 0 : index
    %3 = vector.load %arg6[%c0_5, %c0_6] : memref<256x144xbf16, #tpu.memory_space<vmem>>, vector<256x144xbf16>
    %c0_7 = arith.constant 0 : index
    %c0_8 = arith.constant 0 : index
    %4 = vector.load %arg7[%c0_7, %c0_8] : memref<256x144xbf16, #tpu.memory_space<vmem>>, vector<256x144xbf16>
    %c0_9 = arith.constant 0 : index
    %c0_10 = arith.constant 0 : index
    %c0_11 = arith.constant 0 : index
    %5 = vector.load %arg2[%c0_9, %c0_10, %c0_11] : memref<2x256x4xf32, #tpu.memory_space<vmem>>, vector<1x256x4xf32>
    %6 = vector.shape_cast %5 : vector<1x256x4xf32> to vector<256x4xf32>
    %7 = arith.truncf %6 : vector<256x4xf32> to vector<256x4xbf16>
    %cst = arith.constant dense<0.000000e+00> : vector<288x4xf32>
    %8 = tpu.matmul %2, %7, %cst {dimension_numbers = #tpu.dot_dimension_numbers<[1], [0], [0], [1], [0, 0, 1, 1], [], []>} : vector<288x256xbf16>, vector<256x4xbf16>, vector<288x4xf32> -> vector<288x4xf32>
    %9 = vector.extract_strided_slice %8 {offsets = [0, 0], sizes = [144, 4], strides = [1, 1]} : vector<288x4xf32> to vector<144x4xf32>
    %10 = vector.extract_strided_slice %8 {offsets = [144, 0], sizes = [144, 4], strides = [1, 1]} : vector<288x4xf32> to vector<144x4xf32>
    %11 = arith.mulf %9, %0 : vector<144x4xf32>
    %12 = arith.mulf %10, %1 : vector<144x4xf32>
    %13 = arith.subf %11, %12 : vector<144x4xf32>
    %14 = arith.truncf %13 : vector<144x4xf32> to vector<144x4xbf16>
    %15 = arith.mulf %9, %1 : vector<144x4xf32>
    %16 = arith.mulf %10, %0 : vector<144x4xf32>
    %17 = arith.addf %15, %16 : vector<144x4xf32>
    %18 = arith.truncf %17 : vector<144x4xf32> to vector<144x4xbf16>
    %cst_12 = arith.constant dense<0.000000e+00> : vector<256x4xf32>
    %19 = tpu.matmul %3, %14, %cst_12 {dimension_numbers = #tpu.dot_dimension_numbers<[1], [0], [0], [1], [0, 0, 1, 1], [], []>} : vector<256x144xbf16>, vector<144x4xbf16>, vector<256x4xf32> -> vector<256x4xf32>
    %cst_13 = arith.constant dense<0.000000e+00> : vector<256x4xf32>
    %20 = tpu.matmul %4, %18, %cst_13 {dimension_numbers = #tpu.dot_dimension_numbers<[1], [0], [0], [1], [0, 0, 1, 1], [], []>} : vector<256x144xbf16>, vector<144x4xbf16>, vector<256x4xf32> -> vector<256x4xf32>
    %21 = arith.addf %19, %20 : vector<256x4xf32>
    %c0_14 = arith.constant 0 : index
    %c0_15 = arith.constant 0 : index
    %c0_16 = arith.constant 0 : index
    %22 = vector.load %arg8[%c0_14, %c0_15, %c0_16] : memref<2x256x4xf32, #tpu.memory_space<vmem>>, vector<1x256x4xf32>
    %23 = vector.shape_cast %22 : vector<1x256x4xf32> to vector<256x4xf32>
    %24 = vector.shape_cast %21 : vector<256x4xf32> to vector<1x256x4xf32>
    tpu.vector_store %arg8[%c0_14, %c0_15, %c0_16], %24 {strides = array<i32>} : memref<2x256x4xf32, #tpu.memory_space<vmem>>, vector<1x256x4xf32>,
    %c1 = arith.constant 1 : index
    %c0_17 = arith.constant 0 : index
    %c0_18 = arith.constant 0 : index
    %25 = vector.load %arg2[%c1, %c0_17, %c0_18] : memref<2x256x4xf32, #tpu.memory_space<vmem>>, vector<1x256x4xf32>
    %26 = vector.shape_cast %25 : vector<1x256x4xf32> to vector<256x4xf32>
    %27 = arith.truncf %26 : vector<256x4xf32> to vector<256x4xbf16>
    %cst_19 = arith.constant dense<0.000000e+00> : vector<288x4xf32>
    %28 = tpu.matmul %2, %27, %cst_19 {dimension_numbers = #tpu.dot_dimension_numbers<[1], [0], [0], [1], [0, 0, 1, 1], [], []>} : vector<288x256xbf16>, vector<256x4xbf16>, vector<288x4xf32> -> vector<288x4xf32>
    %29 = vector.extract_strided_slice %28 {offsets = [0, 0], sizes = [144, 4], strides = [1, 1]} : vector<288x4xf32> to vector<144x4xf32>
    %30 = vector.extract_strided_slice %28 {offsets = [144, 0], sizes = [144, 4], strides = [1, 1]} : vector<288x4xf32> to vector<144x4xf32>
    %31 = arith.mulf %29, %0 : vector<144x4xf32>
    %32 = arith.mulf %30, %1 : vector<144x4xf32>
    %33 = arith.subf %31, %32 : vector<144x4xf32>
    %34 = arith.truncf %33 : vector<144x4xf32> to vector<144x4xbf16>
    %35 = arith.mulf %29, %1 : vector<144x4xf32>
    %36 = arith.mulf %30, %0 : vector<144x4xf32>
    %37 = arith.addf %35, %36 : vector<144x4xf32>
    %38 = arith.truncf %37 : vector<144x4xf32> to vector<144x4xbf16>
    %cst_20 = arith.constant dense<0.000000e+00> : vector<256x4xf32>
    %39 = tpu.matmul %3, %34, %cst_20 {dimension_numbers = #tpu.dot_dimension_numbers<[1], [0], [0], [1], [0, 0, 1, 1], [], []>} : vector<256x144xbf16>, vector<144x4xbf16>, vector<256x4xf32> -> vector<256x4xf32>
    %cst_21 = arith.constant dense<0.000000e+00> : vector<256x4xf32>
    %40 = tpu.matmul %4, %38, %cst_21 {dimension_numbers = #tpu.dot_dimension_numbers<[1], [0], [0], [1], [0, 0, 1, 1], [], []>} : vector<256x144xbf16>, vector<144x4xbf16>, vector<256x4xf32> -> vector<256x4xf32>
    %41 = arith.addf %39, %40 : vector<256x4xf32>
    %c1_22 = arith.constant 1 : index
    %c0_23 = arith.constant 0 : index
    %c0_24 = arith.constant 0 : index
    %42 = vector.load %arg8[%c1_22, %c0_23, %c0_24] : memref<2x256x4xf32, #tpu.memory_space<vmem>>, vector<1x256x4xf32>
    %43 = vector.shape_cast %42 : vector<1x256x4xf32> to vector<256x4xf32>
    %44 = vector.shape_cast %41 : vector<256x4xf32> to vector<1x256x4xf32>
    tpu.vector_store %arg8[%c1_22, %c0_23, %c0_24], %44 {strides = array<i32>} : memref<2x256x4xf32, #tpu.memory_space<vmem>>, vector<1x256x4xf32>,
    return
  }
  func.func @transform_0(%arg0: i32, %arg1: i32) -> (i32, i32, i32) {
    %c0_i32 = arith.constant 0 : i32
    %c0_i32_0 = arith.constant 0 : i32
    return %arg1, %c0_i32, %arg0 : i32, i32, i32
  }
  func.func @transform_1(%arg0: i32, %arg1: i32) -> (i32, i32) {
    %c0_i32 = arith.constant 0 : i32
    %c0_i32_0 = arith.constant 0 : i32
    return %c0_i32, %arg0 : i32, i32
  }
  func.func @transform_2(%arg0: i32, %arg1: i32) -> (i32, i32) {
    %c0_i32 = arith.constant 0 : i32
    %c0_i32_0 = arith.constant 0 : i32
    return %c0_i32, %arg0 : i32, i32
  }
  func.func @transform_3(%arg0: i32, %arg1: i32) -> (i32, i32) {
    %c0_i32 = arith.constant 0 : i32
    %c0_i32_0 = arith.constant 0 : i32
    %c0_i32_1 = arith.constant 0 : i32
    return %c0_i32, %c0_i32_0 : i32, i32
  }
  func.func @transform_4(%arg0: i32, %arg1: i32) -> (i32, i32) {
    %c0_i32 = arith.constant 0 : i32
    %c0_i32_0 = arith.constant 0 : i32
    %c0_i32_1 = arith.constant 0 : i32
    return %c0_i32, %c0_i32_0 : i32, i32
  }
  func.func @transform_5(%arg0: i32, %arg1: i32) -> (i32, i32) {
    %c0_i32 = arith.constant 0 : i32
    %c0_i32_0 = arith.constant 0 : i32
    %c0_i32_1 = arith.constant 0 : i32
    return %c0_i32, %c0_i32_0 : i32, i32
  }
  func.func @transform_6(%arg0: i32, %arg1: i32) -> (i32, i32, i32) {
    %c0_i32 = arith.constant 0 : i32
    %c0_i32_0 = arith.constant 0 : i32
    return %arg1, %c0_i32, %arg0 : i32, i32, i32
  }
}

</mosaic_0001>

<bundles_post_ra>
// kernel: tpu_custom_call.1
= control target key start
LH: loop header
LB: loop body
LE: loop exit
PB: predicated region body
PF: predicated region fallthrough
CT: control target
= control target key end

     0   :  { %vm856_vm0 = vcmask 130048   ;;  %vm1453_vm1 = vcmask 31744   ;;  %s5326_s0 = inlined_call_operand.vmem [shape: f32[2,256,4], index: 0, kind: input, shape index: {}]   ;;  %s5327_s3 = inlined_call_operand.vmem [shape: bf16[288,256], index: 3, kind: input, shape index: {}]   ;;  %s5328_s1 = inlined_call_operand.vmem [shape: f32[144,4], index: 1, kind: input, shape index: {}]   ;;  %s5329_s2 = inlined_call_operand.vmem [shape: f32[144,4], index: 2, kind: input, shape index: {}]   ;;  %s5330_s5 = inlined_call_operand.vmem [shape: bf16[256,144], index: 5, kind: input, shape index: {}]   ;;  %s5331_s4 = inlined_call_operand.vmem [shape: bf16[256,144], index: 4, kind: input, shape index: {}]   ;;  %s5332_s6 = inlined_call_operand.vmem [shape: f32[2,256,4], index: 6, kind: output, shape index: {}]  }
   0x1   :  { %v174_v0 = vld [vmem:[%s5326_s0 + $0x70] sm:$0xff]  ;;  %v175_v1 = vld [vmem:[%s5326_s0 + $0x78] sm:$0xff]  ;;  %v172_v5 = vld [vmem:[%s5326_s0 + $0x60] sm:$0xff] }
   0x2   :  { %v190_v2 = vld [vmem:[%s5326_s0 + $0xf0] sm:$0xff]  ;;  %v199_v3 = vpack.c.bf16 %v175_v1, %v174_v0  ;;  %v191_v4 = vld [vmem:[%s5326_s0 + $0xf8] sm:$0xff]  ;;  %v173_v6 = vld [vmem:[%s5326_s0 + $0x68] sm:$0xff] }
   0x3   :  { %v207_v7 = vpack.c.bf16 %v191_v4, %v190_v2  ;;  %v188_v8 = vld [vmem:[%s5326_s0 + $0xe0] sm:$0xff]  ;;  %v189_v9 = vld [vmem:[%s5326_s0 + $0xe8] sm:$0xff]  ;;  %v198_v10 = vpack.c.bf16 %v173_v6, %v172_v5  ;;  %v170_v12 = vld [vmem:[%s5326_s0 + $0x50] sm:$0xff] }
   0x4   :  { %388 = vmatpush.bf16.msra.mxu0 %v199_v3  ;;  %2880 = vmatpush.bf16.msra.mxu3 %v199_v3  ;;  %v206_v11 = vpack.c.bf16 %v189_v9, %v188_v8  ;;  %v171_v13 = vld [vmem:[%s5326_s0 + $0x58] sm:$0xff]  ;;  %v186_v14 = vld [vmem:[%s5326_s0 + $0xd0] sm:$0xff]  ;;  %v168_v18 = vld [vmem:[%s5326_s0 + $0x40] sm:$0xff] }
   0x5   :  { %487 = vmatpush.bf16.msra.mxu1 %v207_v7  ;;  %2888 = vmatpush.bf16.msra.mxu2 %v207_v7  ;;  %v187_v15 = vld [vmem:[%s5326_s0 + $0xd8] sm:$0xff]  ;;  %v197_v16 = vpack.c.bf16 %v171_v13, %v170_v12  ;;  %v169_v19 = vld [vmem:[%s5326_s0 + $0x48] sm:$0xff]  ;;  %v184_v20 = vld [vmem:[%s5326_s0 + $0xc0] sm:$0xff] }
   0x6   :  { %v205_v17 = vpack.c.bf16 %v187_v15, %v186_v14  ;;  %v185_v21 = vld [vmem:[%s5326_s0 + $0xc8] sm:$0xff]  ;;  %v196_v22 = vpack.c.bf16 %v169_v19, %v168_v18  ;;  %v166_v24 = vld [vmem:[%s5326_s0 + $0x30] sm:$0xff]  ;;  %v167_v25 = vld [vmem:[%s5326_s0 + $0x38] sm:$0xff] }
   0x7   :  { %v204_v23 = vpack.c.bf16 %v185_v21, %v184_v20  ;;  %v182_v26 = vld [vmem:[%s5326_s0 + $0xb0] sm:$0xff]  ;;  %v183_v27 = vld [vmem:[%s5326_s0 + $0xb8] sm:$0xff]  ;;  %v195_v28 = vpack.c.bf16 %v167_v25, %v166_v24  ;;  %v164_v30 = vld [vmem:[%s5326_s0 + $0x20] sm:$0xff] }
   0x8   :  { %389 = vmatpush.bf16.msra.mxu0 %v198_v10  ;;  %2881 = vmatpush.bf16.msra.mxu3 %v198_v10  ;;  %v203_v29 = vpack.c.bf16 %v183_v27, %v182_v26  ;;  %v165_v31 = vld [vmem:[%s5326_s0 + $0x28] sm:$0xff]  ;;  %v180_v32 = vld [vmem:[%s5326_s0 + $0xa0] sm:$0xff]  ;;  %v162_v36 = vld [vmem:[%s5326_s0 + $0x10] sm:$0xff] }
   0x9   :  { %488 = vmatpush.bf16.msra.mxu1 %v206_v11  ;;  %2889 = vmatpush.bf16.msra.mxu2 %v206_v11  ;;  %v181_v33 = vld [vmem:[%s5326_s0 + $0xa8] sm:$0xff]  ;;  %v194_v34 = vpack.c.bf16 %v165_v31, %v164_v30  ;;  %v163_v37 = vld [vmem:[%s5326_s0 + $0x18] sm:$0xff]  ;;  %v178_v38 = vld [vmem:[%s5326_s0 + $0x90] sm:$0xff] }
   0xa   :  { %v202_v35 = vpack.c.bf16 %v181_v33, %v180_v32  ;;  %v179_v39 = vld [vmem:[%s5326_s0 + $0x98] sm:$0xff]  ;;  %v193_v40 = vpack.c.bf16 %v163_v37, %v162_v36  ;;  %v160_v42 = vld [vmem:[%s5326_s0] sm:$0xff]  ;;  %v161_v43 = vld [vmem:[%s5326_s0 + $0x8] sm:$0xff] }
   0xb   :  { %v201_v41 = vpack.c.bf16 %v179_v39, %v178_v38  ;;  %v176_v44 = vld [vmem:[%s5326_s0 + $0x80] sm:$0xff]  ;;  %v177_v45 = vld [vmem:[%s5326_s0 + $0x88] sm:$0xff]  ;;  %v192_v46 = vpack.c.bf16 %v161_v43, %v160_v42  ;;  %v2262_v54 = vld [vmem:[%s5327_s3 + $0x10] sm:$0xf] }
   0xc   :  { %390 = vmatpush.bf16.msra.mxu0 %v197_v16  ;;  %2882 = vmatpush.bf16.msra.mxu3 %v197_v16  ;;  %v2254_v47 = vld [vmem:[%s5327_s3] sm:$0xf]  ;;  %v2781_v48 = vld [vmem:[%s5327_s3 + $0x4] sm:$0xf0]  ;;  %v200_v49 = vpack.c.bf16 %v177_v45, %v176_v44  ;;  %v2780_v50 = vld [vmem:[%s5327_s3 + $0x4] sm:$0xf] }
   0xd   :  { %489 = vmatpush.bf16.msra.mxu1 %v205_v17  ;;  %2890 = vmatpush.bf16.msra.mxu2 %v205_v17  ;;  %v2256_v51 = vld [vmem:[%s5327_s3 + $0x8] sm:$0xf0]  ;;  %v3047_v52 = vor.u32 %v2781_v48, %v2254_v47  ;;  %v2783_v55 = vld [vmem:[%s5327_s3 + $0x14] sm:$0xf0]  ;;  %v2782_v56 = vld [vmem:[%s5327_s3 + $0x14] sm:$0xf] }
   0xe   :  { %v3049_v53 = vor.u32 %v2780_v50, %v2256_v51  ;;  %v2264_v57 = vld [vmem:[%s5327_s3 + $0x18] sm:$0xf0]  ;;  %v3065_v58 = vor.u32 %v2783_v55, %v2262_v54  ;;  %v2270_v60 = vld [vmem:[%s5327_s3 + $0x20] sm:$0xf]  ;;  %v2785_v61 = vld [vmem:[%s5327_s3 + $0x24] sm:$0xf0] }
   0xf   :  { %v3067_v59 = vor.u32 %v2782_v56, %v2264_v57  ;;  %v2784_v62 = vld [vmem:[%s5327_s3 + $0x24] sm:$0xf]  ;;  %v2272_v63 = vld [vmem:[%s5327_s3 + $0x28] sm:$0xf0]  ;;  %v3083_v0 = vor.u32 %v2785_v61, %v2270_v60  ;;  %v2278_v2 = vld [vmem:[%s5327_s3 + $0x30] sm:$0xf] }
  0x10   :  { %391 = vmatpush.bf16.msra.mxu0 %v196_v22  ;;  %2883 = vmatpush.bf16.msra.mxu3 %v196_v22  ;;  %v3085_v1 = vor.u32 %v2784_v62, %v2272_v63  ;;  %v2787_v3 = vld [vmem:[%s5327_s3 + $0x34] sm:$0xf0]  ;;  %v2786_v4 = vld [vmem:[%s5327_s3 + $0x34] sm:$0xf]  ;;  %v2280_v5 = vld [vmem:[%s5327_s3 + $0x38] sm:$0xf0] }
  0x11   :  { %490 = vmatpush.bf16.msra.mxu1 %v204_v23  ;;  %2891 = vmatpush.bf16.msra.mxu2 %v204_v23  ;;  %v3101_v6 = vor.u32 %v2787_v3, %v2278_v2  ;;  %v3103_v7 = vor.u32 %v2786_v4, %v2280_v5  ;;  %v2286_v8 = vld [vmem:[%s5327_s3 + $0x40] sm:$0xf]  ;;  %v2789_v9 = vld [vmem:[%s5327_s3 + $0x44] sm:$0xf0]  ;;  %v2788_v10 = vld [vmem:[%s5327_s3 + $0x44] sm:$0xf] }
  0x12   :  { %v2288_v11 = vld [vmem:[%s5327_s3 + $0x48] sm:$0xf0]  ;;  %v3119_v12 = vor.u32 %v2789_v9, %v2286_v8  ;;  %v2382_v14 = vld [vmem:[%s5327_s3 + $0x100] sm:$0xf]  ;;  %v2813_v15 = vld [vmem:[%s5327_s3 + $0x104] sm:$0xf0] }
  0x13   :  { %v3121_v13 = vor.u32 %v2788_v10, %v2288_v11  ;;  %v2812_v16 = vld [vmem:[%s5327_s3 + $0x104] sm:$0xf]  ;;  %v3134_v17 = vor.u32 %v2813_v15, %v2382_v14  ;;  %v2384_v18 = vld [vmem:[%s5327_s3 + $0x108] sm:$0xf0]  ;;  %v2294_v20 = vld [vmem:[%s5327_s3 + $0x50] sm:$0xf] }
  0x14   :  { %392 = vmatpush.bf16.msra.mxu0 %v195_v28  ;;  %2884 = vmatpush.bf16.msra.mxu3 %v195_v28  ;;  %v3139_v19 = vor.u32 %v2812_v16, %v2384_v18  ;;  %v2791_v21 = vld [vmem:[%s5327_s3 + $0x54] sm:$0xf0]  ;;  %v2790_v22 = vld [vmem:[%s5327_s3 + $0x54] sm:$0xf]  ;;  %v2296_v23 = vld [vmem:[%s5327_s3 + $0x58] sm:$0xf0] }
  0x15   :  { %491 = vmatpush.bf16.msra.mxu1 %v203_v29  ;;  %2892 = vmatpush.bf16.msra.mxu2 %v203_v29  ;;  %5399 = vst [vmem:[#allocation2_spill] sm:$0xff] %v3134_v17  ;;  %v3155_v24 = vor.u32 %v2791_v21, %v2294_v20  ;;  %v3157_v25 = vor.u32 %v2790_v22, %v2296_v23  ;;  %v2390_v26 = vld [vmem:[%s5327_s3 + $0x110] sm:$0xf]  ;;  %v2815_v27 = vld [vmem:[%s5327_s3 + $0x114] sm:$0xf0] }
  0x16   :  { %5400 = vst [vmem:[#allocation3_spill] sm:$0xff] %v3139_v19  ;;  %v2814_v28 = vld [vmem:[%s5327_s3 + $0x114] sm:$0xf]  ;;  %v3170_v29 = vor.u32 %v2815_v27, %v2390_v26  ;;  %v2392_v30 = vld [vmem:[%s5327_s3 + $0x118] sm:$0xf0] }
  0x17   :  { %v3175_v31 = vor.u32 %v2814_v28, %v2392_v30  ;;  %v2302_v32 = vld [vmem:[%s5327_s3 + $0x60] sm:$0xf]  ;;  %v2793_v33 = vld [vmem:[%s5327_s3 + $0x64] sm:$0xf0]  ;;  %v2310_v38 = vld [vmem:[%s5327_s3 + $0x70] sm:$0xf] }
  0x18   :  { %393 = vmatpush.bf16.msra.mxu0 %v194_v34  ;;  %2885 = vmatpush.bf16.msra.mxu3 %v194_v34  ;;  %5401 = vst [vmem:[#allocation4_spill] sm:$0xff] %v3170_v29  ;;  %v2792_v34 = vld [vmem:[%s5327_s3 + $0x64] sm:$0xf]  ;;  %v3191_v36 = vor.u32 %v2793_v33, %v2302_v32  ;;  %v2795_v39 = vld [vmem:[%s5327_s3 + $0x74] sm:$0xf0] }
  0x19   :  { %492 = vmatpush.bf16.msra.mxu1 %v202_v35  ;;  %2893 = vmatpush.bf16.msra.mxu2 %v202_v35  ;;  %5402 = vst [vmem:[#allocation5_spill] sm:$0xff] %v3175_v31  ;;  %v2304_v35 = vld [vmem:[%s5327_s3 + $0x68] sm:$0xf0]  ;;  %v3209_v42 = vor.u32 %v2795_v39, %v2310_v38  ;;  %v2318_v44 = vld [vmem:[%s5327_s3 + $0x80] sm:$0xf] }
  0x1a   :  { %v3193_v37 = vor.u32 %v2792_v34, %v2304_v35  ;;  %v2797_v45 = vld [vmem:[%s5327_s3 + $0x84] sm:$0xf0]  ;;  %v2320_v47 = vld [vmem:[%s5327_s3 + $0x88] sm:$0xf0]  ;;  %v2326_v60 = vld [vmem:[%s5327_s3 + $0x90] sm:$0xf] }
  0x1b   :  { %v3227_v48 = vor.u32 %v2797_v45, %v2318_v44  ;;  %v2799_v61 = vld [vmem:[%s5327_s3 + $0x94] sm:$0xf0]  ;;  %v2798_v62 = vld [vmem:[%s5327_s3 + $0x94] sm:$0xf]  ;;  %v2328_v63 = vld [vmem:[%s5327_s3 + $0x98] sm:$0xf0] }
  0x1c   :  { %394 = vmatpush.bf16.msra.mxu0 %v193_v40  ;;  %2886 = vmatpush.bf16.msra.mxu3 %v193_v40  ;;  %v2794_v40 = vld [vmem:[%s5327_s3 + $0x74] sm:$0xf]  ;;  %v3249_v2 = vor.u32 %v2799_v61, %v2326_v60  ;;  %v3251_v4 = vor.u32 %v2798_v62, %v2328_v63  ;;  %v2334_v14 = vld [vmem:[%s5327_s3 + $0xa0] sm:$0xf]  ;;  %v2801_v15 = vld [vmem:[%s5327_s3 + $0xa4] sm:$0xf0] }
  0x1d   :  { %493 = vmatpush.bf16.msra.mxu1 %v201_v41  ;;  %2894 = vmatpush.bf16.msra.mxu2 %v201_v41  ;;  %v2312_v41 = vld [vmem:[%s5327_s3 + $0x78] sm:$0xf0]  ;;  %v2800_v16 = vld [vmem:[%s5327_s3 + $0xa4] sm:$0xf]  ;;  %v2336_v18 = vld [vmem:[%s5327_s3 + $0xa8] sm:$0xf0]  ;;  %v3271_v20 = vor.u32 %v2801_v15, %v2334_v14 }
  0x1e   :  { %v3211_v43 = vor.u32 %v2794_v40, %v2312_v41  ;;  %5403 = vst [vmem:[#allocation6_spill] sm:$0xff] %v3249_v2  ;;  %v3273_v22 = vor.u32 %v2800_v16, %v2336_v18  ;;  %v2342_v32 = vld [vmem:[%s5327_s3 + $0xb0] sm:$0xf]  ;;  %v2803_v33 = vld [vmem:[%s5327_s3 + $0xb4] sm:$0xf0]  ;;  %v2696_v18 = vld [vmem:[%s5326_s0 + $0x160] sm:$0xff] }
  0x1f   :  { %5404 = vst [vmem:[#allocation7_spill] sm:$0xff] %v3251_v4  ;;  %v2802_v34 = vld [vmem:[%s5327_s3 + $0xb4] sm:$0xf]  ;;  %v2344_v35 = vld [vmem:[%s5327_s3 + $0xb8] sm:$0xf0]  ;;  %v3293_v38 = vor.u32 %v2803_v33, %v2342_v32 }
  0x20   :  { %395 = vmatpush.bf16.msra.mxu0 %v192_v46  ;;  %2887 = vmatpush.bf16.msra.mxu3 %v192_v46  ;;  %v2796_v46 = vld [vmem:[%s5327_s3 + $0x84] sm:$0xf]  ;;  %5405 = vst [vmem:[#allocation8_spill] sm:$0xff] %v3271_v20  ;;  %v3295_v40 = vor.u32 %v2802_v34, %v2344_v35  ;;  %v2714_v14 = vld [vmem:[%s5326_s0 + $0x1f0] sm:$0xff]  ;;  %v2715_v15 = vld [vmem:[%s5326_s0 + $0x1f8] sm:$0xff] }
  0x21   :  { %494 = vmatpush.bf16.msra.mxu1 %v200_v49  ;;  %2895 = vmatpush.bf16.msra.mxu2 %v200_v49  ;;  %v3229_v50 = vor.u32 %v2796_v46, %v2320_v47  ;;  %5406 = vst [vmem:[#allocation9_spill] sm:$0xff] %v3273_v22  ;;  %v1534_v16 = vpack.c.bf16 %v2715_v15, %v2714_v14 }
  0x22   :  { %5407 = vst [vmem:[#allocation10_spill] sm:$0xff] %v3293_v38 }
  0x23   :  { %396 = vmatmul.bf16.vlgmr.msra.gmra.mxu0 %v3047_v52  ;;  %476 = vmatmul.bf16.vlgmr.msra.gmra.mxu3 %v3134_v17  ;;  %5408 = vst [vmem:[#allocation11_spill] sm:$0xff] %v3295_v40 }
  0x24   :  { %495 = vmatmul.bf16.vlgmr.msra.gmra.mxu1 %v3049_v53  ;;  %575 = vmatmul.bf16.vlgmr.msra.gmra.mxu2 %v3139_v19 }
  0x25   :  { %1634 = vmatpush.bf16.msrb.mxu1 %v1534_v16  ;;  %v2709_v16 = vld [vmem:[%s5326_s0 + $0x1c8] sm:$0xff] }
  0x33   :  { %401 = vmatmul.bf16.gmra.mxu0 %v3065_v58  ;;  %481 = vmatmul.bf16.gmra.mxu3 %v3170_v29 }
  0x34   :  { %500 = vmatmul.bf16.gmra.mxu1 %v3067_v59  ;;  %580 = vmatmul.bf16.gmra.mxu2 %v3175_v31 }
  0x43   :  { %406 = vmatmul.bf16.gmra.mxu0 %v3083_v0 }
  0x44   :  { %505 = vmatmul.bf16.gmra.mxu1 %v3085_v1 }
  0x53   :  { %411 = vmatmul.bf16.gmra.mxu0 %v3101_v6 }
  0x54   :  { %510 = vmatmul.bf16.gmra.mxu1 %v3103_v7 }
  0x63   :  { %416 = vmatmul.bf16.gmra.mxu0 %v3119_v12 }
  0x64   :  { %515 = vmatmul.bf16.gmra.mxu1 %v3121_v13 }
  0x73   :  { %421 = vmatmul.bf16.gmra.mxu0 %v3155_v24 }
  0x74   :  { %520 = vmatmul.bf16.gmra.mxu1 %v3157_v25 }
  0x83   :  { %426 = vmatmul.bf16.gmra.mxu0 %v3191_v36 }
  0x84   :  { %525 = vmatmul.bf16.gmra.mxu1 %v3193_v37 }
  0x93   :  { %431 = vmatmul.bf16.gmra.mxu0 %v3209_v42 }
  0x94   :  { %530 = vmatmul.bf16.gmra.mxu1 %v3211_v43 }
  0xa0   :  { %v397_v49 = vpop.f32.mrf.mxu0 }
  0xa1   :  { %v496_v51 = vpop.f32.mrf.mxu1 }
  0xa2   :  { %v3231_v54 = vadd.f32 %v496_v51, %v397_v49  ;;  %v2350_v49 = vld [vmem:[%s5327_s3 + $0xc0] sm:$0xf]  ;;  %v2805_v51 = vld [vmem:[%s5327_s3 + $0xc4] sm:$0xf0] }
  0xa3   :  { %436 = vmatmul.bf16.gmra.mxu0 %v3227_v48  ;;  %v3315_v60 = vor.u32 %v2805_v51, %v2350_v49  ;;  %v2711_v49 = vld [vmem:[%s5326_s0 + $0x1d8] sm:$0xff]  ;;  %v2358_v51 = vld [vmem:[%s5327_s3 + $0xd0] sm:$0xf] }
  0xa4   :  { %535 = vmatmul.bf16.gmra.mxu1 %v3229_v50 }
  0xa5   :  { %5409 = vst [vmem:[#allocation12_spill] sm:$0xff] %v3315_v60 }
  0xa8   :  { %v399_v55 = vpop.f32.mrf.mxu0 }
  0xa9   :  { %v498_v56 = vpop.f32.mrf.mxu1 }
  0xaa   :  { %v3235_v57 = vadd.f32 %v498_v56, %v399_v55  ;;  %v2804_v55 = vld [vmem:[%s5327_s3 + $0xc4] sm:$0xf]  ;;  %v2352_v56 = vld [vmem:[%s5327_s3 + $0xc8] sm:$0xf0] }
  0xab   :  { %v3317_v62 = vor.u32 %v2804_v55, %v2352_v56  ;;  %v2807_v55 = vld [vmem:[%s5327_s3 + $0xd4] sm:$0xf0] }
  0xac   :  { %v3382_v14 = vor.u32 %v2807_v55, %v2358_v51  ;;  %v2704_v51 = vld [vmem:[%s5326_s0 + $0x1a0] sm:$0xff] }
  0xad   :  { %5410 = vst [vmem:[#allocation13_spill] sm:$0xff] %v3317_v62 }
  0xae   :  { %5411 = vst [vmem:[#allocation14_spill] sm:$0xff] %v3382_v14 }
  0xb0   :  { %v402_v3 = vpop.f32.mrf.mxu0 }
  0xb1   :  { %v501_v5 = vpop.f32.mrf.mxu1 }
  0xb2   :  { %v3253_v8 = vadd.f32 %v501_v5, %v402_v3  ;;  %v2698_v5 = vld [vmem:[%s5326_s0 + $0x170] sm:$0xff] }
  0xb3   :  { %441 = vmatmul.bf16.gmra.mxu0 %v3249_v2  ;;  %v2848_v2 = vld [vmem:[%s5330_s5 + $0x4] sm:$0xf] }
  0xb4   :  { %540 = vmatmul.bf16.gmra.mxu1 %v3251_v4 }
  0xb8   :  { %v404_v9 = vpop.f32.mrf.mxu0 }
  0xb9   :  { %v503_v10 = vpop.f32.mrf.mxu1 }
  0xba   :  { %v3257_v11 = vadd.f32 %v503_v10, %v404_v9  ;;  %v2699_v9 = vld [vmem:[%s5326_s0 + $0x178] sm:$0xff] }
  0xbb   :  { %v1526_v10 = vpack.c.bf16 %v2699_v9, %v2698_v5  ;;  %v2692_v5 = vld [vmem:[%s5326_s0 + $0x140] sm:$0xff]  ;;  %v2693_v9 = vld [vmem:[%s5326_s0 + $0x148] sm:$0xff] }
  0xbc   :  { %v1523_v15 = vpack.c.bf16 %v2693_v9, %v2692_v5 }
  0xbd   :  { %1535 = vmatpush.bf16.msrb.mxu0 %v1526_v10  ;;  %v2708_v10 = vld [vmem:[%s5326_s0 + $0x1c0] sm:$0xff] }
  0xc0   :  { %v407_v21 = vpop.f32.mrf.mxu0 }
  0xc1   :  { %v506_v23 = vpop.f32.mrf.mxu1 }
  0xc2   :  { %v3275_v26 = vadd.f32 %v506_v23, %v407_v21  ;;  %v2697_v21 = vld [vmem:[%s5326_s0 + $0x168] sm:$0xff]  ;;  %v2712_v23 = vld [vmem:[%s5326_s0 + $0x1e0] sm:$0xff] }
  0xc3   :  { %446 = vmatmul.bf16.gmra.mxu0 %v3271_v20 }
  0xc4   :  { %545 = vmatmul.bf16.gmra.mxu1 %v3273_v22 }
  0xc8   :  { %v409_v27 = vpop.f32.mrf.mxu0 }
  0xc9   :  { %v508_v28 = vpop.f32.mrf.mxu1 }
  0xca   :  { %v3279_v30 = vadd.f32 %v508_v28, %v409_v27  ;;  %v1525_v27 = vpack.c.bf16 %v2697_v21, %v2696_v18  ;;  %v2713_v28 = vld [vmem:[%s5326_s0 + $0x1e8] sm:$0xff] }
  0xcb   :  { %v1533_v33 = vpack.c.bf16 %v2713_v28, %v2712_v23  ;;  %v1531_v23 = vpack.c.bf16 %v2709_v16, %v2708_v10  ;;  %v2686_v10 = vld [vmem:[%s5326_s0 + $0x110] sm:$0xff] }
  0xcc   :  { %1536 = vmatpush.bf16.msrb.mxu0 %v1525_v27  ;;  %v2702_v16 = vld [vmem:[%s5326_s0 + $0x190] sm:$0xff] }
  0xcd   :  { %1635 = vmatpush.bf16.msrb.mxu1 %v1533_v33  ;;  %v2691_v33 = vld [vmem:[%s5326_s0 + $0x138] sm:$0xff] }
  0xd0   :  { %v412_v39 = vpop.f32.mrf.mxu0 }
  0xd1   :  { %v511_v41 = vpop.f32.mrf.mxu1 }
  0xd2   :  { %v3297_v44 = vadd.f32 %v511_v41, %v412_v39  ;;  %v2694_v39 = vld [vmem:[%s5326_s0 + $0x150] sm:$0xff]  ;;  %v2695_v41 = vld [vmem:[%s5326_s0 + $0x158] sm:$0xff] }
  0xd3   :  { %451 = vmatmul.bf16.gmra.mxu0 %v3293_v38 }
  0xd4   :  { %550 = vmatmul.bf16.gmra.mxu1 %v3295_v40 }
  0xd8   :  { %v414_v45 = vpop.f32.mrf.mxu0 }
  0xd9   :  { %v513_v46 = vpop.f32.mrf.mxu1 }
  0xda   :  { %v3301_v47 = vadd.f32 %v513_v46, %v414_v45  ;;  %v2710_v45 = vld [vmem:[%s5326_s0 + $0x1d0] sm:$0xff]  ;;  %v1524_v46 = vpack.c.bf16 %v2695_v41, %v2694_v39  ;;  %v2707_v41 = vld [vmem:[%s5326_s0 + $0x1b8] sm:$0xff] }
  0xdb   :  { %v1532_v56 = vpack.c.bf16 %v2711_v49, %v2710_v45  ;;  %v2706_v39 = vld [vmem:[%s5326_s0 + $0x1b0] sm:$0xff]  ;;  %v2689_v49 = vld [vmem:[%s5326_s0 + $0x128] sm:$0xff] }
  0xdc   :  { %1537 = vmatpush.bf16.msrb.mxu0 %v1524_v46  ;;  %v1530_v45 = vpack.c.bf16 %v2707_v41, %v2706_v39  ;;  %v2688_v46 = vld [vmem:[%s5326_s0 + $0x120] sm:$0xff] }
  0xdd   :  { %1636 = vmatpush.bf16.msrb.mxu1 %v1532_v56  ;;  %v1521_v55 = vpack.c.bf16 %v2689_v49, %v2688_v46  ;;  %v2705_v56 = vld [vmem:[%s5326_s0 + $0x1a8] sm:$0xff]  ;;  %v2684_v41 = vld [vmem:[%s5326_s0 + $0x100] sm:$0xff] }
  0xde   :  { %v2700_v46 = vld [vmem:[%s5326_s0 + $0x180] sm:$0xff] }
  0xe0   :  { %v417_v61 = vpop.f32.mrf.mxu0  ;;  %1538 = vmatpush.bf16.msrb.mxu0 %v1523_v15  ;;  %v2687_v15 = vld [vmem:[%s5326_s0 + $0x118] sm:$0xff] }
  0xe1   :  { %v516_v63 = vpop.f32.mrf.mxu1  ;;  %1637 = vmatpush.bf16.msrb.mxu1 %v1531_v23  ;;  %v2703_v23 = vld [vmem:[%s5326_s0 + $0x198] sm:$0xff] }
  0xe2   :  { %v3319_v3 = vadd.f32 %v516_v63, %v417_v61  ;;  %v2806_v61 = vld [vmem:[%s5327_s3 + $0xd4] sm:$0xf]  ;;  %v2360_v63 = vld [vmem:[%s5327_s3 + $0xd8] sm:$0xf0]  ;;  %v1528_v39 = vpack.c.bf16 %v2703_v23, %v2702_v16  ;;  %v576_v16 = vpop.f32.mrf.mxu2 }
  0xe3   :  { %456 = vmatmul.bf16.gmra.mxu0 %v3315_v60  ;;  %v3387_v21 = vor.u32 %v2806_v61, %v2360_v63  ;;  %v1529_v63 = vpack.c.bf16 %v2705_v56, %v2704_v51 }
  0xe4   :  { %555 = vmatmul.bf16.gmra.mxu1 %v3317_v62 }
  0xe5   :  { %5412 = vst [vmem:[#allocation15_spill] sm:$0xff] %v3387_v21  ;;  %1638 = vmatpush.bf16.msrb.mxu1 %v1530_v45  ;;  %v2685_v45 = vld [vmem:[%s5326_s0 + $0x108] sm:$0xff] }
  0xe6   :  { %v1519_v51 = vpack.c.bf16 %v2685_v45, %v2684_v41 }
  0xe8   :  { %v419_v32 = vpop.f32.mrf.mxu0 }
  0xe9   :  { %v518_v34 = vpop.f32.mrf.mxu1  ;;  %1639 = vmatpush.bf16.msrb.mxu1 %v1529_v63 }
  0xea   :  { %v3347_v35 = vadd.f32 %v518_v34, %v419_v32  ;;  %v2690_v32 = vld [vmem:[%s5326_s0 + $0x130] sm:$0xff] }
  0xeb   :  { %v1522_v34 = vpack.c.bf16 %v2691_v33, %v2690_v32  ;;  %v2809_v32 = vld [vmem:[%s5327_s3 + $0xe4] sm:$0xf0]  ;;  %v2808_v33 = vld [vmem:[%s5327_s3 + $0xe4] sm:$0xf] }
  0xed   :  { %1539 = vmatpush.bf16.msrb.mxu0 %v1522_v34  ;;  %v2368_v34 = vld [vmem:[%s5327_s3 + $0xe8] sm:$0xf0]  ;;  %1640 = vmatpush.bf16.msrb.mxu1 %v1528_v39  ;;  %v2376_v39 = vld [vmem:[%s5327_s3 + $0xf8] sm:$0xf0] }
  0xf0   :  { %v422_v18 = vpop.f32.mrf.mxu0 }
  0xf1   :  { %v521_v27 = vpop.f32.mrf.mxu1  ;;  %1540 = vmatpush.bf16.msrb.mxu0 %v1521_v55  ;;  %v2701_v55 = vld [vmem:[%s5326_s0 + $0x188] sm:$0xff] }
  0xf2   :  { %v3389_v28 = vadd.f32 %v521_v27, %v422_v18  ;;  %v1520_v18 = vpack.c.bf16 %v2687_v15, %v2686_v10  ;;  %v2366_v27 = vld [vmem:[%s5327_s3 + $0xe0] sm:$0xf]  ;;  %v1527_v63 = vpack.c.bf16 %v2701_v55, %v2700_v46  ;;  %v477_v15 = vpop.f32.mrf.mxu3  ;;  %v578_v46 = vpop.f32.mrf.mxu2 }
  0xf3   :  { %461 = vmatmul.bf16.gmra.mxu0 %v3382_v14  ;;  %v3452_v49 = vor.u32 %v2809_v32, %v2366_v27  ;;  %v2374_v32 = vld [vmem:[%s5327_s3 + $0xf0] sm:$0xf] }
  0xf4   :  { %560 = vmatmul.bf16.gmra.mxu1 %v3387_v21  ;;  %v40_v21 = vld [vmem:[%s5328_s1 + $0x80] sm:$0xff] }
  0xf5   :  { %1541 = vmatpush.bf16.msrb.mxu0 %v1520_v18  ;;  %5413 = vst [vmem:[#allocation16_spill] sm:$0xff] %v3452_v49  ;;  %1641 = vmatpush.bf16.msrb.mxu1 %v1527_v63 }
  0xf8   :  { %v424_v61 = vpop.f32.mrf.mxu0 }
  0xf9   :  { %v523_v5 = vpop.f32.mrf.mxu1  ;;  %1542 = vmatpush.bf16.msrb.mxu0 %v1519_v51 }
  0xfa   :  { %v3417_v9 = vadd.f32 %v523_v5, %v424_v61  ;;  %v3457_v61 = vor.u32 %v2808_v33, %v2368_v34  ;;  %v2811_v33 = vld [vmem:[%s5327_s3 + $0xf4] sm:$0xf0]  ;;  %v2810_v34 = vld [vmem:[%s5327_s3 + $0xf4] sm:$0xf]  ;;  %v479_v41 = vpop.f32.mrf.mxu3 }
  0xfb   :  { %v3477_v45 = vor.u32 %v2811_v33, %v2374_v32  ;;  %v3479_v55 = vor.u32 %v2810_v34, %v2376_v39  ;;  %v56_v32 = vld [vmem:[%s5329_s2 + $0x70] sm:$0xff]  ;;  %v39_v33 = vld [vmem:[%s5328_s1 + $0x78] sm:$0xff] }
  0xfc   :  { %5414 = vst [vmem:[#allocation17_spill] sm:$0xff] %v3457_v61 }
  0xfd   :  { %5415 = vst [vmem:[#allocation18_spill] sm:$0xff] %v3477_v45 }
  0xfe   :  { %5416 = vst [vmem:[#allocation19_spill] sm:$0xff] %v3479_v55 }
 0x100   :  { %v427_v56 = vpop.f32.mrf.mxu0 }
 0x101   :  { %v526_v5 = vpop.f32.mrf.mxu1 }
 0x102   :  { %v3459_v10 = vadd.f32 %v526_v5, %v427_v56  ;;  %v577_v5 = vadd.f32 %v576_v16, %v477_v15  ;;  %v482_v39 = vpop.f32.mrf.mxu3  ;;  %v581_v16 = vpop.f32.mrf.mxu2 }
 0x103   :  { %466 = vmatmul.bf16.gmra.mxu0 %v3452_v49  ;;  %v582_v19 = vadd.f32 %v581_v16, %v482_v39 }
 0x104   :  { %565 = vmatmul.bf16.gmra.mxu1 %v3457_v61 }
 0x105   :  { %v683_v16 = vmul.f32 %v582_v19, %v40_v21 }
 0x108   :  { %v429_v18 = vpop.f32.mrf.mxu0 }
 0x109   :  { %v528_v23 = vpop.f32.mrf.mxu1 }
 0x10a   :  { %v3463_v27 = vadd.f32 %v528_v23, %v429_v18  ;;  %v579_v18 = vadd.f32 %v578_v46, %v479_v41  ;;  %v38_v23 = vld [vmem:[%s5328_s1 + $0x70] sm:$0xff]  ;;  %v583_v39 = vpop.f32.mrf.mxu2 }
 0x10b   :  { %v681_v46 = vmul.f32 %v577_v5, %v38_v23 }
 0x10c   :  { %v682_v31 = vmul.f32 %v579_v18, %v39_v33 }
 0x110   :  { %v432_v51 = vpop.f32.mrf.mxu0 }
 0x111   :  { %v531_v56 = vpop.f32.mrf.mxu1 }
 0x112   :  { %v532_v63 = vadd.f32 %v531_v56, %v432_v51  ;;  %v57_v51 = vld [vmem:[%s5329_s2 + $0x78] sm:$0xff] }
 0x113   :  { %471 = vmatmul.bf16.gmra.mxu0 %v3477_v45  ;;  %v58_v45 = vld [vmem:[%s5329_s2 + $0x80] sm:$0xff] }
 0x114   :  { %570 = vmatmul.bf16.gmra.mxu1 %v3479_v55  ;;  %v663_v41 = vmul.f32 %v532_v63, %v56_v32  ;;  %v620_v60 = vmul.f32 %v582_v19, %v58_v45  ;;  %v2400_v19 = vld [vmem:[%s5330_s5 + $0x8] sm:$0xf0] }
 0x116   :  { %v699_v17 = vadd.f32 %v681_v46, %v663_v41 }
 0x118   :  { %v434_v34 = vpop.f32.mrf.mxu0 }
 0x119   :  { %v533_v15 = vpop.f32.mrf.mxu1 }
 0x11a   :  { %v534_v56 = vadd.f32 %v533_v15, %v434_v34  ;;  %v484_v34 = vpop.f32.mrf.mxu3 }
 0x11c   :  { %v664_v29 = vmul.f32 %v534_v56, %v57_v51 }
 0x11e   :  { %v700_v55 = vadd.f32 %v682_v31, %v664_v29  ;;  %v584_v31 = vadd.f32 %v583_v39, %v484_v34 }
 0x120   :  { %v437_v61 = vpop.f32.mrf.mxu0  ;;  %v710_v49 = vpack.c.bf16 %v700_v55, %v699_v17  ;;  %v41_v17 = vld [vmem:[%s5328_s1 + $0x88] sm:$0xff] }
 0x121   :  { %v536_v14 = vpop.f32.mrf.mxu1  ;;  %v59_v55 = vld [vmem:[%s5329_s2 + $0x88] sm:$0xff]  ;;  %v684_v38 = vmul.f32 %v584_v31, %v41_v17 }
 0x122   :  { %v537_v62 = vadd.f32 %v536_v14, %v437_v61  ;;  %905 = vmatpush.bf16.msrb.mxu2 %v710_v49  ;;  %v601_v61 = vmul.f32 %v534_v56, %v39_v33  ;;  %v619_v49 = vmul.f32 %v579_v18, %v57_v51  ;;  %v621_v40 = vmul.f32 %v584_v31, %v59_v55 }
 0x123   :  { %1543 = vmatmul.bf16.vlgmr.msrb.gmra.mxu0 %v3047_v52 }
 0x124   :  { %v602_v15 = vmul.f32 %v537_v62, %v40_v21  ;;  %1642 = vmatmul.bf16.vlgmr.msrb.gmra.mxu1 %v3049_v53  ;;  %v665_v41 = vmul.f32 %v537_v62, %v58_v45  ;;  %v600_v53 = vmul.f32 %v532_v63, %v38_v23  ;;  %v3520_v63 = vld [vmem:[%s5328_s1] sm:$0xff]  ;;  %v3527_v23 = vor.u32 %v2848_v2, %v2400_v19 }
 0x126   :  { %v638_v29 = vsub.f32 %v602_v15, %v620_v60  ;;  %v618_v60 = vmul.f32 %v577_v5, %v56_v32  ;;  %v637_v15 = vsub.f32 %v601_v61, %v619_v49  ;;  %v701_v20 = vadd.f32 %v683_v16, %v665_v41  ;;  %5417 = vst [vmem:[#allocation20_spill] sm:$0xff] %v3527_v23  ;;  %v2850_v49 = vld [vmem:[%s5330_s5 + $0x14] sm:$0xf]  ;;  %v2408_v16 = vld [vmem:[%s5330_s5 + $0x18] sm:$0xf0] }
 0x128   :  { %v439_v14 = vpop.f32.mrf.mxu0  ;;  %v636_v62 = vsub.f32 %v600_v53, %v618_v60  ;;  %v3572_v53 = vld [vmem:[%s5328_s1 + $0x10] sm:$0xff] }
 0x129   :  { %v538_v52 = vpop.f32.mrf.mxu1  ;;  %v3577_v60 = vld [vmem:[%s5329_s2 + $0x10] sm:$0xff]  ;;  %v588_v19 = vmul.f32 %v3253_v8, %v3572_v53 }
 0x12a   :  { %v539_v46 = vadd.f32 %v538_v52, %v439_v14  ;;  %v647_v5 = vpack.c.bf16 %v637_v15, %v636_v62  ;;  %v651_v62 = vmul.f32 %v3253_v8, %v3577_v60  ;;  %v3601_v8 = vld [vmem:[%s5329_s2 + $0x18] sm:$0xff] }
 0x12c   :  { %v603_v34 = vmul.f32 %v539_v46, %v41_v17  ;;  %v666_v39 = vmul.f32 %v539_v46, %v59_v55 }
 0x12e   :  { %v639_v22 = vsub.f32 %v603_v34, %v621_v40  ;;  %v702_v4 = vadd.f32 %v684_v38, %v666_v39  ;;  %v3525_v38 = vld [vmem:[%s5329_s2] sm:$0xff]  ;;  %v3579_v39 = vor.u32 %v2850_v49, %v2408_v16 }
 0x130   :  { %v442_v21 = vpop.f32.mrf.mxu0  ;;  %v711_v45 = vpack.c.bf16 %v702_v4, %v701_v20  ;;  %v3515_v18 = vpack.c.bf16 %v639_v22, %v638_v29  ;;  %v586_v4 = vmul.f32 %v3231_v54, %v3520_v63  ;;  %v649_v20 = vmul.f32 %v3231_v54, %v3525_v38  ;;  %v3549_v54 = vld [vmem:[%s5329_s2 + $0x8] sm:$0xff]  ;;  %5418 = vst [vmem:[#allocation21_spill] sm:$0xff] %v3579_v39 }
 0x131   :  { %v541_v40 = vpop.f32.mrf.mxu1  ;;  %v650_v17 = vmul.f32 %v3235_v57, %v3549_v54 }
 0x132   :  { %v542_v32 = vadd.f32 %v541_v40, %v442_v21  ;;  %1001 = vmatpush.bf16.msrb.mxu3 %v711_v45 }
 0x133   :  { %1548 = vmatmul.bf16.gmra.mxu0 %v3065_v58  ;;  %v3544_v58 = vld [vmem:[%s5328_s1 + $0x8] sm:$0xff] }
 0x134   :  { %v604_v22 = vmul.f32 %v542_v32, %v3525_v38  ;;  %v667_v33 = vmul.f32 %v542_v32, %v3520_v63  ;;  %1647 = vmatmul.bf16.gmra.mxu1 %v3067_v59  ;;  %v587_v59 = vmul.f32 %v3235_v57, %v3544_v58 }
 0x135   :  { %2524 = vmatmul.msk.bf16.vlgmr.msrb.gmra.mxu3 %vm856_vm0, %v3527_v23 }
 0x136   :  { %1275 = vmatpush.bf16.msra.mxu3 %v647_v5  ;;  %v622_v2 = vsub.f32 %v586_v4, %v604_v22  ;;  %v3539_v51 = vadd.f32 %v667_v33, %v649_v20  ;;  %v652_v22 = vmul.f32 %v3257_v11, %v3601_v8 }
 0x138   :  { %v444_v56 = vpop.f32.mrf.mxu0 }
 0x139   :  { %v543_v29 = vpop.f32.mrf.mxu1 }
 0x13a   :  { %v544_v31 = vadd.f32 %v543_v29, %v444_v56  ;;  %v2852_v29 = vld [vmem:[%s5330_s5 + $0x24] sm:$0xf] }
 0x13c   :  { %v605_v55 = vmul.f32 %v544_v31, %v3549_v54  ;;  %v668_v14 = vmul.f32 %v544_v31, %v3544_v58  ;;  %v2416_v31 = vld [vmem:[%s5330_s5 + $0x28] sm:$0xf0] }
 0x13d   :  { %v3631_v16 = vor.u32 %v2852_v29, %v2416_v31 }
 0x13e   :  { %v623_v61 = vsub.f32 %v587_v59, %v605_v55  ;;  %v3563_v52 = vadd.f32 %v668_v14, %v650_v17  ;;  %v3624_v14 = vld [vmem:[%s5328_s1 + $0x20] sm:$0xff] }
 0x13f   :  { %5419 = vst [vmem:[#allocation22_spill] sm:$0xff] %v3631_v16 }
 0x140   :  { %v447_v41 = vpop.f32.mrf.mxu0  ;;  %v3567_v57 = vpack.c.bf16 %v623_v61, %v622_v2  ;;  %v3629_v61 = vld [vmem:[%s5329_s2 + $0x20] sm:$0xff] }
 0x141   :  { %v546_v34 = vpop.f32.mrf.mxu1 }
 0x142   :  { %v547_v15 = vadd.f32 %v546_v34, %v447_v41  ;;  %v590_v34 = vmul.f32 %v3275_v26, %v3624_v14 }
 0x143   :  { %1553 = vmatmul.bf16.gmra.mxu0 %v3083_v0  ;;  %v3596_v0 = vld [vmem:[%s5328_s1 + $0x18] sm:$0xff] }
 0x144   :  { %v606_v21 = vmul.f32 %v547_v15, %v3577_v60  ;;  %v669_v45 = vmul.f32 %v547_v15, %v3572_v53  ;;  %1652 = vmatmul.bf16.gmra.mxu1 %v3085_v1  ;;  %v589_v1 = vmul.f32 %v3257_v11, %v3596_v0  ;;  %v653_v15 = vmul.f32 %v3275_v26, %v3629_v61  ;;  %v3653_v26 = vld [vmem:[%s5329_s2 + $0x28] sm:$0xff] }
 0x145   :  { %2525 = vmatmul.msk.bf16.gmra.mxu3 %vm856_vm0, %v3579_v39 }
 0x146   :  { %v624_v40 = vsub.f32 %v588_v19, %v606_v21  ;;  %v3591_v5 = vadd.f32 %v669_v45, %v651_v62 }
 0x148   :  { %v449_v32 = vpop.f32.mrf.mxu0 }
 0x149   :  { %v548_v4 = vpop.f32.mrf.mxu1 }
 0x14a   :  { %v549_v20 = vadd.f32 %v548_v4, %v449_v32 }
 0x14c   :  { %v607_v33 = vmul.f32 %v549_v20, %v3601_v8  ;;  %v670_v2 = vmul.f32 %v549_v20, %v3596_v0  ;;  %v654_v20 = vmul.f32 %v3279_v30, %v3653_v26 }
 0x14e   :  { %v625_v56 = vsub.f32 %v589_v1, %v607_v33  ;;  %v3615_v59 = vadd.f32 %v670_v2, %v652_v22  ;;  %v2854_v2 = vld [vmem:[%s5330_s5 + $0x34] sm:$0xf] }
 0x150   :  { %v452_v17 = vpop.f32.mrf.mxu0  ;;  %v3619_v11 = vpack.c.bf16 %v625_v56, %v624_v40  ;;  %v2424_v56 = vld [vmem:[%s5330_s5 + $0x38] sm:$0xf0] }
 0x151   :  { %v551_v49 = vpop.f32.mrf.mxu1 }
 0x152   :  { %v552_v41 = vadd.f32 %v551_v49, %v452_v17  ;;  %v3676_v49 = vld [vmem:[%s5328_s1 + $0x30] sm:$0xff] }
 0x153   :  { %1558 = vmatmul.bf16.gmra.mxu0 %v3101_v6  ;;  %v3648_v6 = vld [vmem:[%s5328_s1 + $0x28] sm:$0xff] }
 0x154   :  { %v608_v19 = vmul.f32 %v552_v41, %v3629_v61  ;;  %v671_v62 = vmul.f32 %v552_v41, %v3624_v14  ;;  %1657 = vmatmul.bf16.gmra.mxu1 %v3103_v7  ;;  %v591_v7 = vmul.f32 %v3279_v30, %v3648_v6  ;;  %v3681_v41 = vld [vmem:[%s5329_s2 + $0x30] sm:$0xff] }
 0x155   :  { %2526 = vmatmul.msk.bf16.gmra.mxu3 %vm856_vm0, %v3631_v16 }
 0x156   :  { %v626_v21 = vsub.f32 %v590_v34, %v608_v19  ;;  %v3643_v45 = vadd.f32 %v671_v62, %v653_v15  ;;  %v3683_v15 = vor.u32 %v2854_v2, %v2424_v56  ;;  %v592_v62 = vmul.f32 %v3297_v44, %v3676_v49 }
 0x158   :  { %v454_v40 = vpop.f32.mrf.mxu0  ;;  %5420 = vst [vmem:[#allocation23_spill] sm:$0xff] %v3683_v15 }
 0x159   :  { %v553_v32 = vpop.f32.mrf.mxu1 }
 0x15a   :  { %v554_v4 = vadd.f32 %v553_v32, %v454_v40 }
 0x15c   :  { %v609_v1 = vmul.f32 %v554_v4, %v3653_v26  ;;  %v672_v22 = vmul.f32 %v554_v4, %v3648_v6 }
 0x15e   :  { %v627_v33 = vsub.f32 %v591_v7, %v609_v1  ;;  %v3667_v29 = vadd.f32 %v672_v22, %v654_v20 }
 0x160   :  { %v457_v31 = vpop.f32.mrf.mxu0  ;;  %v3671_v30 = vpack.c.bf16 %v627_v33, %v626_v21  ;;  %v655_v21 = vmul.f32 %v3297_v44, %v3681_v41  ;;  %v3705_v44 = vld [vmem:[%s5329_s2 + $0x38] sm:$0xff] }
 0x161   :  { %v556_v34 = vpop.f32.mrf.mxu1  ;;  %5422 = vst [vmem:[#allocation25_spill] sm:$0xff] %v3705_v44  ;;  %v656_v33 = vmul.f32 %v3301_v47, %v3705_v44 }
 0x162   :  { %v557_v19 = vadd.f32 %v556_v34, %v457_v31  ;;  %v2856_v34 = vld [vmem:[%s5330_s5 + $0x44] sm:$0xf] }
 0x163   :  { %1563 = vmatmul.bf16.gmra.mxu0 %v3119_v12  ;;  %v3700_v12 = vld [vmem:[%s5328_s1 + $0x38] sm:$0xff] }
 0x164   :  { %v610_v40 = vmul.f32 %v557_v19, %v3681_v41  ;;  %v673_v32 = vmul.f32 %v557_v19, %v3676_v49  ;;  %1662 = vmatmul.bf16.gmra.mxu1 %v3121_v13  ;;  %5421 = vst [vmem:[#allocation24_spill] sm:$0xff] %v3700_v12  ;;  %v593_v13 = vmul.f32 %v3301_v47, %v3700_v12  ;;  %v2432_v19 = vld [vmem:[%s5330_s5 + $0x48] sm:$0xf0] }
 0x165   :  { %2527 = vmatmul.msk.bf16.gmra.mxu3 %vm856_vm0, %v3683_v15 }
 0x166   :  { %v628_v4 = vsub.f32 %v592_v62, %v610_v40  ;;  %v3695_v7 = vadd.f32 %v673_v32, %v655_v21 }
 0x168   :  { %v459_v20 = vpop.f32.mrf.mxu0 }
 0x169   :  { %v558_v1 = vpop.f32.mrf.mxu1 }
 0x16a   :  { %v559_v22 = vadd.f32 %v558_v1, %v459_v20  ;;  %v3725_v20 = vor.u32 %v2856_v34, %v2432_v19 }
 0x16c   :  { %v611_v2 = vmul.f32 %v559_v22, %v3705_v44  ;;  %v674_v56 = vmul.f32 %v559_v22, %v3700_v12  ;;  %5423 = vst [vmem:[#allocation26_spill] sm:$0xff] %v3725_v20  ;;  %v3734_v22 = vld [vmem:[%s5328_s1 + $0x40] sm:$0xff] }
 0x16d   :  { %v594_v34 = vmul.f32 %v3319_v3, %v3734_v22 }
 0x16e   :  { %v629_v31 = vsub.f32 %v593_v13, %v611_v2  ;;  %v3719_v62 = vadd.f32 %v674_v56, %v656_v33 }
 0x170   :  { %v462_v21 = vpop.f32.mrf.mxu0  ;;  %v3723_v47 = vpack.c.bf16 %v629_v31, %v628_v4  ;;  %v3739_v4 = vld [vmem:[%s5329_s2 + $0x40] sm:$0xff] }
 0x171   :  { %v561_v32 = vpop.f32.mrf.mxu1  ;;  %v657_v19 = vmul.f32 %v3319_v3, %v3739_v4  ;;  %v2440_v3 = vld [vmem:[%s5330_s5 + $0x58] sm:$0xf0] }
 0x172   :  { %v562_v1 = vadd.f32 %v561_v32, %v462_v21 }
 0x173   :  { %1568 = vmatmul.bf16.gmra.mxu0 %v3155_v24  ;;  %v3744_v24 = vld [vmem:[%s5328_s1 + $0x48] sm:$0xff] }
 0x174   :  { %1667 = vmatmul.bf16.gmra.mxu1 %v3157_v25  ;;  %v3749_v25 = vld [vmem:[%s5329_s2 + $0x48] sm:$0xff]  ;;  %v612_v2 = vmul.f32 %v562_v1, %v3739_v4  ;;  %v675_v56 = vmul.f32 %v562_v1, %v3734_v22  ;;  %v595_v21 = vmul.f32 %v3347_v35, %v3744_v24  ;;  %v2858_v1 = vld [vmem:[%s5330_s5 + $0x54] sm:$0xf] }
 0x175   :  { %2528 = vmatmul.msk.bf16.gmra.mxu3 %vm856_vm0, %v3725_v20  ;;  %v658_v32 = vmul.f32 %v3347_v35, %v3749_v25 }
 0x176   :  { %v630_v17 = vsub.f32 %v594_v34, %v612_v2 }
 0x178   :  { %v464_v13 = vpop.f32.mrf.mxu0 }
 0x179   :  { %v563_v33 = vpop.f32.mrf.mxu1 }
 0x17a   :  { %v564_v31 = vadd.f32 %v563_v33, %v464_v13  ;;  %v3769_v13 = vadd.f32 %v675_v56, %v657_v19 }
 0x17c   :  { %v613_v46 = vmul.f32 %v564_v31, %v3749_v25  ;;  %v676_v55 = vmul.f32 %v564_v31, %v3744_v24 }
 0x17e   :  { %v631_v40 = vsub.f32 %v595_v21, %v613_v46  ;;  %v3771_v33 = vadd.f32 %v676_v55, %v658_v32  ;;  %v3777_v46 = vor.u32 %v2858_v1, %v2440_v3  ;;  %v3786_v55 = vld [vmem:[%s5328_s1 + $0x50] sm:$0xff] }
 0x17f   :  { %v596_v21 = vmul.f32 %v3389_v28, %v3786_v55 }
 0x180   :  { %v467_v20 = vpop.f32.mrf.mxu0  ;;  %v3775_v15 = vpack.c.bf16 %v631_v40, %v630_v17  ;;  %5424 = vst [vmem:[#allocation27_spill] sm:$0xff] %v3777_v46  ;;  %v3791_v17 = vld [vmem:[%s5329_s2 + $0x50] sm:$0xff] }
 0x181   :  { %v566_v2 = vpop.f32.mrf.mxu1  ;;  %v659_v32 = vmul.f32 %v3389_v28, %v3791_v17  ;;  %v2448_v28 = vld [vmem:[%s5330_s5 + $0x68] sm:$0xf0] }
 0x182   :  { %v567_v56 = vadd.f32 %v566_v2, %v467_v20 }
 0x183   :  { %1573 = vmatmul.bf16.gmra.mxu0 %v3191_v36  ;;  %v3796_v36 = vld [vmem:[%s5328_s1 + $0x58] sm:$0xff] }
 0x184   :  { %1672 = vmatmul.bf16.gmra.mxu1 %v3193_v37  ;;  %v3801_v37 = vld [vmem:[%s5329_s2 + $0x58] sm:$0xff]  ;;  %v614_v31 = vmul.f32 %v567_v56, %v3791_v17  ;;  %v677_v34 = vmul.f32 %v567_v56, %v3786_v55  ;;  %v597_v1 = vmul.f32 %v3417_v9, %v3796_v36  ;;  %v2860_v56 = vld [vmem:[%s5330_s5 + $0x64] sm:$0xf] }
 0x185   :  { %2529 = vmatmul.msk.bf16.gmra.mxu3 %vm856_vm0, %v3777_v46  ;;  %v660_v3 = vmul.f32 %v3417_v9, %v3801_v37  ;;  %v3821_v12 = vor.u32 %v2860_v56, %v2448_v28 }
 0x186   :  { %v632_v46 = vsub.f32 %v596_v21, %v614_v31 }
 0x187   :  { %5425 = vst [vmem:[#allocation28_spill] sm:$0xff] %v3821_v12 }
 0x188   :  { %v469_v40 = vpop.f32.mrf.mxu0 }
 0x189   :  { %v568_v20 = vpop.f32.mrf.mxu1 }
 0x18a   :  { %v569_v19 = vadd.f32 %v568_v20, %v469_v40  ;;  %v695_v40 = vadd.f32 %v677_v34, %v659_v32 }
 0x18c   :  { %v615_v2 = vmul.f32 %v569_v19, %v3801_v37  ;;  %v678_v35 = vmul.f32 %v569_v19, %v3796_v36  ;;  %v3830_v19 = vld [vmem:[%s5328_s1 + $0x60] sm:$0xff] }
 0x18d   :  { %5426 = vst [vmem:[#allocation29_spill] sm:$0xff] %v3830_v19  ;;  %v598_v32 = vmul.f32 %v3459_v10, %v3830_v19 }
 0x18e   :  { %v633_v16 = vsub.f32 %v597_v1, %v615_v2  ;;  %v696_v20 = vadd.f32 %v678_v35, %v660_v3 }
 0x190   :  { %v472_v39 = vpop.f32.mrf.mxu0  ;;  %v708_v23 = vpack.c.bf16 %v696_v20, %v695_v40  ;;  %v645_v44 = vpack.c.bf16 %v633_v16, %v632_v46  ;;  %v3835_v16 = vld [vmem:[%s5329_s2 + $0x60] sm:$0xff] }
 0x191   :  { %v571_v9 = vpop.f32.mrf.mxu1  ;;  %5427 = vst [vmem:[#allocation30_spill] sm:$0xff] %v3835_v16  ;;  %v661_v1 = vmul.f32 %v3459_v10, %v3835_v16  ;;  %v2456_v10 = vld [vmem:[%s5330_s5 + $0x78] sm:$0xf0] }
 0x192   :  { %v572_v31 = vadd.f32 %v571_v9, %v472_v39 }
 0x193   :  { %1578 = vmatmul.bf16.gmra.mxu0 %v3209_v42  ;;  %v3840_v42 = vld [vmem:[%s5328_s1 + $0x68] sm:$0xff] }
 0x194   :  { %1677 = vmatmul.bf16.gmra.mxu1 %v3211_v43  ;;  %v3845_v43 = vld [vmem:[%s5329_s2 + $0x68] sm:$0xff]  ;;  %v616_v46 = vmul.f32 %v572_v31, %v3835_v16  ;;  %v679_v34 = vmul.f32 %v572_v31, %v3830_v19  ;;  %v599_v3 = vmul.f32 %v3463_v27, %v3840_v42 }
 0x195   :  { %2530 = vmatmul.msk.bf16.gmra.mxu3 %vm856_vm0, %v3821_v12  ;;  %5428 = vst [vmem:[#allocation31_spill] sm:$0xff] %v3845_v43  ;;  %v662_v2 = vmul.f32 %v3463_v27, %v3845_v43 }
 0x196   :  { %v634_v40 = vsub.f32 %v598_v32, %v616_v46  ;;  %v697_v9 = vadd.f32 %v679_v34, %v661_v1  ;;  %v5430_v32 = vpack.c.bf16 %v3771_v33, %v3769_v13 }
 0x198   :  { %v474_v35 = vpop.f32.mrf.mxu0 }
 0x199   :  { %v573_v39 = vpop.f32.mrf.mxu1 }
 0x19a   :  { %v574_v21 = vadd.f32 %v573_v39, %v474_v35  ;;  %v2862_v35 = vld [vmem:[%s5330_s5 + $0x74] sm:$0xf] }
 0x19b   :  { %v3865_v19 = vor.u32 %v2862_v35, %v2456_v10 }
 0x19c   :  { %v617_v56 = vmul.f32 %v574_v21, %v3845_v43  ;;  %v680_v28 = vmul.f32 %v574_v21, %v3840_v42 }
 0x19d   :  { %5429 = vst [vmem:[#allocation32_spill] sm:$0xff] %v3865_v19 }
 0x19e   :  { %v635_v20 = vsub.f32 %v599_v3, %v617_v56  ;;  %v698_v31 = vadd.f32 %v680_v28, %v662_v2 }
 0x1a0   :  { %v1544_v39 = vpop.f32.mrf.mxu0  ;;  %v709_v12 = vpack.c.bf16 %v698_v31, %v697_v9  ;;  %v646_v16 = vpack.c.bf16 %v635_v20, %v634_v40  ;;  %v2406_v20 = vld [vmem:[%s5330_s5 + $0x10] sm:$0xf]  ;;  %v2851_v9 = vld [vmem:[%s5330_s5 + $0x14] sm:$0xf0] }
 0x1a1   :  { %v1643_v27 = vpop.f32.mrf.mxu1 }
 0x1a2   :  { %v3867_v43 = vadd.f32 %v1643_v27, %v1544_v39  ;;  %906 = vmatpush.bf16.msrb.mxu2 %v709_v12  ;;  %1276 = vmatpush.bf16.msra.mxu3 %v646_v16  ;;  %v3947_v39 = vor.u32 %v2851_v9, %v2406_v20  ;;  %v5454_v20 = vld [vmem:[#allocation12_spill] sm:$0xff]  ;;  %v5455_v9 = vld [vmem:[#allocation13_spill] sm:$0xff] }
 0x1a3   :  { %1583 = vmatmul.bf16.gmra.mxu0 %v3227_v48  ;;  %v5431_v48 = vpack.c.bf16 %v3719_v62, %v3695_v7  ;;  %v5434_v7 = vld [vmem:[#allocation6_spill] sm:$0xff]  ;;  %v5435_v62 = vld [vmem:[#allocation7_spill] sm:$0xff] }
 0x1a4   :  { %1682 = vmatmul.bf16.gmra.mxu1 %v3229_v50  ;;  %v2864_v50 = vld [vmem:[%s5330_s5 + $0x84] sm:$0xf] }
 0x1a5   :  { %2531 = vmatmul.msk.bf16.gmra.mxu3 %vm856_vm0, %v3865_v19 }
 0x1a6   :  { %907 = vmatpush.bf16.msrb.mxu2 %v708_v23  ;;  %1277 = vmatpush.bf16.msra.mxu3 %v645_v44  ;;  %v2464_v23 = vld [vmem:[%s5330_s5 + $0x88] sm:$0xf0] }
 0x1a7   :  { %v3889_v13 = vor.u32 %v2864_v50, %v2464_v23 }
 0x1a8   :  { %v1546_v46 = vpop.f32.mrf.mxu0 }
 0x1a9   :  { %v1645_v34 = vpop.f32.mrf.mxu1  ;;  %5432 = vst [vmem:[#allocation33_spill] sm:$0xff] %v3889_v13 }
 0x1aa   :  { %v3873_v21 = vadd.f32 %v1645_v34, %v1546_v46  ;;  %908 = vmatpush.bf16.msrb.mxu2 %v5430_v32  ;;  %1278 = vmatpush.bf16.msra.mxu3 %v3775_v15  ;;  %v5433_v15 = vpack.c.bf16 %v3667_v29, %v3643_v45  ;;  %v2398_v45 = vld [vmem:[%s5330_s5] sm:$0xf]  ;;  %v2849_v29 = vld [vmem:[%s5330_s5 + $0x4] sm:$0xf0]  ;;  %v2868_v46 = vld [vmem:[%s5330_s5 + $0xa4] sm:$0xf] }
 0x1ab   :  { %v3913_v3 = vor.u32 %v2849_v29, %v2398_v45  ;;  %v2480_v34 = vld [vmem:[%s5330_s5 + $0xa8] sm:$0xf0] }
 0x1ac   :  { %v3960_v23 = vor.u32 %v2868_v46, %v2480_v34 }
 0x1ad   :  { %5438 = vst [vmem:[#allocation7_spill] sm:$0xff] %v3913_v3 }
 0x1ae   :  { %909 = vmatpush.bf16.msrb.mxu2 %v5431_v48  ;;  %1279 = vmatpush.bf16.msra.mxu3 %v3723_v47  ;;  %v5436_v47 = vpack.c.bf16 %v3615_v59, %v3591_v5  ;;  %v5439_v5 = vpack.c.bf16 %v3563_v52, %v3539_v51  ;;  %v2866_v59 = vld [vmem:[%s5330_s5 + $0x94] sm:$0xf]  ;;  %5447 = vst [vmem:[#allocation37_spill] sm:$0xff] %v3960_v23 }
 0x1b0   :  { %v1549_v12 = vpop.f32.mrf.mxu0 }
 0x1b1   :  { %v1648_v44 = vpop.f32.mrf.mxu1 }
 0x1b2   :  { %v3891_v33 = vadd.f32 %v1648_v44, %v1549_v12  ;;  %910 = vmatpush.bf16.msrb.mxu2 %v5433_v15  ;;  %1280 = vmatpush.bf16.msra.mxu3 %v3671_v30  ;;  %v5448_v44 = vld [vmem:[#allocation10_spill] sm:$0xff]  ;;  %v5449_v15 = vld [vmem:[#allocation11_spill] sm:$0xff] }
 0x1b3   :  { %1588 = vmatmul.bf16.gmra.mxu0 %v5434_v7  ;;  %v2414_v7 = vld [vmem:[%s5330_s5 + $0x20] sm:$0xf] }
 0x1b4   :  { %1687 = vmatmul.bf16.gmra.mxu1 %v5435_v62  ;;  %v2853_v62 = vld [vmem:[%s5330_s5 + $0x24] sm:$0xf0] }
 0x1b5   :  { %2532 = vmatmul.msk.bf16.gmra.mxu3 %vm856_vm0, %v3889_v13 }
 0x1b6   :  { %911 = vmatpush.bf16.msrb.mxu2 %v5436_v47  ;;  %1281 = vmatpush.bf16.msra.mxu3 %v3619_v11  ;;  %v2472_v11 = vld [vmem:[%s5330_s5 + $0x98] sm:$0xf0] }
 0x1b7   :  { %v3931_v51 = vor.u32 %v2866_v59, %v2472_v11  ;;  %v2488_v59 = vld [vmem:[%s5330_s5 + $0xb8] sm:$0xf0] }
 0x1b8   :  { %v3911_v30 = vpop.f32.mrf.mxu3  ;;  %v1551_v16 = vpop.f32.mrf.mxu0 }
 0x1b9   :  { %5437 = vst [vmem:[#allocation6_spill] sm:$0xff] %v3911_v30  ;;  %v1650_v1 = vpop.f32.mrf.mxu1 }
 0x1ba   :  { %v3915_v2 = vadd.f32 %v1650_v1, %v1551_v16  ;;  %912 = vmatpush.bf16.msrb.mxu2 %v5439_v5  ;;  %1282 = vmatpush.bf16.msra.mxu3 %v3567_v57  ;;  %5441 = vst [vmem:[#allocation35_spill] sm:$0xff] %v3931_v51  ;;  %v5442_v57 = vld [vmem:[#allocation8_spill] sm:$0xff]  ;;  %v3976_v16 = vor.u32 %v2853_v62, %v2414_v7  ;;  %v2496_v7 = vld [vmem:[%s5330_s5 + $0xc8] sm:$0xf0] }
 0x1bb   :  { %v2870_v5 = vld [vmem:[%s5330_s5 + $0xb4] sm:$0xf] }
 0x1bc   :  { %5451 = vst [vmem:[#allocation11_spill] sm:$0xff] %v3976_v16 }
 0x1bd   :  { %913 = vmatmul.bf16.vlgmr.msrb.gmra.mxu2 %v3913_v3 }
 0x1be   :  { %1371 = vmatpush.bf16.msra.mxu2 %v3515_v18  ;;  %v5443_v18 = vld [vmem:[#allocation9_spill] sm:$0xff] }
 0x1bf   :  { %5445 = vst [vmem:[#allocation9_spill] sm:$0xff] %v3947_v39 }
 0x1c0   :  { %v3929_v56 = vpop.f32.mrf.mxu3  ;;  %v1554_v28 = vpop.f32.mrf.mxu0 }
 0x1c1   :  { %5440 = vst [vmem:[#allocation34_spill] sm:$0xff] %v3929_v56  ;;  %v1653_v40 = vpop.f32.mrf.mxu1 }
 0x1c2   :  { %v3933_v52 = vadd.f32 %v1653_v40, %v1554_v28 }
 0x1c3   :  { %1593 = vmatmul.bf16.gmra.mxu0 %v5442_v57  ;;  %v3989_v57 = vor.u32 %v2870_v5, %v2488_v59 }
 0x1c4   :  { %1692 = vmatmul.bf16.gmra.mxu1 %v5443_v18 }
 0x1c5   :  { %2533 = vmatmul.msk.bf16.gmra.mxu3 %vm856_vm0, %v3931_v51  ;;  %5453 = vst [vmem:[#allocation39_spill] sm:$0xff] %v3989_v57 }
 0x1c8   :  { %v3945_v31 = vpop.f32.mrf.mxu3  ;;  %v1556_v35 = vpop.f32.mrf.mxu0 }
 0x1c9   :  { %5444 = vst [vmem:[#allocation8_spill] sm:$0xff] %v3945_v31  ;;  %v1655_v10 = vpop.f32.mrf.mxu1 }
 0x1ca   :  { %v3949_v27 = vadd.f32 %v1655_v10, %v1556_v35  ;;  %v2422_v35 = vld [vmem:[%s5330_s5 + $0x30] sm:$0xf]  ;;  %v2855_v10 = vld [vmem:[%s5330_s5 + $0x34] sm:$0xf0] }
 0x1cd   :  { %918 = vmatmul.bf16.gmra.mxu2 %v3947_v39 }
 0x1d0   :  { %v3958_v32 = vpop.f32.mrf.mxu3  ;;  %v1559_v48 = vpop.f32.mrf.mxu0 }
 0x1d1   :  { %5446 = vst [vmem:[#allocation36_spill] sm:$0xff] %v3958_v32  ;;  %v1658_v50 = vpop.f32.mrf.mxu1 }
 0x1d2   :  { %v3962_v12 = vadd.f32 %v1658_v50, %v1559_v48  ;;  %v4005_v50 = vor.u32 %v2855_v10, %v2422_v35 }
 0x1d3   :  { %1598 = vmatmul.bf16.gmra.mxu0 %v5448_v44 }
 0x1d4   :  { %1697 = vmatmul.bf16.gmra.mxu1 %v5449_v15  ;;  %5457 = vst [vmem:[#allocation13_spill] sm:$0xff] %v4005_v50  ;;  %v2872_v15 = vld [vmem:[%s5330_s5 + $0xc4] sm:$0xf] }
 0x1d5   :  { %2534 = vmatmul.msk.bf16.gmra.mxu3 %vm856_vm0, %v3960_v23  ;;  %v4018_v5 = vor.u32 %v2872_v15, %v2496_v7  ;;  %v2874_v7 = vld [vmem:[%s5330_s5 + $0xd4] sm:$0xf] }
 0x1d7   :  { %5459 = vst [vmem:[#allocation41_spill] sm:$0xff] %v4018_v5 }
 0x1d8   :  { %v3974_v47 = vpop.f32.mrf.mxu3  ;;  %v1561_v45 = vpop.f32.mrf.mxu0 }
 0x1d9   :  { %5450 = vst [vmem:[#allocation10_spill] sm:$0xff] %v3974_v47  ;;  %v1660_v29 = vpop.f32.mrf.mxu1 }
 0x1da   :  { %v3978_v1 = vadd.f32 %v1660_v29, %v1561_v45 }
 0x1dd   :  { %923 = vmatmul.bf16.gmra.mxu2 %v3976_v16 }
 0x1e0   :  { %v3987_v11 = vpop.f32.mrf.mxu3  ;;  %v1564_v28 = vpop.f32.mrf.mxu0 }
 0x1e1   :  { %5452 = vst [vmem:[#allocation38_spill] sm:$0xff] %v3987_v11  ;;  %v1663_v40 = vpop.f32.mrf.mxu1 }
 0x1e2   :  { %v3991_v18 = vadd.f32 %v1663_v40, %v1564_v28  ;;  %v5460_v28 = vld [vmem:[#allocation14_spill] sm:$0xff]  ;;  %v5461_v40 = vld [vmem:[#allocation15_spill] sm:$0xff] }
 0x1e3   :  { %1603 = vmatmul.bf16.gmra.mxu0 %v5454_v20  ;;  %v2430_v20 = vld [vmem:[%s5330_s5 + $0x40] sm:$0xf] }
 0x1e4   :  { %1702 = vmatmul.bf16.gmra.mxu1 %v5455_v9  ;;  %v2857_v9 = vld [vmem:[%s5330_s5 + $0x44] sm:$0xf0] }
 0x1e5   :  { %2535 = vmatmul.msk.bf16.gmra.mxu3 %vm856_vm0, %v3989_v57  ;;  %v2859_v57 = vld [vmem:[%s5330_s5 + $0x54] sm:$0xf0] }
 0x1e8   :  { %v4003_v46 = vpop.f32.mrf.mxu3  ;;  %v1566_v34 = vpop.f32.mrf.mxu0 }
 0x1e9   :  { %5456 = vst [vmem:[#allocation12_spill] sm:$0xff] %v4003_v46  ;;  %v1665_v48 = vpop.f32.mrf.mxu1 }
 0x1ea   :  { %v4007_v44 = vadd.f32 %v1665_v48, %v1566_v34  ;;  %v4034_v48 = vor.u32 %v2857_v9, %v2430_v20  ;;  %v5466_v9 = vld [vmem:[#allocation16_spill] sm:$0xff] }
 0x1ec   :  { %5463 = vst [vmem:[#allocation15_spill] sm:$0xff] %v4034_v48 }
 0x1ed   :  { %928 = vmatmul.bf16.gmra.mxu2 %v4005_v50 }
 0x1f0   :  { %v4016_v62 = vpop.f32.mrf.mxu3  ;;  %v1569_v45 = vpop.f32.mrf.mxu0 }
 0x1f1   :  { %5458 = vst [vmem:[#allocation40_spill] sm:$0xff] %v4016_v62  ;;  %v1668_v29 = vpop.f32.mrf.mxu1 }
 0x1f2   :  { %v4020_v59 = vadd.f32 %v1668_v29, %v1569_v45  ;;  %v2504_v45 = vld [vmem:[%s5330_s5 + $0xd8] sm:$0xf0] }
 0x1f3   :  { %1608 = vmatmul.bf16.gmra.mxu0 %v5460_v28 }
 0x1f4   :  { %1707 = vmatmul.bf16.gmra.mxu1 %v5461_v40 }
 0x1f5   :  { %2536 = vmatmul.msk.bf16.gmra.mxu3 %vm856_vm0, %v4018_v5  ;;  %v4047_v5 = vor.u32 %v2874_v7, %v2504_v45 }
 0x1f7   :  { %5465 = vst [vmem:[#allocation43_spill] sm:$0xff] %v4047_v5 }
 0x1f8   :  { %v4032_v35 = vpop.f32.mrf.mxu3  ;;  %v1571_v10 = vpop.f32.mrf.mxu0 }
 0x1f9   :  { %5462 = vst [vmem:[#allocation14_spill] sm:$0xff] %v4032_v35  ;;  %v1670_v34 = vpop.f32.mrf.mxu1 }
 0x1fa   :  { %v4036_v15 = vadd.f32 %v1670_v34, %v1571_v10  ;;  %v5467_v10 = vld [vmem:[#allocation17_spill] sm:$0xff]  ;;  %v2438_v34 = vld [vmem:[%s5330_s5 + $0x50] sm:$0xf] }
 0x1fd   :  { %933 = vmatmul.bf16.gmra.mxu2 %v4034_v48  ;;  %v2861_v48 = vld [vmem:[%s5330_s5 + $0x64] sm:$0xf0] }
 0x200   :  { %v4045_v29 = vpop.f32.mrf.mxu3  ;;  %v1574_v28 = vpop.f32.mrf.mxu0 }
 0x201   :  { %5464 = vst [vmem:[#allocation42_spill] sm:$0xff] %v4045_v29  ;;  %v1673_v40 = vpop.f32.mrf.mxu1 }
 0x202   :  { %v4049_v20 = vadd.f32 %v1673_v40, %v1574_v28  ;;  %v4067_v28 = vor.u32 %v2859_v57, %v2438_v34  ;;  %v2876_v40 = vld [vmem:[%s5330_s5 + $0xe4] sm:$0xf]  ;;  %v5473_v34 = vld [vmem:[#allocation19_spill] sm:$0xff] }
 0x203   :  { %1613 = vmatmul.bf16.gmra.mxu0 %v5466_v9  ;;  %v2512_v9 = vld [vmem:[%s5330_s5 + $0xe8] sm:$0xf0]  ;;  %v5472_v57 = vld [vmem:[#allocation18_spill] sm:$0xff] }
 0x204   :  { %1712 = vmatmul.bf16.gmra.mxu1 %v5467_v10  ;;  %5469 = vst [vmem:[#allocation17_spill] sm:$0xff] %v4067_v28  ;;  %v4078_v13 = vor.u32 %v2876_v40, %v2512_v9  ;;  %v2878_v9 = vld [vmem:[%s5330_s5 + $0xf4] sm:$0xf] }
 0x205   :  { %2537 = vmatmul.msk.bf16.gmra.mxu3 %vm856_vm0, %v4047_v5 }
 0x206   :  { %5471 = vst [vmem:[#allocation45_spill] sm:$0xff] %v4078_v13 }
 0x208   :  { %v4061_v23 = vpop.f32.mrf.mxu3  ;;  %v4063_v7 = vpop.f32.mrf.mxu0 }
 0x209   :  { %5468 = vst [vmem:[#allocation16_spill] sm:$0xff] %v4061_v23  ;;  %v4065_v45 = vpop.f32.mrf.mxu1  ;;  %v5485_v23 = vld [vmem:[#allocation4_spill] sm:$0xff] }
 0x20d   :  { %938 = vmatmul.bf16.gmra.mxu2 %v4067_v28  ;;  %v2446_v28 = vld [vmem:[%s5330_s5 + $0x60] sm:$0xf] }
 0x210   :  { %v4076_v10 = vpop.f32.mrf.mxu3  ;;  %v1579_v5 = vpop.f32.mrf.mxu0 }
 0x211   :  { %5470 = vst [vmem:[#allocation44_spill] sm:$0xff] %v4076_v10  ;;  %v1678_v51 = vpop.f32.mrf.mxu1 }
 0x212   :  { %v4080_v19 = vadd.f32 %v1678_v51, %v1579_v5  ;;  %v4098_v5 = vor.u32 %v2861_v48, %v2446_v28  ;;  %v5479_v48 = vld [vmem:[#allocation2_spill] sm:$0xff]  ;;  %v5480_v28 = vld [vmem:[#allocation3_spill] sm:$0xff] }
 0x213   :  { %1618 = vmatmul.bf16.gmra.mxu0 %v5472_v57  ;;  %v2520_v57 = vld [vmem:[%s5330_s5 + $0xf8] sm:$0xf0] }
 0x214   :  { %1717 = vmatmul.bf16.gmra.mxu1 %v5473_v34  ;;  %5475 = vst [vmem:[#allocation19_spill] sm:$0xff] %v4098_v5  ;;  %v4109_v39 = vor.u32 %v2878_v9, %v2520_v57  ;;  %v2542_v57 = vld [vmem:[%s5331_s4] sm:$0xf] }
 0x215   :  { %2538 = vmatmul.msk.bf16.gmra.mxu3 %vm856_vm0, %v4078_v13 }
 0x216   :  { %5477 = vst [vmem:[#allocation47_spill] sm:$0xff] %v4109_v39 }
 0x218   :  { %v4092_v50 = vpop.f32.mrf.mxu3  ;;  %v4094_v40 = vpop.f32.mrf.mxu0 }
 0x219   :  { %5474 = vst [vmem:[#allocation18_spill] sm:$0xff] %v4092_v50  ;;  %v4096_v51 = vpop.f32.mrf.mxu1 }
 0x21d   :  { %943 = vmatmul.bf16.gmra.mxu2 %v4098_v5  ;;  %v2454_v5 = vld [vmem:[%s5330_s5 + $0x70] sm:$0xf] }
 0x220   :  { %v4107_v34 = vpop.f32.mrf.mxu3  ;;  %v1584_v13 = vpop.f32.mrf.mxu0 }
 0x221   :  { %5476 = vst [vmem:[#allocation46_spill] sm:$0xff] %v4107_v34  ;;  %v1683_v16 = vpop.f32.mrf.mxu1  ;;  %v2863_v34 = vld [vmem:[%s5330_s5 + $0x74] sm:$0xf0] }
 0x222   :  { %v4111_v3 = vadd.f32 %v1683_v16, %v1584_v13  ;;  %v4129_v16 = vor.u32 %v2863_v34, %v2454_v5  ;;  %v4144_v5 = vmul.f32 %v3867_v43, %v3520_v63  ;;  %v1796_v34 = vmul.f32 %v3867_v43, %v3525_v38  ;;  %v2462_v43 = vld [vmem:[%s5330_s5 + $0x80] sm:$0xf] }
 0x223   :  { %1623 = vmatmul.bf16.gmra.mxu0 %v5479_v48  ;;  %v2817_v48 = vld [vmem:[%s5331_s4 + $0x4] sm:$0xf0] }
 0x224   :  { %5478 = vst [vmem:[#allocation48_spill] sm:$0xff] %v4111_v3  ;;  %1722 = vmatmul.bf16.gmra.mxu1 %v5480_v28  ;;  %v4140_v10 = vor.u32 %v2817_v48, %v2542_v57 }
 0x225   :  { %2539 = vmatmul.msk.bf16.gmra.mxu3 %vm856_vm0, %v4109_v39  ;;  %5482 = vst [vmem:[#allocation3_spill] sm:$0xff] %v4129_v16 }
 0x226   :  { %5484 = vst [vmem:[#allocation50_spill] sm:$0xff] %v4140_v10 }
 0x228   :  { %v4123_v50 = vpop.f32.mrf.mxu3  ;;  %v4125_v9 = vpop.f32.mrf.mxu0 }
 0x229   :  { %5481 = vst [vmem:[#allocation2_spill] sm:$0xff] %v4123_v50  ;;  %v4127_v13 = vpop.f32.mrf.mxu1 }
 0x22d   :  { %948 = vmatmul.bf16.gmra.mxu2 %v4129_v16 }
 0x230   :  { %v4138_v28 = vpop.f32.mrf.mxu3  ;;  %v1589_v39 = vpop.f32.mrf.mxu0 }
 0x231   :  { %5483 = vst [vmem:[#allocation49_spill] sm:$0xff] %v4138_v28  ;;  %v1688_v50 = vpop.f32.mrf.mxu1  ;;  %v5486_v28 = vld [vmem:[#allocation5_spill] sm:$0xff] }
 0x232   :  { %v1689_v16 = vadd.f32 %v1688_v50, %v1589_v39 }
 0x233   :  { %1628 = vmatmul.bf16.gmra.mxu0 %v5485_v23 }
 0x234   :  { %v4150_v29 = vmul.f32 %v1689_v16, %v3525_v38  ;;  %v1814_v35 = vmul.f32 %v1689_v16, %v3520_v63  ;;  %1727 = vmatmul.bf16.gmra.mxu1 %v5486_v28  ;;  %v2865_v38 = vld [vmem:[%s5330_s5 + $0x84] sm:$0xf0]  ;;  %v2819_v16 = vld [vmem:[%s5331_s4 + $0x14] sm:$0xf0] }
 0x235   :  { %1283 = vmatmul.bf16.vlgmr.msra.gmra.mxu3 %v4140_v10  ;;  %v4171_v50 = vor.u32 %v2865_v38, %v2462_v43  ;;  %v4188_v43 = vmul.f32 %v3891_v33, %v3572_v53  ;;  %v1798_v38 = vmul.f32 %v3891_v33, %v3577_v60  ;;  %v2867_v33 = vld [vmem:[%s5330_s5 + $0x94] sm:$0xf0] }
 0x236   :  { %v4157_v48 = vadd.f32 %v1814_v35, %v1796_v34  ;;  %v2550_v35 = vld [vmem:[%s5331_s4 + $0x10] sm:$0xf] }
 0x237   :  { %5488 = vst [vmem:[#allocation5_spill] sm:$0xff] %v4171_v50  ;;  %v4184_v62 = vor.u32 %v2819_v16, %v2550_v35  ;;  %v2470_v16 = vld [vmem:[%s5330_s5 + $0x90] sm:$0xf] }
 0x238   :  { %v4165_v39 = vpop.f32.mrf.mxu3  ;;  %v4167_v63 = vpop.f32.mrf.mxu0 }
 0x239   :  { %5487 = vst [vmem:[#allocation4_spill] sm:$0xff] %v4165_v39  ;;  %v4169_v23 = vpop.f32.mrf.mxu1 }
 0x23a   :  { %5490 = vst [vmem:[#allocation52_spill] sm:$0xff] %v4184_v62 }
 0x23d   :  { %953 = vmatmul.bf16.gmra.mxu2 %v4171_v50 }
 0x240   :  { %v4180_v28 = vpop.f32.mrf.mxu2  ;;  %v4182_v34 = vpop.f32.mrf.mxu3 }
 0x241   :  { %5489 = vst [vmem:[#allocation51_spill] sm:$0xff] %v4182_v34  ;;  %v1594_v57 = vpop.f32.mrf.mxu0  ;;  %v1693_v39 = vpop.f32.mrf.mxu1 }
 0x242   :  { %v1694_v50 = vadd.f32 %v1693_v39, %v1594_v57 }
 0x244   :  { %v4193_v46 = vmul.f32 %v1694_v50, %v3577_v60  ;;  %v1816_v11 = vmul.f32 %v1694_v50, %v3572_v53  ;;  %v4215_v50 = vor.u32 %v2867_v33, %v2470_v16  ;;  %v4232_v16 = vmul.f32 %v3933_v52, %v3624_v14 }
 0x245   :  { %1288 = vmatmul.bf16.gmra.mxu3 %v4184_v62  ;;  %v1800_v33 = vmul.f32 %v3933_v52, %v3629_v61  ;;  %v2869_v52 = vld [vmem:[%s5330_s5 + $0xa4] sm:$0xf0] }
 0x246   :  { %v4199_v35 = vadd.f32 %v1816_v11, %v1798_v38  ;;  %5493 = vst [vmem:[#allocation55_spill] sm:$0xff] %v4215_v50  ;;  %v2558_v11 = vld [vmem:[%s5331_s4 + $0x20] sm:$0xf]  ;;  %v2821_v38 = vld [vmem:[%s5331_s4 + $0x24] sm:$0xf0] }
 0x247   :  { %v4228_v10 = vor.u32 %v2821_v38, %v2558_v11  ;;  %v2478_v38 = vld [vmem:[%s5330_s5 + $0xa0] sm:$0xf] }
 0x248   :  { %v4207_v57 = vpop.f32.mrf.mxu2  ;;  %v4209_v60 = vpop.f32.mrf.mxu3 }
 0x249   :  { %5491 = vst [vmem:[#allocation53_spill] sm:$0xff] %v4207_v57  ;;  %v4211_v53 = vpop.f32.mrf.mxu0  ;;  %v4213_v39 = vpop.f32.mrf.mxu1 }
 0x24a   :  { %5492 = vst [vmem:[#allocation54_spill] sm:$0xff] %v4209_v60 }
 0x24b   :  { %5496 = vst [vmem:[#allocation58_spill] sm:$0xff] %v4228_v10 }
 0x24d   :  { %958 = vmatmul.bf16.gmra.mxu2 %v4215_v50 }
 0x250   :  { %v4224_v34 = vpop.f32.mrf.mxu2  ;;  %v4226_v62 = vpop.f32.mrf.mxu3 }
 0x251   :  { %5494 = vst [vmem:[#allocation56_spill] sm:$0xff] %v4224_v34  ;;  %v1599_v60 = vpop.f32.mrf.mxu0  ;;  %v1698_v47 = vpop.f32.mrf.mxu1 }
 0x252   :  { %5495 = vst [vmem:[#allocation57_spill] sm:$0xff] %v4226_v62  ;;  %v1699_v50 = vadd.f32 %v1698_v47, %v1599_v60 }
 0x254   :  { %v4237_v32 = vmul.f32 %v1699_v50, %v3629_v61  ;;  %v1818_v31 = vmul.f32 %v1699_v50, %v3624_v14  ;;  %v4259_v50 = vor.u32 %v2869_v52, %v2478_v38  ;;  %v4276_v38 = vmul.f32 %v3962_v12, %v3676_v49 }
 0x255   :  { %1293 = vmatmul.bf16.gmra.mxu3 %v4228_v10  ;;  %v1802_v52 = vmul.f32 %v3962_v12, %v3681_v41  ;;  %v2871_v12 = vld [vmem:[%s5330_s5 + $0xb4] sm:$0xf0] }
 0x256   :  { %v4243_v11 = vadd.f32 %v1818_v31, %v1800_v33  ;;  %5499 = vst [vmem:[#allocation61_spill] sm:$0xff] %v4259_v50  ;;  %v2566_v31 = vld [vmem:[%s5331_s4 + $0x30] sm:$0xf]  ;;  %v2823_v33 = vld [vmem:[%s5331_s4 + $0x34] sm:$0xf0] }
 0x257   :  { %v4272_v34 = vor.u32 %v2823_v33, %v2566_v31  ;;  %v2486_v33 = vld [vmem:[%s5330_s5 + $0xb0] sm:$0xf] }
 0x258   :  { %v4251_v47 = vpop.f32.mrf.mxu2  ;;  %v4253_v61 = vpop.f32.mrf.mxu3 }
 0x259   :  { %5497 = vst [vmem:[#allocation59_spill] sm:$0xff] %v4251_v47  ;;  %v4255_v14 = vpop.f32.mrf.mxu0  ;;  %v4257_v60 = vpop.f32.mrf.mxu1 }
 0x25a   :  { %5498 = vst [vmem:[#allocation60_spill] sm:$0xff] %v4253_v61 }
 0x25b   :  { %5502 = vst [vmem:[#allocation64_spill] sm:$0xff] %v4272_v34 }
 0x25d   :  { %963 = vmatmul.bf16.gmra.mxu2 %v4259_v50 }
 0x260   :  { %v4268_v62 = vpop.f32.mrf.mxu2  ;;  %v4270_v10 = vpop.f32.mrf.mxu3 }
 0x261   :  { %5500 = vst [vmem:[#allocation62_spill] sm:$0xff] %v4268_v62  ;;  %v1604_v61 = vpop.f32.mrf.mxu0  ;;  %v1703_v47 = vpop.f32.mrf.mxu1 }
 0x262   :  { %5501 = vst [vmem:[#allocation63_spill] sm:$0xff] %v4270_v10  ;;  %v1704_v50 = vadd.f32 %v1703_v47, %v1604_v61  ;;  %v1797_v10 = vmul.f32 %v3873_v21, %v3549_v54 }
 0x264   :  { %v4281_v56 = vmul.f32 %v1704_v50, %v3681_v41  ;;  %v1820_v57 = vmul.f32 %v1704_v50, %v3676_v49  ;;  %v1691_v49 = vadd.f32 %v4169_v23, %v4167_v63  ;;  %v2574_v63 = vld [vmem:[%s5331_s4 + $0x40] sm:$0xf]  ;;  %v2825_v23 = vld [vmem:[%s5331_s4 + $0x44] sm:$0xf0] }
 0x265   :  { %1298 = vmatmul.bf16.gmra.mxu3 %v4272_v34 }
 0x266   :  { %v4287_v31 = vadd.f32 %v1820_v57, %v1802_v52  ;;  %v4305_v57 = vor.u32 %v2871_v12, %v2486_v33  ;;  %v1734_v52 = vmul.f32 %v3873_v21, %v3544_v58  ;;  %v1752_v34 = vmul.f32 %v1691_v49, %v3549_v54 }
 0x268   :  { %v4295_v47 = vpop.f32.mrf.mxu2  ;;  %v4297_v41 = vpop.f32.mrf.mxu3  ;;  %5505 = vst [vmem:[#allocation67_spill] sm:$0xff] %v4305_v57 }
 0x269   :  { %5503 = vst [vmem:[#allocation65_spill] sm:$0xff] %v4295_v47  ;;  %v4301_v61 = vpop.f32.mrf.mxu0  ;;  %v4303_v50 = vpop.f32.mrf.mxu1  ;;  %v1815_v47 = vmul.f32 %v1691_v49, %v3544_v58  ;;  %v4326_v58 = vor.u32 %v2825_v23, %v2574_v63  ;;  %v4330_v49 = vmul.f32 %v3991_v18, %v3734_v22  ;;  %v1799_v23 = vmul.f32 %v3915_v2, %v3601_v8 }
 0x26a   :  { %5504 = vst [vmem:[#allocation66_spill] sm:$0xff] %v4297_v41  ;;  %v1770_v41 = vsub.f32 %v1734_v52, %v1752_v34  ;;  %v5508_v34 = vsub.f32 %v4144_v5, %v4150_v29  ;;  %v1696_v29 = vadd.f32 %v4213_v39, %v4211_v53  ;;  %v2582_v53 = vld [vmem:[%s5331_s4 + $0x50] sm:$0xf]  ;;  %v2827_v39 = vld [vmem:[%s5331_s4 + $0x54] sm:$0xf0]  ;;  %v5514_v52 = vsub.f32 %v4188_v43, %v4193_v46 }
 0x26b   :  { %v4324_v21 = vadd.f32 %v1815_v47, %v1797_v10  ;;  %5507 = vst [vmem:[#allocation69_spill] sm:$0xff] %v4326_v58 }
 0x26c   :  { %v4344_v47 = vpack.c.bf16 %v1770_v41, %v5508_v34 }
 0x26d   :  { %968 = vmatmul.bf16.gmra.mxu2 %v4305_v57  ;;  %v1804_v57 = vmul.f32 %v3991_v18, %v3739_v4 }
 0x270   :  { %v4320_v33 = vpop.f32.mrf.mxu2  ;;  %v4322_v12 = vpop.f32.mrf.mxu3 }
 0x271   :  { %5506 = vst [vmem:[#allocation68_spill] sm:$0xff] %v4322_v12  ;;  %v1609_v54 = vpop.f32.mrf.mxu0  ;;  %v1708_v62 = vpop.f32.mrf.mxu1 }
 0x272   :  { %v1709_v3 = vadd.f32 %v1708_v62, %v1609_v54  ;;  %v1817_v54 = vmul.f32 %v1696_v29, %v3596_v0 }
 0x274   :  { %v4335_v30 = vmul.f32 %v1709_v3, %v3739_v4  ;;  %v1822_v12 = vmul.f32 %v1709_v3, %v3734_v22  ;;  %v2494_v4 = vld [vmem:[%s5330_s5 + $0xc0] sm:$0xf]  ;;  %v2873_v22 = vld [vmem:[%s5330_s5 + $0xc4] sm:$0xf0] }
 0x275   :  { %1303 = vmatmul.bf16.gmra.mxu3 %v4326_v58  ;;  %v4362_v63 = vor.u32 %v2873_v22, %v2494_v4 }
 0x276   :  { %v4348_v18 = vadd.f32 %v1822_v12, %v1804_v57  ;;  %v1736_v57 = vmul.f32 %v3915_v2, %v3596_v0  ;;  %v1754_v12 = vmul.f32 %v1696_v29, %v3601_v8  ;;  %v4381_v2 = vadd.f32 %v1817_v54, %v1799_v23  ;;  %v2875_v23 = vld [vmem:[%s5330_s5 + $0xd4] sm:$0xf0] }
 0x277   :  { %5510 = vst [vmem:[#allocation71_spill] sm:$0xff] %v4362_v63  ;;  %v4383_v0 = vor.u32 %v2827_v39, %v2582_v53  ;;  %v1701_v53 = vadd.f32 %v4257_v60, %v4255_v14  ;;  %v1743_v14 = vmul.f32 %v4020_v59, %v3786_v55  ;;  %v2590_v60 = vld [vmem:[%s5331_s4 + $0x60] sm:$0xf] }
 0x278   :  { %v4356_v3 = vpop.f32.mrf.mxu2  ;;  %v4358_v62 = vpop.f32.mrf.mxu3  ;;  %v1772_v22 = vsub.f32 %v1736_v57, %v1754_v12  ;;  %v2502_v57 = vld [vmem:[%s5330_s5 + $0xd0] sm:$0xf] }
 0x279   :  { %5509 = vst [vmem:[#allocation70_spill] sm:$0xff] %v4358_v62  ;;  %v1611_v5 = vpop.f32.mrf.mxu0  ;;  %v1710_v41 = vpop.f32.mrf.mxu1  ;;  %v4405_v46 = vor.u32 %v2875_v23, %v2502_v57  ;;  %v1756_v62 = vmul.f32 %v1701_v53, %v3653_v26 }
 0x27a   :  { %5513 = vst [vmem:[#allocation74_spill] sm:$0xff] %v4383_v0 }
 0x27b   :  { %5517 = vst [vmem:[#allocation77_spill] sm:$0xff] %v4405_v46 }
 0x27d   :  { %973 = vmatmul.bf16.gmra.mxu2 %v4362_v63  ;;  %v4391_v63 = vpack.c.bf16 %v1772_v22, %v5514_v52  ;;  %v1738_v22 = vmul.f32 %v3949_v27, %v3648_v6 }
 0x280   :  { %v4377_v34 = vpop.f32.mrf.mxu2  ;;  %v4379_v4 = vpop.f32.mrf.mxu3 }
 0x281   :  { %5511 = vst [vmem:[#allocation72_spill] sm:$0xff] %v4377_v34  ;;  %v1614_v8 = vpop.f32.mrf.mxu0  ;;  %v1713_v10 = vpop.f32.mrf.mxu1 }
 0x282   :  { %5512 = vst [vmem:[#allocation73_spill] sm:$0xff] %v4379_v4  ;;  %v1714_v43 = vadd.f32 %v1713_v10, %v1614_v8  ;;  %v1801_v4 = vmul.f32 %v3949_v27, %v3653_v26  ;;  %v2829_v10 = vld [vmem:[%s5331_s4 + $0x64] sm:$0xf0]  ;;  %v1806_v27 = vmul.f32 %v4020_v59, %v3791_v17  ;;  %v1744_v26 = vmul.f32 %v4036_v15, %v3796_v36 }
 0x283   :  { %v1711_v8 = vadd.f32 %v1710_v41, %v1611_v5  ;;  %v1774_v59 = vsub.f32 %v1738_v22, %v1756_v62  ;;  %v4438_v34 = vor.u32 %v2829_v10, %v2590_v60 }
 0x284   :  { %v1824_v57 = vmul.f32 %v1714_v43, %v3786_v55  ;;  %v1805_v55 = vmul.f32 %v4007_v44, %v3749_v25 }
 0x285   :  { %1308 = vmatmul.bf16.gmra.mxu3 %v4383_v0  ;;  %v1819_v0 = vmul.f32 %v1701_v53, %v3648_v6  ;;  %v1807_v6 = vmul.f32 %v4036_v15, %v3801_v37  ;;  %v1823_v15 = vmul.f32 %v1711_v8, %v3744_v24 }
 0x286   :  { %v4448_v5 = vadd.f32 %v1824_v57, %v1806_v27 }
 0x287   :  { %v4472_v60 = vadd.f32 %v1823_v15, %v1805_v55  ;;  %v2598_v55 = vld [vmem:[%s5331_s4 + $0x70] sm:$0xf] }
 0x288   :  { %v4399_v12 = vpop.f32.mrf.mxu2  ;;  %v4401_v54 = vpop.f32.mrf.mxu3 }
 0x289   :  { %5515 = vst [vmem:[#allocation75_spill] sm:$0xff] %v4399_v12  ;;  %v1616_v39 = vpop.f32.mrf.mxu0  ;;  %v1715_v29 = vpop.f32.mrf.mxu1 }
 0x28a   :  { %5516 = vst [vmem:[#allocation76_spill] sm:$0xff] %v4401_v54  ;;  %v1716_v52 = vadd.f32 %v1715_v29, %v1616_v39  ;;  %v1761_v29 = vmul.f32 %v1714_v43, %v3791_v17  ;;  %v4436_v54 = vadd.f32 %v1819_v0, %v1801_v4  ;;  %v1742_v17 = vmul.f32 %v4007_v44, %v3744_v24  ;;  %v2510_v24 = vld [vmem:[%s5330_s5 + $0xe0] sm:$0xf] }
 0x28b   :  { %v5518_v44 = vsub.f32 %v4232_v16, %v4237_v32 }
 0x28c   :  { %v1762_v23 = vmul.f32 %v1716_v52, %v3801_v37  ;;  %v1825_v53 = vmul.f32 %v1716_v52, %v3796_v36  ;;  %v1706_v36 = vadd.f32 %v4303_v50, %v4301_v61  ;;  %v1760_v37 = vmul.f32 %v1711_v8, %v3749_v25  ;;  %v2877_v25 = vld [vmem:[%s5330_s5 + $0xe4] sm:$0xf0]  ;;  %v5519_v61 = vld [vmem:[#allocation24_spill] sm:$0xff]  ;;  %v5520_v52 = vld [vmem:[#allocation25_spill] sm:$0xff] }
 0x28d   :  { %978 = vmatmul.bf16.gmra.mxu2 %v4405_v46  ;;  %v1779_v62 = vsub.f32 %v1743_v14, %v1761_v29  ;;  %v4458_v43 = vpack.c.bf16 %v1774_v59, %v5518_v44  ;;  %v1740_v50 = vmul.f32 %v3978_v1, %v5519_v61  ;;  %v1803_v22 = vmul.f32 %v3978_v1, %v5520_v52 }
 0x28e   :  { %v1780_v41 = vsub.f32 %v1744_v26, %v1762_v23  ;;  %v4450_v4 = vadd.f32 %v1825_v53, %v1807_v6  ;;  %v1758_v14 = vmul.f32 %v1706_v36, %v5520_v52  ;;  %v1821_v32 = vmul.f32 %v1706_v36, %v5519_v61  ;;  %v2831_v36 = vld [vmem:[%s5331_s4 + $0x74] sm:$0xf0] }
 0x28f   :  { %v1778_v16 = vsub.f32 %v1742_v17, %v1760_v37  ;;  %v4482_v57 = vor.u32 %v2877_v25, %v2510_v24  ;;  %v5523_v59 = vsub.f32 %v4330_v49, %v4335_v30  ;;  %v5525_v30 = vsub.f32 %v4276_v38, %v4281_v56  ;;  %v2518_v56 = vld [vmem:[%s5330_s5 + $0xf0] sm:$0xf]  ;;  %v2879_v38 = vld [vmem:[%s5330_s5 + $0xf4] sm:$0xf0] }
 0x290   :  { %v4432_v39 = vpop.f32.mrf.mxu2  ;;  %v4434_v46 = vpop.f32.mrf.mxu3  ;;  %v4480_v6 = vpack.c.bf16 %v1780_v41, %v1779_v62  ;;  %v1776_v1 = vsub.f32 %v1740_v50, %v1758_v14  ;;  %v4484_v23 = vadd.f32 %v1821_v32, %v1803_v22  ;;  %v4511_v24 = vor.u32 %v2831_v36, %v2598_v55  ;;  %v5526_v14 = vld [vmem:[#allocation29_spill] sm:$0xff] }
 0x291   :  { %v1619_v58 = vpop.f32.mrf.mxu0  ;;  %v1718_v12 = vpop.f32.mrf.mxu1  ;;  %5522 = vst [vmem:[#allocation25_spill] sm:$0xff] %v4482_v57  ;;  %v4491_v17 = vpack.c.bf16 %v1778_v16, %v5523_v59  ;;  %v1676_v25 = vadd.f32 %v4065_v45, %v4063_v7  ;;  %v1681_v50 = vadd.f32 %v4096_v51, %v4094_v40  ;;  %v1745_v32 = vmul.f32 %v4049_v20, %v5526_v14  ;;  %v5527_v7 = vld [vmem:[#allocation30_spill] sm:$0xff]  ;;  %v5528_v51 = vld [vmem:[#allocation31_spill] sm:$0xff]  ;;  %v2898_v36 = vld [vmem:[%s5328_s1 + $0x78] sm:$0xff] }
 0x292   :  { %v4509_v49 = vpack.c.bf16 %v1776_v1, %v5525_v30  ;;  %v1719_v52 = vadd.f32 %v1718_v12, %v1619_v58  ;;  %v1808_v45 = vmul.f32 %v4049_v20, %v5527_v7  ;;  %v2896_v12 = vld [vmem:[%s5328_s1 + $0x70] sm:$0xff]  ;;  %v4547_v62 = vor.u32 %v2879_v38, %v2518_v56 }
 0x293   :  { %v1746_v40 = vmul.f32 %v1676_v25, %v3840_v42  ;;  %v1809_v58 = vmul.f32 %v1676_v25, %v5528_v51  ;;  %v1747_v16 = vmul.f32 %v2896_v12, %v4080_v19  ;;  %v1748_v30 = vmul.f32 %v2898_v36, %v1681_v50 }
 0x295   :  { %1313 = vmatmul.bf16.gmra.mxu3 %v4438_v34 }
 0x298   :  { %v4474_v10 = vpop.f32.mrf.mxu2  ;;  %v4476_v27 = vpop.f32.mrf.mxu3 }
 0x299   :  { %5521 = vst [vmem:[#allocation24_spill] sm:$0xff] %v4476_v27  ;;  %v1621_v8 = vpop.f32.mrf.mxu0  ;;  %v1720_v29 = vpop.f32.mrf.mxu1 }
 0x29a   :  { %v1721_v22 = vadd.f32 %v1720_v29, %v1621_v8  ;;  %v2897_v8 = vld [vmem:[%s5329_s2 + $0x70] sm:$0xff] }
 0x29b   :  { %v1810_v29 = vmul.f32 %v2897_v8, %v4080_v19  ;;  %v2899_v19 = vld [vmem:[%s5329_s2 + $0x78] sm:$0xff] }
 0x29d   :  { %983 = vmatmul.bf16.gmra.mxu2 %v4482_v57 }
 0x2a0   :  { %v4500_v37 = vpop.f32.mrf.mxu2  ;;  %v4502_v15 = vpop.f32.mrf.mxu3 }
 0x2a1   :  { %5524 = vst [vmem:[#allocation78_spill] sm:$0xff] %v4502_v15  ;;  %v1624_v41 = vpop.f32.mrf.mxu0  ;;  %v1723_v44 = vpop.f32.mrf.mxu1 }
 0x2a2   :  { %v1724_v61 = vadd.f32 %v1723_v44, %v1624_v41  ;;  %v1763_v41 = vmul.f32 %v1719_v52, %v5527_v7  ;;  %v1826_v44 = vmul.f32 %v1719_v52, %v5526_v14 }
 0x2a4   :  { %v1765_v1 = vmul.f32 %v2897_v8, %v1724_v61  ;;  %v1828_v59 = vmul.f32 %v2896_v12, %v1724_v61  ;;  %v1811_v61 = vmul.f32 %v2899_v19, %v1681_v50  ;;  %v1764_v12 = vmul.f32 %v1721_v22, %v5528_v51  ;;  %v2606_v50 = vld [vmem:[%s5331_s4 + $0x80] sm:$0xf] }
 0x2a5   :  { %1318 = vmatmul.bf16.gmra.mxu3 %v4511_v24  ;;  %v1827_v8 = vmul.f32 %v1721_v22, %v3840_v42  ;;  %v1781_v15 = vsub.f32 %v1745_v32, %v1763_v41  ;;  %v1844_v52 = vadd.f32 %v1826_v44, %v1808_v45  ;;  %v2833_v42 = vld [vmem:[%s5331_s4 + $0x84] sm:$0xf0] }
 0x2a6   :  { %v1783_v26 = vsub.f32 %v1747_v16, %v1765_v1  ;;  %v1846_v57 = vadd.f32 %v1828_v59, %v1810_v29  ;;  %v1782_v56 = vsub.f32 %v1746_v40, %v1764_v12  ;;  %v4565_v40 = vor.u32 %v2833_v42, %v2606_v50 }
 0x2a7   :  { %v1845_v38 = vadd.f32 %v1827_v8, %v1809_v58  ;;  %v1686_v1 = vadd.f32 %v4127_v13, %v4125_v9  ;;  %v2901_v9 = vld [vmem:[%s5329_s2 + $0x80] sm:$0xff]  ;;  %v2902_v8 = vld [vmem:[%s5328_s1 + $0x88] sm:$0xff] }
 0x2a8   :  { %v4538_v55 = vpop.f32.mrf.mxu2  ;;  %v4540_v20 = vpop.f32.mrf.mxu3  ;;  %v1793_v16 = vpack.c.bf16 %v1782_v56, %v1781_v15  ;;  %v2900_v15 = vld [vmem:[%s5328_s1 + $0x80] sm:$0xff] }
 0x2a9   :  { %5529 = vst [vmem:[#allocation29_spill] sm:$0xff] %v4540_v20  ;;  %v1626_v25 = vpop.f32.mrf.mxu0  ;;  %v1725_v0 = vpop.f32.mrf.mxu1  ;;  %v1856_v58 = vpack.c.bf16 %v1845_v38, %v1844_v52  ;;  %v2903_v52 = vld [vmem:[%s5329_s2 + $0x88] sm:$0xff] }
 0x2aa   :  { %v1726_v53 = vadd.f32 %v1725_v0, %v1626_v25  ;;  %v1813_v56 = vmul.f32 %v2903_v52, %v1686_v1 }
 0x2ac   :  { %v1766_v20 = vmul.f32 %v2899_v19, %v1726_v53  ;;  %v1829_v7 = vmul.f32 %v2898_v36, %v1726_v53 }
 0x2ad   :  { %988 = vmatmul.bf16.gmra.mxu2 %v4547_v62 }
 0x2ae   :  { %v1784_v14 = vsub.f32 %v1748_v30, %v1766_v20  ;;  %v1847_v27 = vadd.f32 %v1829_v7, %v1811_v61  ;;  %v5531_v20 = vld [vmem:[#allocation48_spill] sm:$0xff]  ;;  %v1750_v7 = vmul.f32 %v2902_v8, %v1686_v1 }
 0x2af   :  { %v1749_v36 = vmul.f32 %v2900_v15, %v5531_v20  ;;  %v1812_v13 = vmul.f32 %v2901_v9, %v5531_v20  ;;  %v2552_v20 = vld [vmem:[%s5331_s4 + $0x18] sm:$0xf0] }
 0x2b0   :  { %v4561_v0 = vpop.f32.mrf.mxu2  ;;  %v4563_v22 = vpop.f32.mrf.mxu3  ;;  %v1857_v53 = vpack.c.bf16 %v1847_v27, %v1846_v57  ;;  %v1794_v32 = vpack.c.bf16 %v1784_v14, %v1783_v26  ;;  %v2816_v27 = vld [vmem:[%s5331_s4 + $0x4] sm:$0xf]  ;;  %v2544_v26 = vld [vmem:[%s5331_s4 + $0x8] sm:$0xf0]  ;;  %v5532_v14 = vpack.c.bf16 %v4450_v4, %v4448_v5  ;;  %v2614_v5 = vld [vmem:[%s5331_s4 + $0x90] sm:$0xf] }
 0x2b1   :  { %v1629_v45 = vpop.f32.mrf.mxu0  ;;  %v1728_v51 = vpop.f32.mrf.mxu1  ;;  %v5530_v57 = vld [vmem:[#allocation6_spill] sm:$0xff]  ;;  %v2547_v12 = vor.u32 %v2816_v27, %v2544_v26  ;;  %v2835_v4 = vld [vmem:[%s5331_s4 + $0x94] sm:$0xf0] }
 0x2b2   :  { %1859 = vmatpush.bf16.msrb.mxu3 %v1857_v53  ;;  %2037 = vmatpush.bf16.msra.mxu0 %v1794_v32  ;;  %v1729_v29 = vadd.f32 %v1728_v51, %v1629_v45  ;;  %v1004_v59 = vadd.f32 %v5530_v57, %v4180_v28 }
 0x2b4   :  { %v1767_v30 = vmul.f32 %v2901_v9, %v1729_v29  ;;  %v1830_v41 = vmul.f32 %v2900_v15, %v1729_v29  ;;  %v2818_v15 = vld [vmem:[%s5331_s4 + $0x14] sm:$0xf] }
 0x2b5   :  { %1323 = vmatmul.bf16.gmra.mxu3 %v4565_v40 }
 0x2b6   :  { %1860 = vmatpush.bf16.msrb.mxu3 %v1856_v58  ;;  %2038 = vmatpush.bf16.msra.mxu0 %v1793_v16  ;;  %v1785_v50 = vsub.f32 %v1749_v36, %v1767_v30  ;;  %v1848_v42 = vadd.f32 %v1830_v41, %v1812_v13  ;;  %v5533_v58 = vpack.c.bf16 %v4472_v60, %v4348_v18  ;;  %v5535_v16 = vld [vmem:[#allocation34_spill] sm:$0xff]  ;;  %v2837_v41 = vld [vmem:[%s5331_s4 + $0xa4] sm:$0xf0] }
 0x2b7   :  { %v4617_v60 = vor.u32 %v2835_v4, %v2614_v5  ;;  %v5540_v13 = vpack.c.bf16 %v4381_v2, %v4199_v35  ;;  %v5541_v30 = vpack.c.bf16 %v4324_v21, %v4157_v48  ;;  %v5544_v21 = vld [vmem:[#allocation50_spill] sm:$0xff] }
 0x2b8   :  { %v4586_v44 = vpop.f32.mrf.mxu2  ;;  %v1284_v25 = vpop.f32.mrf.mxu3 }
 0x2b9   :  { %v4588_v19 = vadd.f32 %v1284_v25, %v1004_v59  ;;  %v1631_v28 = vpop.f32.mrf.mxu0  ;;  %v1730_v61 = vpop.f32.mrf.mxu1  ;;  %v5537_v59 = vpack.c.bf16 %v4436_v54, %v4243_v11  ;;  %v2555_v54 = vor.u32 %v2818_v15, %v2552_v20  ;;  %v5542_v25 = vld [vmem:[#allocation59_spill] sm:$0xff] }
 0x2ba   :  { %v1731_v38 = vadd.f32 %v1730_v61, %v1631_v28  ;;  %1861 = vmatpush.bf16.msrb.mxu3 %v5532_v14  ;;  %2039 = vmatpush.bf16.msra.mxu0 %v4480_v6  ;;  %v5534_v6 = vld [vmem:[#allocation53_spill] sm:$0xff]  ;;  %v5543_v28 = vld [vmem:[#allocation36_spill] sm:$0xff] }
 0x2bb   :  { %v1006_v29 = vadd.f32 %v5535_v16, %v5534_v6  ;;  %v1011_v35 = vadd.f32 %v5543_v28, %v5542_v25  ;;  %v5549_v16 = vld [vmem:[#allocation52_spill] sm:$0xff]  ;;  %v2576_v25 = vld [vmem:[%s5331_s4 + $0x48] sm:$0xf0]  ;;  %v5554_v28 = vld [vmem:[#allocation14_spill] sm:$0xff] }
 0x2bc   :  { %v1768_v53 = vmul.f32 %v2903_v52, %v1731_v38  ;;  %v1831_v32 = vmul.f32 %v2902_v8, %v1731_v38  ;;  %v2560_v8 = vld [vmem:[%s5331_s4 + $0x28] sm:$0xf0] }
 0x2bd   :  { %2668 = vmatmul.msk.bf16.vlgmr.msra.gmra.mxu2 %vm856_vm0, %v2547_v12 }
 0x2be   :  { %v1786_v45 = vsub.f32 %v1750_v7, %v1768_v53  ;;  %v1849_v51 = vadd.f32 %v1831_v32, %v1813_v56  ;;  %1862 = vmatpush.bf16.msrb.mxu3 %v5533_v58  ;;  %2040 = vmatpush.bf16.msra.mxu0 %v4491_v17  ;;  %v5536_v17 = vpack.c.bf16 %v4484_v23, %v4287_v31  ;;  %v5538_v31 = vld [vmem:[#allocation56_spill] sm:$0xff]  ;;  %v5546_v7 = vld [vmem:[#allocation10_spill] sm:$0xff]  ;;  %v2839_v53 = vld [vmem:[%s5331_s4 + $0xb4] sm:$0xf0] }
 0x2bf   :  { %v5539_v23 = vld [vmem:[#allocation8_spill] sm:$0xff]  ;;  %v5547_v32 = vld [vmem:[#allocation65_spill] sm:$0xff] }
 0x2c0   :  { %v4613_v1 = vpop.f32.mrf.mxu2  ;;  %v1286_v27 = vpop.f32.mrf.mxu3  ;;  %v1858_v26 = vpack.c.bf16 %v1849_v51, %v1848_v42  ;;  %v1795_v57 = vpack.c.bf16 %v1786_v45, %v1785_v50  ;;  %v2630_v42 = vld [vmem:[%s5331_s4 + $0xb0] sm:$0xf]  ;;  %v5548_v45 = vld [vmem:[#allocation38_spill] sm:$0xff] }
 0x2c1   :  { %v4615_v18 = vadd.f32 %v1286_v27, %v1006_v29  ;;  %v1016_v51 = vadd.f32 %v5548_v45, %v5547_v32  ;;  %v4692_v6 = vor.u32 %v2839_v53, %v2630_v42  ;;  %v2822_v29 = vld [vmem:[%s5331_s4 + $0x34] sm:$0xf]  ;;  %v2568_v27 = vld [vmem:[%s5331_s4 + $0x38] sm:$0xf0] }
 0x2c2   :  { %1863 = vmatpush.bf16.msrb.mxu3 %v5536_v17  ;;  %1955 = vmatpush.bf16.msrb.mxu2 %v1858_v26  ;;  %v5550_v26 = vld [vmem:[#allocation12_spill] sm:$0xff]  ;;  %v2571_v20 = vor.u32 %v2822_v29, %v2568_v27 }
 0x2c3   :  { %2041 = vmatpush.bf16.msra.mxu0 %v4509_v49  ;;  %2133 = vmatpush.bf16.msra.mxu1 %v1795_v57  ;;  %v1009_v49 = vadd.f32 %v5539_v23, %v5538_v31  ;;  %v1019_v57 = vadd.f32 %v5550_v26, %v4320_v33  ;;  %v2638_v31 = vld [vmem:[%s5331_s4 + $0xc0] sm:$0xf]  ;;  %v2841_v23 = vld [vmem:[%s5331_s4 + $0xc4] sm:$0xf0]  ;;  %v5558_v29 = vld [vmem:[#allocation16_spill] sm:$0xff] }
 0x2c4   :  { %v1029_v27 = vadd.f32 %v5558_v29, %v4432_v39  ;;  %v5563_v29 = vld [vmem:[#allocation74_spill] sm:$0xff] }
 0x2c5   :  { %1328 = vmatmul.bf16.gmra.mxu3 %v4617_v60 }
 0x2c6   :  { %1864 = vmatpush.bf16.msrb.mxu3 %v5537_v59  ;;  %2732 = vmatmul.msk.bf16.vlgmr.msra.gmra.mxu1 %vm856_vm0, %v2547_v12  ;;  %v2820_v12 = vld [vmem:[%s5331_s4 + $0x24] sm:$0xf] }
 0x2c7   :  { %2042 = vmatpush.bf16.msra.mxu0 %v4458_v43  ;;  %v2622_v43 = vld [vmem:[%s5331_s4 + $0xa0] sm:$0xf]  ;;  %v2563_v50 = vor.u32 %v2820_v12, %v2560_v8 }
 0x2c8   :  { %v4637_v36 = vpop.f32.mrf.mxu2  ;;  %v1289_v9 = vpop.f32.mrf.mxu3  ;;  %v4662_v48 = vor.u32 %v2837_v41, %v2622_v43  ;;  %v5552_v43 = vld [vmem:[#allocation58_spill] sm:$0xff] }
 0x2c9   :  { %v4639_v11 = vadd.f32 %v1289_v9, %v1009_v49  ;;  %v5551_v49 = vld [vmem:[#allocation40_spill] sm:$0xff]  ;;  %v2824_v41 = vld [vmem:[%s5331_s4 + $0x44] sm:$0xf] }
 0x2ca   :  { %1865 = vmatpush.bf16.msrb.mxu3 %v5540_v13  ;;  %v1021_v9 = vadd.f32 %v5551_v49, %v4356_v3  ;;  %v5553_v3 = vld [vmem:[#allocation72_spill] sm:$0xff]  ;;  %v2579_v8 = vor.u32 %v2824_v41, %v2576_v25  ;;  %v5560_v25 = vld [vmem:[#allocation69_spill] sm:$0xff] }
 0x2cb   :  { %2043 = vmatpush.bf16.msra.mxu0 %v4391_v63  ;;  %v5559_v49 = vld [vmem:[#allocation44_spill] sm:$0xff] }
 0x2cd   :  { %2669 = vmatmul.msk.bf16.gmra.mxu2 %vm856_vm0, %v2555_v54 }
 0x2ce   :  { %1866 = vmatpush.bf16.msrb.mxu3 %v5541_v30  ;;  %v4722_v30 = vor.u32 %v2841_v23, %v2638_v31  ;;  %v2654_v31 = vld [vmem:[%s5331_s4 + $0xe0] sm:$0xf]  ;;  %v2845_v23 = vld [vmem:[%s5331_s4 + $0xe4] sm:$0xf0] }
 0x2cf   :  { %2044 = vmatpush.bf16.msra.mxu0 %v4344_v47  ;;  %v5545_v47 = vld [vmem:[#allocation62_spill] sm:$0xff]  ;;  %v4782_v41 = vor.u32 %v2845_v23, %v2654_v31 }
 0x2d0   :  { %v4658_v63 = vpop.f32.mrf.mxu2  ;;  %v1291_v2 = vpop.f32.mrf.mxu3  ;;  %v1014_v52 = vadd.f32 %v5546_v7, %v5545_v47  ;;  %v2646_v47 = vld [vmem:[%s5331_s4 + $0xd0] sm:$0xf]  ;;  %v2843_v7 = vld [vmem:[%s5331_s4 + $0xd4] sm:$0xf0] }
 0x2d1   :  { %v4660_v61 = vadd.f32 %v1291_v2, %v1011_v35  ;;  %v1024_v35 = vadd.f32 %v5554_v28, %v5553_v3  ;;  %v4752_v45 = vor.u32 %v2843_v7, %v2646_v47  ;;  %v2828_v3 = vld [vmem:[%s5331_s4 + $0x64] sm:$0xf]  ;;  %v2592_v28 = vld [vmem:[%s5331_s4 + $0x68] sm:$0xf0] }
 0x2d2   :  { %2045 = vmatmul.bf16.vlgmr.msra.gmra.mxu0 %v5544_v21  ;;  %v2595_v7 = vor.u32 %v2828_v3, %v2592_v28 }
 0x2d5   :  { %1333 = vmatmul.bf16.gmra.mxu3 %v4662_v48 }
 0x2d6   :  { %2733 = vmatmul.msk.bf16.gmra.mxu1 %vm856_vm0, %v2555_v54 }
 0x2d8   :  { %v4675_v56 = vpop.f32.mrf.mxu2  ;;  %v1294_v38 = vpop.f32.mrf.mxu3 }
 0x2d9   :  { %v4677_v14 = vadd.f32 %v1294_v38, %v1014_v52  ;;  %v5555_v52 = vld [vmem:[#allocation75_spill] sm:$0xff]  ;;  %v5556_v38 = vld [vmem:[#allocation42_spill] sm:$0xff] }
 0x2dd   :  { %2670 = vmatmul.msk.bf16.gmra.mxu2 %vm856_vm0, %v2563_v50 }
 0x2e0   :  { %v4688_v58 = vpop.f32.mrf.mxu2  ;;  %v1296_v5 = vpop.f32.mrf.mxu3 }
 0x2e1   :  { %v4690_v4 = vadd.f32 %v1296_v5, %v1016_v51  ;;  %v5557_v51 = vld [vmem:[#allocation64_spill] sm:$0xff] }
 0x2e2   :  { %2050 = vmatmul.bf16.gmra.mxu0 %v5549_v16  ;;  %v2826_v5 = vld [vmem:[%s5331_s4 + $0x54] sm:$0xf]  ;;  %v2584_v16 = vld [vmem:[%s5331_s4 + $0x58] sm:$0xf0] }
 0x2e5   :  { %1338 = vmatmul.bf16.gmra.mxu3 %v4692_v6 }
 0x2e6   :  { %2734 = vmatmul.msk.bf16.gmra.mxu1 %vm856_vm0, %v2563_v50  ;;  %v1026_v50 = vadd.f32 %v5556_v38, %v5555_v52  ;;  %v2662_v52 = vld [vmem:[%s5331_s4 + $0xf0] sm:$0xf]  ;;  %v2847_v38 = vld [vmem:[%s5331_s4 + $0xf4] sm:$0xf0] }
 0x2e8   :  { %v4705_v17 = vpop.f32.mrf.mxu2  ;;  %v1299_v59 = vpop.f32.mrf.mxu3 }
 0x2e9   :  { %v4707_v15 = vadd.f32 %v1299_v59, %v1019_v57 }
 0x2ed   :  { %2671 = vmatmul.msk.bf16.gmra.mxu2 %vm856_vm0, %v2571_v20 }
 0x2f0   :  { %v4718_v33 = vpop.f32.mrf.mxu2  ;;  %v1301_v54 = vpop.f32.mrf.mxu3 }
 0x2f1   :  { %v4720_v13 = vadd.f32 %v1301_v54, %v1021_v9  ;;  %v1031_v9 = vadd.f32 %v5559_v49, %v4474_v10  ;;  %v5561_v10 = vld [vmem:[#allocation18_spill] sm:$0xff] }
 0x2f2   :  { %2055 = vmatmul.bf16.gmra.mxu0 %v5552_v43 }
 0x2f5   :  { %1343 = vmatmul.bf16.gmra.mxu3 %v4722_v30 }
 0x2f6   :  { %2735 = vmatmul.msk.bf16.gmra.mxu1 %vm856_vm0, %v2571_v20  ;;  %v2587_v20 = vor.u32 %v2826_v5, %v2584_v16  ;;  %v4812_v16 = vor.u32 %v2847_v38, %v2662_v52 }
 0x2f8   :  { %v4735_v2 = vpop.f32.mrf.mxu2  ;;  %v1304_v21 = vpop.f32.mrf.mxu3 }
 0x2f9   :  { %v4737_v12 = vadd.f32 %v1304_v21, %v1024_v35  ;;  %v1034_v35 = vadd.f32 %v5561_v10, %v4500_v37 }
 0x2fd   :  { %2672 = vmatmul.msk.bf16.gmra.mxu2 %vm856_vm0, %v2579_v8 }
 0x300   :  { %v4748_v42 = vpop.f32.mrf.mxu2  ;;  %v1306_v53 = vpop.f32.mrf.mxu3 }
 0x301   :  { %v4750_v32 = vadd.f32 %v1306_v53, %v1026_v50  ;;  %v5562_v50 = vld [vmem:[#allocation46_spill] sm:$0xff] }
 0x302   :  { %2060 = vmatmul.bf16.gmra.mxu0 %v5557_v51  ;;  %v1036_v53 = vadd.f32 %v5562_v50, %v4538_v55  ;;  %v5564_v55 = vld [vmem:[#allocation2_spill] sm:$0xff] }
 0x305   :  { %1348 = vmatmul.bf16.gmra.mxu3 %v4752_v45 }
 0x306   :  { %2736 = vmatmul.msk.bf16.gmra.mxu1 %vm856_vm0, %v2579_v8 }
 0x308   :  { %v4765_v26 = vpop.f32.mrf.mxu2  ;;  %v1309_v57 = vpop.f32.mrf.mxu3 }
 0x309   :  { %v4767_v59 = vadd.f32 %v1309_v57, %v1029_v27  ;;  %v2830_v27 = vld [vmem:[%s5331_s4 + $0x74] sm:$0xf]  ;;  %v2600_v57 = vld [vmem:[%s5331_s4 + $0x78] sm:$0xf0] }
 0x30d   :  { %2673 = vmatmul.msk.bf16.gmra.mxu2 %vm856_vm0, %v2587_v20 }
 0x310   :  { %v4778_v39 = vpop.f32.mrf.mxu2  ;;  %v1311_v54 = vpop.f32.mrf.mxu3 }
 0x311   :  { %v4780_v43 = vadd.f32 %v1311_v54, %v1031_v9  ;;  %v2603_v9 = vor.u32 %v2830_v27, %v2600_v57  ;;  %v5565_v54 = vld [vmem:[#allocation49_spill] sm:$0xff] }
 0x312   :  { %2065 = vmatmul.bf16.gmra.mxu0 %v5560_v25  ;;  %v1041_v25 = vadd.f32 %v5565_v54, %v4586_v44  ;;  %v5567_v44 = vld [vmem:[#allocation4_spill] sm:$0xff] }
 0x315   :  { %1353 = vmatmul.bf16.gmra.mxu3 %v4782_v41 }
 0x316   :  { %2737 = vmatmul.msk.bf16.gmra.mxu1 %vm856_vm0, %v2587_v20  ;;  %v1039_v20 = vadd.f32 %v5564_v55, %v4561_v0  ;;  %v2832_v0 = vld [vmem:[%s5331_s4 + $0x84] sm:$0xf] }
 0x318   :  { %v4795_v21 = vpop.f32.mrf.mxu2  ;;  %v1314_v8 = vpop.f32.mrf.mxu3 }
 0x319   :  { %v4797_v47 = vadd.f32 %v1314_v8, %v1034_v35  ;;  %v5566_v35 = vld [vmem:[#allocation7_spill] sm:$0xff] }
 0x31a   :  { %v2608_v8 = vld [vmem:[%s5331_s4 + $0x88] sm:$0xf0] }
 0x31d   :  { %2674 = vmatmul.msk.bf16.gmra.mxu2 %vm856_vm0, %v2595_v7 }
 0x320   :  { %v4808_v37 = vpop.f32.mrf.mxu2  ;;  %v1316_v51 = vpop.f32.mrf.mxu3 }
 0x321   :  { %v4810_v5 = vadd.f32 %v1316_v51, %v1036_v53  ;;  %v5568_v53 = vld [vmem:[#allocation51_spill] sm:$0xff] }
 0x322   :  { %2070 = vmatmul.bf16.gmra.mxu0 %v5563_v29  ;;  %v1046_v51 = vadd.f32 %v5568_v53, %v4637_v36  ;;  %v2834_v36 = vld [vmem:[%s5331_s4 + $0x94] sm:$0xf] }
 0x325   :  { %1358 = vmatmul.bf16.gmra.mxu3 %v4812_v16 }
 0x326   :  { %2738 = vmatmul.msk.bf16.gmra.mxu1 %vm856_vm0, %v2595_v7  ;;  %v1044_v7 = vadd.f32 %v5567_v44, %v4613_v1  ;;  %v5569_v1 = vld [vmem:[#allocation9_spill] sm:$0xff] }
 0x328   :  { %v4825_v31 = vpop.f32.mrf.mxu2  ;;  %v1319_v23 = vpop.f32.mrf.mxu3 }
 0x329   :  { %v4827_v49 = vadd.f32 %v1319_v23, %v1039_v20  ;;  %v2616_v20 = vld [vmem:[%s5331_s4 + $0x98] sm:$0xf0] }
 0x32d   :  { %2675 = vmatmul.msk.bf16.gmra.mxu2 %vm856_vm0, %v2603_v9 }
 0x330   :  { %v4832_v3 = vpop.f32.mrf.mxu2  ;;  %v1321_v28 = vpop.f32.mrf.mxu3 }
 0x331   :  { %v4834_v10 = vadd.f32 %v1321_v28, %v1041_v25  ;;  %v2619_v28 = vor.u32 %v2834_v36, %v2616_v20 }
 0x332   :  { %2075 = vmatmul.bf16.gmra.mxu0 %v4438_v34  ;;  %v2611_v34 = vor.u32 %v2832_v0, %v2608_v8 }
 0x335   :  { %1867 = vmatmul.bf16.vlgmr.msrb.gmra.mxu3 %v5566_v35  ;;  %v5571_v35 = vld [vmem:[#allocation57_spill] sm:$0xff] }
 0x336   :  { %2739 = vmatmul.msk.bf16.gmra.mxu1 %vm856_vm0, %v2603_v9  ;;  %v1051_v0 = vadd.f32 %v5571_v35, %v4675_v56  ;;  %v2624_v56 = vld [vmem:[%s5331_s4 + $0xa8] sm:$0xf0] }
 0x338   :  { %v4847_v52 = vpop.f32.mrf.mxu2  ;;  %v1324_v38 = vpop.f32.mrf.mxu3 }
 0x339   :  { %v4849_v50 = vadd.f32 %v1324_v38, %v1044_v7  ;;  %v2836_v38 = vld [vmem:[%s5331_s4 + $0xa4] sm:$0xf] }
 0x33d   :  { %2676 = vmatmul.msk.bf16.gmra.mxu2 %vm856_vm0, %v2611_v34 }
 0x340   :  { %v1326_v29 = vpop.f32.mrf.mxu3  ;;  %v1373_v27 = vpop.f32.mrf.mxu2 }
 0x341   :  { %v4854_v57 = vadd.f32 %v1326_v29, %v1046_v51  ;;  %v1374_v55 = vadd.f32 %v1373_v27, %v4588_v19  ;;  %v5570_v19 = vld [vmem:[#allocation54_spill] sm:$0xff]  ;;  %v2627_v27 = vor.u32 %v2836_v38, %v2624_v56 }
 0x342   :  { %2080 = vmatmul.bf16.gmra.mxu0 %v4511_v24  ;;  %v1049_v24 = vadd.f32 %v5570_v19, %v4658_v63  ;;  %v2840_v38 = vld [vmem:[%s5331_s4 + $0xc4] sm:$0xf] }
 0x343   :  { %1454 = vst.msk [vmem:[%s5332_s6] sm:$0xff] %vm1453_vm1, %v1374_v55  ;;  %v5574_v55 = vld [vmem:[#allocation63_spill] sm:$0xff] }
 0x345   :  { %1872 = vmatmul.bf16.gmra.mxu3 %v5569_v1  ;;  %v1056_v1 = vadd.f32 %v5574_v55, %v4705_v17  ;;  %v2632_v17 = vld [vmem:[%s5331_s4 + $0xb8] sm:$0xf0] }
 0x346   :  { %2740 = vmatmul.msk.bf16.gmra.mxu1 %vm856_vm0, %v2611_v34 }
 0x348   :  { %v1329_v23 = vpop.f32.mrf.mxu3  ;;  %v1375_v9 = vpop.f32.mrf.mxu2 }
 0x349   :  { %v4872_v54 = vadd.f32 %v1329_v23, %v1049_v24  ;;  %v1376_v25 = vadd.f32 %v1375_v9, %v4615_v18  ;;  %v5572_v18 = vld [vmem:[#allocation11_spill] sm:$0xff]  ;;  %v2838_v24 = vld [vmem:[%s5331_s4 + $0xb4] sm:$0xf] }
 0x34a   :  { %v2635_v35 = vor.u32 %v2838_v24, %v2632_v17 }
 0x34b   :  { %1455 = vst.msk [vmem:[%s5332_s6 + $0x8] sm:$0xff] %vm1453_vm1, %v1376_v25 }
 0x34d   :  { %2677 = vmatmul.msk.bf16.gmra.mxu2 %vm856_vm0, %v2619_v28 }
 0x350   :  { %v1331_v8 = vpop.f32.mrf.mxu3  ;;  %v1378_v44 = vpop.f32.mrf.mxu2 }
 0x351   :  { %v4882_v63 = vadd.f32 %v1331_v8, %v1051_v0  ;;  %v1379_v7 = vadd.f32 %v1378_v44, %v4639_v11  ;;  %v5573_v11 = vld [vmem:[#allocation60_spill] sm:$0xff] }
 0x352   :  { %2085 = vmatmul.bf16.gmra.mxu0 %v4565_v40  ;;  %v1054_v40 = vadd.f32 %v5573_v11, %v4688_v58  ;;  %v5577_v0 = vld [vmem:[#allocation68_spill] sm:$0xff] }
 0x353   :  { %1456 = vst.msk [vmem:[%s5332_s6 + $0x10] sm:$0xff] %vm1453_vm1, %v1379_v7  ;;  %v1061_v8 = vadd.f32 %v5577_v0, %v4735_v2  ;;  %v2640_v2 = vld [vmem:[%s5331_s4 + $0xc8] sm:$0xf0] }
 0x355   :  { %1877 = vmatmul.bf16.gmra.mxu3 %v5572_v18 }
 0x356   :  { %2741 = vmatmul.msk.bf16.gmra.mxu1 %vm856_vm0, %v2619_v28 }
 0x358   :  { %v1334_v34 = vpop.f32.mrf.mxu3  ;;  %v1380_v53 = vpop.f32.mrf.mxu2 }
 0x359   :  { %v4900_v51 = vadd.f32 %v1334_v34, %v1054_v40  ;;  %v1381_v29 = vadd.f32 %v1380_v53, %v4660_v61  ;;  %v5575_v61 = vld [vmem:[#allocation13_spill] sm:$0xff]  ;;  %v4959_v53 = vor.u32 %v2840_v38, %v2640_v2 }
 0x35b   :  { %1457 = vst.msk [vmem:[%s5332_s6 + $0x18] sm:$0xff] %vm1453_vm1, %v1381_v29  ;;  %v5580_v29 = vld [vmem:[#allocation73_spill] sm:$0xff] }
 0x35d   :  { %2678 = vmatmul.msk.bf16.gmra.mxu2 %vm856_vm0, %v2627_v27 }
 0x360   :  { %v1336_v36 = vpop.f32.mrf.mxu3  ;;  %v1383_v20 = vpop.f32.mrf.mxu2 }
 0x361   :  { %v4910_v58 = vadd.f32 %v1336_v36, %v1056_v1  ;;  %v1384_v19 = vadd.f32 %v1383_v20, %v4677_v14  ;;  %v5576_v14 = vld [vmem:[#allocation66_spill] sm:$0xff]  ;;  %v2842_v20 = vld [vmem:[%s5331_s4 + $0xd4] sm:$0xf] }
 0x362   :  { %2090 = vmatmul.bf16.gmra.mxu0 %v4617_v60  ;;  %v1059_v60 = vadd.f32 %v5576_v14, %v4718_v33 }
 0x363   :  { %1458 = vst.msk [vmem:[%s5332_s6 + $0x20] sm:$0xff] %vm1453_vm1, %v1384_v19  ;;  %v5582_v19 = vld [vmem:[#allocation76_spill] sm:$0xff] }
 0x365   :  { %1882 = vmatmul.bf16.gmra.mxu3 %v5575_v61 }
 0x366   :  { %2742 = vmatmul.msk.bf16.gmra.mxu1 %vm856_vm0, %v2627_v27  ;;  %v1066_v27 = vadd.f32 %v5580_v29, %v4765_v26  ;;  %v2648_v26 = vld [vmem:[%s5331_s4 + $0xd8] sm:$0xf0] }
 0x367   :  { %v4989_v14 = vor.u32 %v2842_v20, %v2648_v26  ;;  %v5589_v26 = vld [vmem:[#allocation20_spill] sm:$0xff] }
 0x368   :  { %v1339_v23 = vpop.f32.mrf.mxu3  ;;  %v1385_v9 = vpop.f32.mrf.mxu2 }
 0x369   :  { %v4928_v25 = vadd.f32 %v1339_v23, %v1059_v60  ;;  %v1386_v28 = vadd.f32 %v1385_v9, %v4690_v4  ;;  %v5578_v4 = vld [vmem:[#allocation15_spill] sm:$0xff]  ;;  %v1071_v60 = vadd.f32 %v4434_v46, %v4795_v21  ;;  %v5584_v21 = vld [vmem:[#allocation24_spill] sm:$0xff] }
 0x36a   :  { %v2656_v46 = vld [vmem:[%s5331_s4 + $0xe8] sm:$0xf0]  ;;  %v1074_v0 = vadd.f32 %v5584_v21, %v4808_v37 }
 0x36b   :  { %1459 = vst.msk [vmem:[%s5332_s6 + $0x28] sm:$0xff] %vm1453_vm1, %v1386_v28  ;;  %v5595_v21 = vld [vmem:[#allocation23_spill] sm:$0xff] }
 0x36d   :  { %2679 = vmatmul.msk.bf16.gmra.mxu2 %vm856_vm0, %v2635_v35 }
 0x370   :  { %v1341_v44 = vpop.f32.mrf.mxu3  ;;  %v1388_v7 = vpop.f32.mrf.mxu2 }
 0x371   :  { %v4938_v33 = vadd.f32 %v1341_v44, %v1061_v8  ;;  %v1389_v18 = vadd.f32 %v1388_v7, %v4707_v15  ;;  %v5579_v15 = vld [vmem:[#allocation70_spill] sm:$0xff] }
 0x372   :  { %2095 = vmatmul.bf16.gmra.mxu0 %v4662_v48  ;;  %v1064_v48 = vadd.f32 %v5579_v15, %v4748_v42 }
 0x373   :  { %1460 = vst.msk [vmem:[%s5332_s6 + $0x30] sm:$0xff] %vm1453_vm1, %v1389_v18 }
 0x375   :  { %1887 = vmatmul.bf16.gmra.mxu3 %v5578_v4  ;;  %v5585_v4 = vld [vmem:[#allocation78_spill] sm:$0xff] }
 0x376   :  { %2743 = vmatmul.msk.bf16.gmra.mxu1 %vm856_vm0, %v2635_v35  ;;  %v2844_v35 = vld [vmem:[%s5331_s4 + $0xe4] sm:$0xf]  ;;  %v1076_v38 = vadd.f32 %v5585_v4, %v4825_v31  ;;  %v2664_v31 = vld [vmem:[%s5331_s4 + $0xf8] sm:$0xf0] }
 0x377   :  { %v5018_v18 = vor.u32 %v2844_v35, %v2656_v46  ;;  %v5594_v35 = vld [vmem:[#allocation67_spill] sm:$0xff] }
 0x378   :  { %v1344_v56 = vpop.f32.mrf.mxu3  ;;  %v1390_v11 = vpop.f32.mrf.mxu2 }
 0x379   :  { %v4956_v40 = vadd.f32 %v1344_v56, %v1064_v48  ;;  %v1391_v34 = vadd.f32 %v1390_v11, %v4720_v13  ;;  %v5581_v13 = vld [vmem:[#allocation17_spill] sm:$0xff]  ;;  %v2846_v56 = vld [vmem:[%s5331_s4 + $0xf4] sm:$0xf] }
 0x37a   :  { %v5587_v11 = vld [vmem:[#allocation29_spill] sm:$0xff] }
 0x37b   :  { %1461 = vst.msk [vmem:[%s5332_s6 + $0x38] sm:$0xff] %vm1453_vm1, %v1391_v34  ;;  %v1079_v34 = vadd.f32 %v5587_v11, %v4832_v3  ;;  %v5588_v3 = vld [vmem:[#allocation5_spill] sm:$0xff] }
 0x37d   :  { %2680 = vmatmul.msk.bf16.gmra.mxu2 %vm856_vm0, %v4959_v53 }
 0x380   :  { %v1346_v42 = vpop.f32.mrf.mxu3  ;;  %v1393_v55 = vpop.f32.mrf.mxu2 }
 0x381   :  { %v4969_v1 = vadd.f32 %v1346_v42, %v1066_v27  ;;  %v1394_v36 = vadd.f32 %v1393_v55, %v4737_v12  ;;  %v1069_v12 = vadd.f32 %v5582_v19, %v4778_v39  ;;  %v5047_v55 = vor.u32 %v2846_v56, %v2664_v31  ;;  %v5598_v56 = vld [vmem:[#allocation28_spill] sm:$0xff]  ;;  %v2135_v31 = vpop.f32.mrf.mxu1 }
 0x382   :  { %2100 = vmatmul.bf16.gmra.mxu0 %v4692_v6 }
 0x383   :  { %1462 = vst.msk [vmem:[%s5332_s6 + $0x40] sm:$0xff] %vm1453_vm1, %v1394_v36 }
 0x385   :  { %1892 = vmatmul.bf16.gmra.mxu3 %v5581_v13 }
 0x388   :  { %v1349_v61 = vpop.f32.mrf.mxu3  ;;  %v1395_v6 = vpop.f32.mrf.mxu2 }
 0x389   :  { %v4986_v24 = vadd.f32 %v1349_v61, %v1069_v12  ;;  %v1396_v17 = vadd.f32 %v1395_v6, %v4750_v32  ;;  %v5583_v32 = vld [vmem:[#allocation19_spill] sm:$0xff]  ;;  %v5591_v6 = vld [vmem:[#allocation21_spill] sm:$0xff] }
 0x38a   :  { %v5590_v12 = vld [vmem:[#allocation55_spill] sm:$0xff] }
 0x38b   :  { %1463 = vst.msk [vmem:[%s5332_s6 + $0x48] sm:$0xff] %vm1453_vm1, %v1396_v17 }
 0x38d   :  { %2681 = vmatmul.msk.bf16.gmra.mxu2 %vm856_vm0, %v4989_v14 }
 0x390   :  { %v1351_v39 = vpop.f32.mrf.mxu3  ;;  %v1398_v23 = vpop.f32.mrf.mxu2 }
 0x391   :  { %v4999_v9 = vadd.f32 %v1351_v39, %v1071_v60  ;;  %v1399_v28 = vadd.f32 %v1398_v23, %v4767_v59  ;;  %v5592_v60 = vld [vmem:[#allocation61_spill] sm:$0xff]  ;;  %v5593_v23 = vld [vmem:[#allocation22_spill] sm:$0xff] }
 0x393   :  { %1464 = vst.msk [vmem:[%s5332_s6 + $0x50] sm:$0xff] %vm1453_vm1, %v1399_v28 }
 0x395   :  { %1897 = vmatmul.bf16.gmra.mxu3 %v5583_v32 }
 0x398   :  { %v1354_v8 = vpop.f32.mrf.mxu3  ;;  %v1400_v59 = vpop.f32.mrf.mxu2 }
 0x399   :  { %v5015_v44 = vadd.f32 %v1354_v8, %v1074_v0  ;;  %v1401_v7 = vadd.f32 %v1400_v59, %v4780_v43  ;;  %v5586_v43 = vld [vmem:[#allocation3_spill] sm:$0xff] }
 0x39b   :  { %1465 = vst.msk [vmem:[%s5332_s6 + $0x58] sm:$0xff] %vm1453_vm1, %v1401_v7 }
 0x39d   :  { %2682 = vmatmul.msk.bf16.gmra.mxu2 %vm856_vm0, %v5018_v18 }
 0x3a0   :  { %v1356_v37 = vpop.f32.mrf.mxu3  ;;  %v1403_v2 = vpop.f32.mrf.mxu2 }
 0x3a1   :  { %v5028_v15 = vadd.f32 %v1356_v37, %v1076_v38  ;;  %v1404_v48 = vadd.f32 %v1403_v2, %v4797_v47 }
 0x3a3   :  { %1466 = vst.msk [vmem:[%s5332_s6 + $0x60] sm:$0xff] %vm1453_vm1, %v1404_v48 }
 0x3a5   :  { %1902 = vmatmul.bf16.gmra.mxu3 %v5586_v43  ;;  %v2046_v43 = vpop.f32.mrf.mxu0 }
 0x3a8   :  { %v1359_v29 = vpop.f32.mrf.mxu3  ;;  %v1405_v47 = vpop.f32.mrf.mxu2 }
 0x3a9   :  { %v5044_v27 = vadd.f32 %v1359_v29, %v1079_v34  ;;  %v1406_v42 = vadd.f32 %v1405_v47, %v4810_v5  ;;  %v5599_v29 = vld [vmem:[#allocation71_spill] sm:$0xff]  ;;  %v2137_v47 = vpop.f32.mrf.mxu1  ;;  %2744 = vmatmul.msk.bf16.gmra.mxu1 %vm856_vm0, %v4959_v53 }
 0x3ab   :  { %1467 = vst.msk [vmem:[%s5332_s6 + $0x68] sm:$0xff] %vm1453_vm1, %v1406_v42 }
 0x3ad   :  { %2683 = vmatmul.msk.bf16.gmra.mxu2 %vm856_vm0, %v5047_v55 }
 0x3b0   :  { %v1408_v36 = vpop.f32.mrf.mxu2  ;;  %v1361_v32 = vpop.f32.mrf.mxu3 }
 0x3b1   :  { %v1409_v13 = vadd.f32 %v1408_v36, %v4827_v49 }
 0x3b3   :  { %1468 = vst.msk [vmem:[%s5332_s6 + $0x70] sm:$0xff] %vm1453_vm1, %v1409_v13 }
 0x3b5   :  { %1907 = vmatmul.bf16.gmra.mxu3 %v5588_v3  ;;  %v5600_v3 = vld [vmem:[#allocation32_spill] sm:$0xff] }
 0x3b8   :  { %v1410_v5 = vpop.f32.mrf.mxu2 }
 0x3b9   :  { %v1411_v20 = vadd.f32 %v1410_v5, %v4834_v10  ;;  %v2140_v5 = vpop.f32.mrf.mxu1 }
 0x3bb   :  { %1469 = vst.msk [vmem:[%s5332_s6 + $0x78] sm:$0xff] %vm1453_vm1, %v1411_v20 }
 0x3bd   :  { %2716 = vmatmul.msk.bf16.vlgmr.msrb.gmra.mxu2 %vm856_vm0, %v5589_v26 }
 0x3c0   :  { %v1413_v19 = vpop.f32.mrf.mxu2 }
 0x3c1   :  { %v1414_v49 = vadd.f32 %v1413_v19, %v4849_v50  ;;  %v5601_v19 = vld [vmem:[#allocation77_spill] sm:$0xff] }
 0x3c3   :  { %1470 = vst.msk [vmem:[%s5332_s6 + $0x80] sm:$0xff] %vm1453_vm1, %v1414_v49  ;;  %v2142_v49 = vpop.f32.mrf.mxu1  ;;  %2745 = vmatmul.msk.bf16.gmra.mxu1 %vm856_vm0, %v4989_v14 }
 0x3c5   :  { %1912 = vmatmul.bf16.gmra.mxu3 %v5590_v12 }
 0x3c8   :  { %v1415_v61 = vpop.f32.mrf.mxu2 }
 0x3c9   :  { %v1416_v10 = vadd.f32 %v1415_v61, %v4854_v57 }
 0x3cb   :  { %1471 = vst.msk [vmem:[%s5332_s6 + $0x88] sm:$0xff] %vm1453_vm1, %v1416_v10 }
 0x3cd   :  { %2717 = vmatmul.msk.bf16.gmra.mxu2 %vm856_vm0, %v5591_v6 }
 0x3d0   :  { %v1418_v17 = vpop.f32.mrf.mxu2 }
 0x3d1   :  { %v1419_v50 = vadd.f32 %v1418_v17, %v4872_v54  ;;  %v5602_v17 = vld [vmem:[#allocation33_spill] sm:$0xff] }
 0x3d3   :  { %1472 = vst.msk [vmem:[%s5332_s6 + $0x90] sm:$0xff] %vm1453_vm1, %v1419_v50 }
 0x3d5   :  { %1917 = vmatmul.bf16.gmra.mxu3 %v5592_v60  ;;  %v5603_v60 = vld [vmem:[#allocation25_spill] sm:$0xff] }
 0x3d8   :  { %v1420_v39 = vpop.f32.mrf.mxu2 }
 0x3d9   :  { %v1421_v57 = vadd.f32 %v1420_v39, %v4882_v63 }
 0x3db   :  { %1473 = vst.msk [vmem:[%s5332_s6 + $0x98] sm:$0xff] %vm1453_vm1, %v1421_v57 }
 0x3dd   :  { %2718 = vmatmul.msk.bf16.gmra.mxu2 %vm856_vm0, %v5593_v23 }
 0x3e0   :  { %v1423_v28 = vpop.f32.mrf.mxu2 }
 0x3e1   :  { %v1424_v54 = vadd.f32 %v1423_v28, %v4900_v51 }
 0x3e3   :  { %1474 = vst.msk [vmem:[%s5332_s6 + $0xa0] sm:$0xff] %vm1453_vm1, %v1424_v54 }
 0x3e5   :  { %1922 = vmatmul.bf16.gmra.mxu3 %v5594_v35 }
 0x3e8   :  { %v1425_v63 = vpop.f32.mrf.mxu2 }
 0x3e9   :  { %v1426_v46 = vadd.f32 %v1425_v63, %v4910_v58  ;;  %v5596_v58 = vld [vmem:[#allocation26_spill] sm:$0xff] }
 0x3eb   :  { %1475 = vst.msk [vmem:[%s5332_s6 + $0xa8] sm:$0xff] %vm1453_vm1, %v1426_v46 }
 0x3ed   :  { %2719 = vmatmul.msk.bf16.gmra.mxu2 %vm856_vm0, %v5595_v21  ;;  %v5604_v21 = vld [vmem:[#allocation35_spill] sm:$0xff] }
 0x3f0   :  { %v1428_v51 = vpop.f32.mrf.mxu2 }
 0x3f1   :  { %v1429_v0 = vadd.f32 %v1428_v51, %v4928_v25 }
 0x3f3   :  { %1476 = vst.msk [vmem:[%s5332_s6 + $0xb0] sm:$0xff] %vm1453_vm1, %v1429_v0 }
 0x3f8   :  { %v1430_v8 = vpop.f32.mrf.mxu2 }
 0x3f9   :  { %v1431_v59 = vadd.f32 %v1430_v8, %v4938_v33  ;;  %v5597_v33 = vld [vmem:[#allocation27_spill] sm:$0xff] }
 0x3fb   :  { %1477 = vst.msk [vmem:[%s5332_s6 + $0xb8] sm:$0xff] %vm1453_vm1, %v1431_v59 }
 0x3fd   :  { %2720 = vmatmul.msk.bf16.gmra.mxu2 %vm856_vm0, %v5596_v58 }
 0x400   :  { %v1433_v7 = vpop.f32.mrf.mxu2 }
 0x401   :  { %v1434_v4 = vadd.f32 %v1433_v7, %v4956_v40 }
 0x403   :  { %1478 = vst.msk [vmem:[%s5332_s6 + $0xc0] sm:$0xff] %vm1453_vm1, %v1434_v4 }
 0x408   :  { %v1435_v25 = vpop.f32.mrf.mxu2 }
 0x409   :  { %v1436_v38 = vadd.f32 %v1435_v25, %v4969_v1  ;;  %v1868_v1 = vpop.f32.mrf.mxu3 }
 0x40b   :  { %1479 = vst.msk [vmem:[%s5332_s6 + $0xc8] sm:$0xff] %vm1453_vm1, %v1436_v38 }
 0x40d   :  { %2721 = vmatmul.msk.bf16.gmra.mxu2 %vm856_vm0, %v5597_v33 }
 0x410   :  { %v1438_v37 = vpop.f32.mrf.mxu2 }
 0x411   :  { %v1439_v2 = vadd.f32 %v1438_v37, %v4986_v24  ;;  %v1870_v34 = vpop.f32.mrf.mxu3  ;;  %1927 = vmatmul.bf16.gmra.mxu3 %v5599_v29 }
 0x413   :  { %1480 = vst.msk [vmem:[%s5332_s6 + $0xd0] sm:$0xff] %vm1453_vm1, %v1439_v2  ;;  %v5605_v2 = vld [vmem:[#allocation37_spill] sm:$0xff] }
 0x418   :  { %v1440_v40 = vpop.f32.mrf.mxu2 }
 0x419   :  { %v1441_v48 = vadd.f32 %v1440_v40, %v4999_v9  ;;  %v2048_v9 = vpop.f32.mrf.mxu0  ;;  %2105 = vmatmul.bf16.gmra.mxu0 %v4722_v30  ;;  %v1873_v13 = vpop.f32.mrf.mxu3 }
 0x41b   :  { %1481 = vst.msk [vmem:[%s5332_s6 + $0xd8] sm:$0xff] %vm1453_vm1, %v1441_v48 }
 0x41d   :  { %2722 = vmatmul.msk.bf16.gmra.mxu2 %vm856_vm0, %v5598_v56 }
 0x420   :  { %v1443_v24 = vpop.f32.mrf.mxu2 }
 0x421   :  { %v1444_v11 = vadd.f32 %v1443_v24, %v5015_v44  ;;  %v2051_v44 = vpop.f32.mrf.mxu0  ;;  %v1875_v26 = vpop.f32.mrf.mxu3  ;;  %1932 = vmatmul.bf16.gmra.mxu3 %v5601_v19 }
 0x423   :  { %1482 = vst.msk [vmem:[%s5332_s6 + $0xe0] sm:$0xff] %vm1453_vm1, %v1444_v11 }
 0x428   :  { %v1445_v42 = vpop.f32.mrf.mxu2 }
 0x429   :  { %v1446_v36 = vadd.f32 %v1445_v42, %v5028_v15  ;;  %v2053_v53 = vpop.f32.mrf.mxu0  ;;  %2110 = vmatmul.bf16.gmra.mxu0 %v4752_v45  ;;  %v1081_v15 = vadd.f32 %v4563_v22, %v4847_v52  ;;  %v1878_v10 = vpop.f32.mrf.mxu3  ;;  %v5606_v42 = vld [vmem:[#allocation39_spill] sm:$0xff] }
 0x42a   :  { %v2145_v45 = vpop.f32.mrf.mxu1 }
 0x42b   :  { %1483 = vst.msk [vmem:[%s5332_s6 + $0xe8] sm:$0xff] %vm1453_vm1, %v1446_v36  ;;  %v1362_v12 = vadd.f32 %v1361_v32, %v1081_v15 }
 0x42d   :  { %2723 = vmatmul.msk.bf16.gmra.mxu2 %vm856_vm0, %v5600_v3 }
 0x430   :  { %v1448_v20 = vpop.f32.mrf.mxu2 }
 0x431   :  { %v1449_v30 = vadd.f32 %v1448_v20, %v5044_v27  ;;  %v2056_v6 = vpop.f32.mrf.mxu0  ;;  %v1880_v52 = vpop.f32.mrf.mxu3  ;;  %1937 = vmatmul.bf16.gmra.mxu3 %v5603_v60 }
 0x432   :  { %v2147_v23 = vpop.f32.mrf.mxu1  ;;  %2746 = vmatmul.msk.bf16.gmra.mxu1 %vm856_vm0, %v5018_v18 }
 0x433   :  { %1484 = vst.msk [vmem:[%s5332_s6 + $0xf0] sm:$0xff] %vm1453_vm1, %v1449_v30 }
 0x438   :  { %v1450_v27 = vpop.f32.mrf.mxu2 }
 0x439   :  { %v1451_v61 = vadd.f32 %v1450_v27, %v1362_v12  ;;  %v2058_v39 = vpop.f32.mrf.mxu0  ;;  %2115 = vmatmul.bf16.gmra.mxu0 %v4782_v41  ;;  %v1883_v32 = vpop.f32.mrf.mxu3 }
 0x43a   :  { %v2150_v41 = vpop.f32.mrf.mxu1 }
 0x43b   :  { %1485 = vst.msk [vmem:[%s5332_s6 + $0xf8] sm:$0xff] %vm1453_vm1, %v1451_v61  ;;  %v5607_v61 = vld [vmem:[#allocation41_spill] sm:$0xff] }
 0x43d   :  { %2724 = vmatmul.msk.bf16.gmra.mxu2 %vm856_vm0, %v5602_v17 }
 0x440   :  { %v1957_v50 = vpop.f32.mrf.mxu2 }
 0x441   :  { %v1958_v22 = vadd.f32 %v1957_v50, %v1868_v1  ;;  %v2061_v63 = vpop.f32.mrf.mxu0  ;;  %v1885_v0 = vpop.f32.mrf.mxu3  ;;  %1942 = vmatmul.bf16.gmra.mxu3 %v4547_v62 }
 0x442   :  { %v2152_v7 = vpop.f32.mrf.mxu1  ;;  %2747 = vmatmul.msk.bf16.gmra.mxu1 %vm856_vm0, %v5047_v55 }
 0x443   :  { %v2047_v14 = vadd.f32 %v2046_v43, %v1958_v22 }
 0x445   :  { %v2136_v57 = vadd.f32 %v2135_v31, %v2047_v14 }
 0x447   :  { %2748 = vst.msk [vmem:[%s5332_s6 + $0x100] sm:$0xff] %vm1453_vm1, %v2136_v57 }
 0x448   :  { %v1959_v28 = vpop.f32.mrf.mxu2 }
 0x449   :  { %v1960_v54 = vadd.f32 %v1959_v28, %v1870_v34  ;;  %v2063_v59 = vpop.f32.mrf.mxu0  ;;  %2120 = vmatmul.bf16.gmra.mxu0 %v4812_v16  ;;  %v1888_v38 = vpop.f32.mrf.mxu3  ;;  %v5608_v28 = vld [vmem:[#allocation43_spill] sm:$0xff] }
 0x44a   :  { %v2155_v16 = vpop.f32.mrf.mxu1 }
 0x44b   :  { %v2049_v35 = vadd.f32 %v2048_v9, %v1960_v54 }
 0x44d   :  { %v2138_v46 = vadd.f32 %v2137_v47, %v2049_v35  ;;  %2725 = vmatmul.msk.bf16.gmra.mxu2 %vm856_vm0, %v5604_v21 }
 0x44f   :  { %2749 = vst.msk [vmem:[%s5332_s6 + $0x108] sm:$0xff] %vm1453_vm1, %v2138_v46 }
 0x450   :  { %v1962_v18 = vpop.f32.mrf.mxu2 }
 0x451   :  { %v1963_v51 = vadd.f32 %v1962_v18, %v1873_v13  ;;  %v2066_v37 = vpop.f32.mrf.mxu0  ;;  %v1890_v48 = vpop.f32.mrf.mxu3 }
 0x452   :  { %v2157_v31 = vpop.f32.mrf.mxu1 }
 0x453   :  { %v2052_v8 = vadd.f32 %v2051_v44, %v1963_v51 }
 0x455   :  { %v2141_v58 = vadd.f32 %v2140_v5, %v2052_v8 }
 0x457   :  { %2750 = vst.msk [vmem:[%s5332_s6 + $0x110] sm:$0xff] %vm1453_vm1, %v2141_v58 }
 0x458   :  { %v1964_v4 = vpop.f32.mrf.mxu2 }
 0x459   :  { %v1965_v25 = vadd.f32 %v1964_v4, %v1875_v26  ;;  %v2068_v43 = vpop.f32.mrf.mxu0  ;;  %v1893_v34 = vpop.f32.mrf.mxu3  ;;  %v5609_v4 = vld [vmem:[#allocation45_spill] sm:$0xff] }
 0x45a   :  { %v2160_v36 = vpop.f32.mrf.mxu1 }
 0x45b   :  { %v2054_v33 = vadd.f32 %v2053_v53, %v1965_v25 }
 0x45d   :  { %v2143_v62 = vadd.f32 %v2142_v49, %v2054_v33  ;;  %2726 = vmatmul.msk.bf16.gmra.mxu2 %vm856_vm0, %v5605_v2 }
 0x45f   :  { %2751 = vst.msk [vmem:[%s5332_s6 + $0x118] sm:$0xff] %vm1453_vm1, %v2143_v62 }
 0x460   :  { %v1967_v55 = vpop.f32.mrf.mxu2 }
 0x461   :  { %v1968_v40 = vadd.f32 %v1967_v55, %v1878_v10  ;;  %v2071_v9 = vpop.f32.mrf.mxu0  ;;  %v1895_v3 = vpop.f32.mrf.mxu3 }
 0x462   :  { %v2162_v26 = vpop.f32.mrf.mxu1 }
 0x463   :  { %v2057_v1 = vadd.f32 %v2056_v6, %v1968_v40 }
 0x465   :  { %v2146_v56 = vadd.f32 %v2145_v45, %v2057_v1 }
 0x467   :  { %2752 = vst.msk [vmem:[%s5332_s6 + $0x120] sm:$0xff] %vm1453_vm1, %v2146_v56  ;;  %v5610_v56 = vld [vmem:[#allocation47_spill] sm:$0xff] }
 0x468   :  { %v1969_v24 = vpop.f32.mrf.mxu2 }
 0x469   :  { %v1970_v11 = vadd.f32 %v1969_v24, %v1880_v52  ;;  %v2073_v20 = vpop.f32.mrf.mxu0  ;;  %v1898_v15 = vpop.f32.mrf.mxu3 }
 0x46a   :  { %v2165_v10 = vpop.f32.mrf.mxu1 }
 0x46b   :  { %v2059_v29 = vadd.f32 %v2058_v39, %v1970_v11 }
 0x46d   :  { %v2148_v47 = vadd.f32 %v2147_v23, %v2059_v29  ;;  %2727 = vmatmul.msk.bf16.gmra.mxu2 %vm856_vm0, %v5606_v42 }
 0x46f   :  { %2753 = vst.msk [vmem:[%s5332_s6 + $0x128] sm:$0xff] %vm1453_vm1, %v2148_v47 }
 0x470   :  { %v1972_v13 = vpop.f32.mrf.mxu2 }
 0x471   :  { %v1973_v44 = vadd.f32 %v1972_v13, %v1883_v32  ;;  %v2076_v12 = vpop.f32.mrf.mxu0  ;;  %v1900_v50 = vpop.f32.mrf.mxu3 }
 0x472   :  { %v2167_v14 = vpop.f32.mrf.mxu1 }
 0x473   :  { %v2062_v5 = vadd.f32 %v2061_v63, %v1973_v44 }
 0x475   :  { %v2151_v30 = vadd.f32 %v2150_v41, %v2062_v5 }
 0x477   :  { %2754 = vst.msk [vmem:[%s5332_s6 + $0x130] sm:$0xff] %vm1453_vm1, %v2151_v30 }
 0x478   :  { %v1974_v19 = vpop.f32.mrf.mxu2 }
 0x479   :  { %v1975_v53 = vadd.f32 %v1974_v19, %v1885_v0  ;;  %v2078_v52 = vpop.f32.mrf.mxu0  ;;  %v1903_v54 = vpop.f32.mrf.mxu3 }
 0x47a   :  { %v2170_v46 = vpop.f32.mrf.mxu1 }
 0x47b   :  { %v2064_v49 = vadd.f32 %v2063_v59, %v1975_v53 }
 0x47d   :  { %v2153_v27 = vadd.f32 %v2152_v7, %v2064_v49  ;;  %2728 = vmatmul.msk.bf16.gmra.mxu2 %vm856_vm0, %v5607_v61 }
 0x47f   :  { %2755 = vst.msk [vmem:[%s5332_s6 + $0x138] sm:$0xff] %vm1453_vm1, %v2153_v27 }
 0x480   :  { %v1977_v6 = vpop.f32.mrf.mxu2 }
 0x481   :  { %v1978_v17 = vadd.f32 %v1977_v6, %v1888_v38  ;;  %v2081_v35 = vpop.f32.mrf.mxu0  ;;  %v1905_v51 = vpop.f32.mrf.mxu3 }
 0x482   :  { %v2172_v58 = vpop.f32.mrf.mxu1 }
 0x483   :  { %v2067_v45 = vadd.f32 %v2066_v37, %v1978_v17 }
 0x485   :  { %v2156_v22 = vadd.f32 %v2155_v16, %v2067_v45 }
 0x487   :  { %2756 = vst.msk [vmem:[%s5332_s6 + $0x140] sm:$0xff] %vm1453_vm1, %v2156_v22 }
 0x488   :  { %v1979_v60 = vpop.f32.mrf.mxu2 }
 0x489   :  { %v1980_v39 = vadd.f32 %v1979_v60, %v1890_v48  ;;  %v2083_v8 = vpop.f32.mrf.mxu0  ;;  %v1908_v33 = vpop.f32.mrf.mxu3 }
 0x48a   :  { %v2175_v16 = vpop.f32.mrf.mxu1 }
 0x48b   :  { %v2069_v57 = vadd.f32 %v2068_v43, %v1980_v39 }
 0x48d   :  { %v2158_v23 = vadd.f32 %v2157_v31, %v2069_v57  ;;  %2729 = vmatmul.msk.bf16.gmra.mxu2 %vm856_vm0, %v5608_v28 }
 0x48f   :  { %2757 = vst.msk [vmem:[%s5332_s6 + $0x148] sm:$0xff] %vm1453_vm1, %v2158_v23 }
 0x490   :  { %v1982_v32 = vpop.f32.mrf.mxu2 }
 0x491   :  { %v1983_v63 = vadd.f32 %v1982_v32, %v1893_v34  ;;  %v2086_v62 = vpop.f32.mrf.mxu0  ;;  %v1910_v1 = vpop.f32.mrf.mxu3 }
 0x492   :  { %v2177_v11 = vpop.f32.mrf.mxu1 }
 0x493   :  { %v2072_v21 = vadd.f32 %v2071_v9, %v1983_v63 }
 0x495   :  { %v2161_v41 = vadd.f32 %v2160_v36, %v2072_v21 }
 0x497   :  { %2758 = vst.msk [vmem:[%s5332_s6 + $0x150] sm:$0xff] %vm1453_vm1, %v2161_v41 }
 0x498   :  { %v1984_v18 = vpop.f32.mrf.mxu2 }
 0x499   :  { %v1985_v0 = vadd.f32 %v1984_v18, %v1895_v3  ;;  %v2088_v31 = vpop.f32.mrf.mxu0  ;;  %v1913_v47 = vpop.f32.mrf.mxu3 }
 0x49a   :  { %v2180_v44 = vpop.f32.mrf.mxu1 }
 0x49b   :  { %v2074_v59 = vadd.f32 %v2073_v20, %v1985_v0 }
 0x49d   :  { %v2163_v7 = vadd.f32 %v2162_v26, %v2074_v59  ;;  %2730 = vmatmul.msk.bf16.gmra.mxu2 %vm856_vm0, %v5609_v4 }
 0x49f   :  { %2759 = vst.msk [vmem:[%s5332_s6 + $0x158] sm:$0xff] %vm1453_vm1, %v2163_v7 }
 0x4a0   :  { %v1987_v25 = vpop.f32.mrf.mxu2 }
 0x4a1   :  { %v1988_v38 = vadd.f32 %v1987_v25, %v1898_v15  ;;  %v2091_v36 = vpop.f32.mrf.mxu0  ;;  %v1915_v30 = vpop.f32.mrf.mxu3 }
 0x4a2   :  { %v2182_v15 = vpop.f32.mrf.mxu1 }
 0x4a3   :  { %v2077_v37 = vadd.f32 %v2076_v12, %v1988_v38 }
 0x4a5   :  { %v2166_v2 = vadd.f32 %v2165_v10, %v2077_v37 }
 0x4a7   :  { %2760 = vst.msk [vmem:[%s5332_s6 + $0x160] sm:$0xff] %vm1453_vm1, %v2166_v2 }
 0x4a8   :  { %v1989_v55 = vpop.f32.mrf.mxu2 }
 0x4a9   :  { %v1990_v40 = vadd.f32 %v1989_v55, %v1900_v50  ;;  %v2093_v19 = vpop.f32.mrf.mxu0  ;;  %v1918_v61 = vpop.f32.mrf.mxu3 }
 0x4aa   :  { %v2185_v45 = vpop.f32.mrf.mxu1 }
 0x4ab   :  { %v2079_v48 = vadd.f32 %v2078_v52, %v1990_v40 }
 0x4ad   :  { %v2168_v43 = vadd.f32 %v2167_v14, %v2079_v48  ;;  %2731 = vmatmul.msk.bf16.gmra.mxu2 %vm856_vm0, %v5610_v56 }
 0x4af   :  { %2761 = vst.msk [vmem:[%s5332_s6 + $0x168] sm:$0xff] %vm1453_vm1, %v2168_v43 }
 0x4b0   :  { %v1992_v24 = vpop.f32.mrf.mxu2 }
 0x4b1   :  { %v1993_v34 = vadd.f32 %v1992_v24, %v1903_v54  ;;  %v2096_v6 = vpop.f32.mrf.mxu0  ;;  %v1920_v60 = vpop.f32.mrf.mxu3 }
 0x4b2   :  { %v2187_v23 = vpop.f32.mrf.mxu1 }
 0x4b3   :  { %v2082_v29 = vadd.f32 %v2081_v35, %v1993_v34 }
 0x4b5   :  { %v2171_v9 = vadd.f32 %v2170_v46, %v2082_v29 }
 0x4b7   :  { %2762 = vst.msk [vmem:[%s5332_s6 + $0x170] sm:$0xff] %vm1453_vm1, %v2171_v9 }
 0x4b8   :  { %v1994_v42 = vpop.f32.mrf.mxu2 }
 0x4b9   :  { %v1995_v13 = vadd.f32 %v1994_v42, %v1905_v51  ;;  %v2098_v39 = vpop.f32.mrf.mxu0  ;;  %v1923_v35 = vpop.f32.mrf.mxu3 }
 0x4ba   :  { %v2190_v41 = vpop.f32.mrf.mxu1 }
 0x4bb   :  { %v2084_v3 = vadd.f32 %v2083_v8, %v1995_v13 }
 0x4bd   :  { %v2173_v5 = vadd.f32 %v2172_v58, %v2084_v3 }
 0x4bf   :  { %2763 = vst.msk [vmem:[%s5332_s6 + $0x178] sm:$0xff] %vm1453_vm1, %v2173_v5 }
 0x4c0   :  { %v1997_v20 = vpop.f32.mrf.mxu2 }
 0x4c1   :  { %v1998_v26 = vadd.f32 %v1997_v20, %v1908_v33  ;;  %v2101_v46 = vpop.f32.mrf.mxu0  ;;  %v1925_v8 = vpop.f32.mrf.mxu3 }
 0x4c2   :  { %v2192_v4 = vpop.f32.mrf.mxu1 }
 0x4c3   :  { %v2087_v53 = vadd.f32 %v2086_v62, %v1998_v26 }
 0x4c5   :  { %v2176_v49 = vadd.f32 %v2175_v16, %v2087_v53 }
 0x4c7   :  { %2764 = vst.msk [vmem:[%s5332_s6 + $0x180] sm:$0xff] %vm1453_vm1, %v2176_v49 }
 0x4c8   :  { %v1999_v12 = vpop.f32.mrf.mxu2 }
 0x4c9   :  { %v2000_v27 = vadd.f32 %v1999_v12, %v1910_v1  ;;  %v2103_v58 = vpop.f32.mrf.mxu0  ;;  %v1928_v37 = vpop.f32.mrf.mxu3 }
 0x4ca   :  { %v2195_v55 = vpop.f32.mrf.mxu1 }
 0x4cb   :  { %v2089_v10 = vadd.f32 %v2088_v31, %v2000_v27 }
 0x4cd   :  { %v2178_v17 = vadd.f32 %v2177_v11, %v2089_v10 }
 0x4cf   :  { %2765 = vst.msk [vmem:[%s5332_s6 + $0x188] sm:$0xff] %vm1453_vm1, %v2178_v17 }
 0x4d0   :  { %v2002_v50 = vpop.f32.mrf.mxu2 }
 0x4d1   :  { %v2003_v22 = vadd.f32 %v2002_v50, %v1913_v47  ;;  %v2106_v2 = vpop.f32.mrf.mxu0  ;;  %v1930_v43 = vpop.f32.mrf.mxu3 }
 0x4d2   :  { %v2197_v11 = vpop.f32.mrf.mxu1 }
 0x4d3   :  { %v2092_v52 = vadd.f32 %v2091_v36, %v2003_v22 }
 0x4d5   :  { %v2181_v14 = vadd.f32 %v2180_v44, %v2092_v52 }
 0x4d7   :  { %2766 = vst.msk [vmem:[%s5332_s6 + $0x190] sm:$0xff] %vm1453_vm1, %v2181_v14 }
 0x4d8   :  { %v2004_v57 = vpop.f32.mrf.mxu2 }
 0x4d9   :  { %v2005_v28 = vadd.f32 %v2004_v57, %v1915_v30  ;;  %v2108_v31 = vpop.f32.mrf.mxu0  ;;  %v1933_v47 = vpop.f32.mrf.mxu3 }
 0x4da   :  { %v2200_v44 = vpop.f32.mrf.mxu1 }
 0x4db   :  { %v2094_v54 = vadd.f32 %v2093_v19, %v2005_v28 }
 0x4dd   :  { %v2183_v32 = vadd.f32 %v2182_v15, %v2094_v54 }
 0x4df   :  { %2767 = vst.msk [vmem:[%s5332_s6 + $0x198] sm:$0xff] %vm1453_vm1, %v2183_v32 }
 0x4e0   :  { %v2007_v63 = vpop.f32.mrf.mxu2 }
 0x4e1   :  { %v2008_v21 = vadd.f32 %v2007_v63, %v1918_v61  ;;  %v2111_v36 = vpop.f32.mrf.mxu0  ;;  %v1935_v30 = vpop.f32.mrf.mxu3 }
 0x4e2   :  { %v2202_v15 = vpop.f32.mrf.mxu1 }
 0x4e3   :  { %v2097_v18 = vadd.f32 %v2096_v6, %v2008_v21 }
 0x4e5   :  { %v2186_v51 = vadd.f32 %v2185_v45, %v2097_v18 }
 0x4e7   :  { %2768 = vst.msk [vmem:[%s5332_s6 + $0x1a0] sm:$0xff] %vm1453_vm1, %v2186_v51 }
 0x4e8   :  { %v2009_v0 = vpop.f32.mrf.mxu2 }
 0x4e9   :  { %v2010_v59 = vadd.f32 %v2009_v0, %v1920_v60  ;;  %v2113_v19 = vpop.f32.mrf.mxu0  ;;  %v1938_v61 = vpop.f32.mrf.mxu3 }
 0x4ea   :  { %v2205_v45 = vpop.f32.mrf.mxu1 }
 0x4eb   :  { %v2099_v7 = vadd.f32 %v2098_v39, %v2010_v59 }
 0x4ed   :  { %v2188_v25 = vadd.f32 %v2187_v23, %v2099_v7 }
 0x4ef   :  { %2769 = vst.msk [vmem:[%s5332_s6 + $0x1a8] sm:$0xff] %vm1453_vm1, %v2188_v25 }
 0x4f0   :  { %v2012_v38 = vpop.f32.mrf.mxu2 }
 0x4f1   :  { %v2013_v33 = vadd.f32 %v2012_v38, %v1923_v35  ;;  %v2116_v6 = vpop.f32.mrf.mxu0  ;;  %v1940_v60 = vpop.f32.mrf.mxu3 }
 0x4f2   :  { %v2207_v23 = vpop.f32.mrf.mxu1 }
 0x4f3   :  { %v2102_v62 = vadd.f32 %v2101_v46, %v2013_v33 }
 0x4f5   :  { %v2191_v16 = vadd.f32 %v2190_v41, %v2102_v62 }
 0x4f7   :  { %2770 = vst.msk [vmem:[%s5332_s6 + $0x1b0] sm:$0xff] %vm1453_vm1, %v2191_v16 }
 0x4f8   :  { %v2014_v40 = vpop.f32.mrf.mxu2 }
 0x4f9   :  { %v2015_v48 = vadd.f32 %v2014_v40, %v1925_v8  ;;  %v2118_v39 = vpop.f32.mrf.mxu0  ;;  %v1943_v35 = vpop.f32.mrf.mxu3 }
 0x4fa   :  { %v2210_v41 = vpop.f32.mrf.mxu1 }
 0x4fb   :  { %v2104_v1 = vadd.f32 %v2103_v58, %v2015_v48 }
 0x4fd   :  { %v2193_v56 = vadd.f32 %v2192_v4, %v2104_v1 }
 0x4ff   :  { %2771 = vst.msk [vmem:[%s5332_s6 + $0x1b8] sm:$0xff] %vm1453_vm1, %v2193_v56 }
 0x500   :  { %v2017_v24 = vpop.f32.mrf.mxu2 }
 0x501   :  { %v2018_v34 = vadd.f32 %v2017_v24, %v1928_v37  ;;  %v2121_v46 = vpop.f32.mrf.mxu0  ;;  %v1945_v0 = vpop.f32.mrf.mxu3 }
 0x502   :  { %v2212_v4 = vpop.f32.mrf.mxu1 }
 0x503   :  { %v2107_v29 = vadd.f32 %v2106_v2, %v2018_v34 }
 0x505   :  { %v2196_v9 = vadd.f32 %v2195_v55, %v2107_v29 }
 0x507   :  { %2772 = vst.msk [vmem:[%s5332_s6 + $0x1c0] sm:$0xff] %vm1453_vm1, %v2196_v9 }
 0x508   :  { %v2019_v42 = vpop.f32.mrf.mxu2 }
 0x509   :  { %v2020_v13 = vadd.f32 %v2019_v42, %v1930_v43  ;;  %v2123_v58 = vpop.f32.mrf.mxu0 }
 0x50b   :  { %v2109_v3 = vadd.f32 %v2108_v31, %v2020_v13 }
 0x50d   :  { %v2198_v5 = vadd.f32 %v2197_v11, %v2109_v3 }
 0x50f   :  { %2773 = vst.msk [vmem:[%s5332_s6 + $0x1c8] sm:$0xff] %vm1453_vm1, %v2198_v5 }
 0x510   :  { %v2022_v20 = vpop.f32.mrf.mxu2 }
 0x511   :  { %v2023_v26 = vadd.f32 %v2022_v20, %v1933_v47 }
 0x513   :  { %v2112_v53 = vadd.f32 %v2111_v36, %v2023_v26 }
 0x515   :  { %v2201_v49 = vadd.f32 %v2200_v44, %v2112_v53 }
 0x517   :  { %2774 = vst.msk [vmem:[%s5332_s6 + $0x1d0] sm:$0xff] %vm1453_vm1, %v2201_v49 }
 0x518   :  { %v2024_v12 = vpop.f32.mrf.mxu2 }
 0x519   :  { %v2025_v27 = vadd.f32 %v2024_v12, %v1935_v30 }
 0x51b   :  { %v2114_v10 = vadd.f32 %v2113_v19, %v2025_v27 }
 0x51d   :  { %v2203_v17 = vadd.f32 %v2202_v15, %v2114_v10 }
 0x51f   :  { %2775 = vst.msk [vmem:[%s5332_s6 + $0x1d8] sm:$0xff] %vm1453_vm1, %v2203_v17 }
 0x520   :  { %v2027_v50 = vpop.f32.mrf.mxu2 }
 0x521   :  { %v2028_v22 = vadd.f32 %v2027_v50, %v1938_v61 }
 0x523   :  { %v2117_v52 = vadd.f32 %v2116_v6, %v2028_v22 }
 0x525   :  { %v2206_v14 = vadd.f32 %v2205_v45, %v2117_v52 }
 0x527   :  { %2776 = vst.msk [vmem:[%s5332_s6 + $0x1e0] sm:$0xff] %vm1453_vm1, %v2206_v14 }
 0x528   :  { %v2029_v57 = vpop.f32.mrf.mxu2 }
 0x529   :  { %v2030_v28 = vadd.f32 %v2029_v57, %v1940_v60 }
 0x52b   :  { %v2119_v54 = vadd.f32 %v2118_v39, %v2030_v28 }
 0x52d   :  { %v2208_v32 = vadd.f32 %v2207_v23, %v2119_v54 }
 0x52f   :  { %2777 = vst.msk [vmem:[%s5332_s6 + $0x1e8] sm:$0xff] %vm1453_vm1, %v2208_v32 }
 0x530   :  { %v2032_v63 = vpop.f32.mrf.mxu2 }
 0x531   :  { %v2033_v21 = vadd.f32 %v2032_v63, %v1943_v35 }
 0x533   :  { %v2122_v18 = vadd.f32 %v2121_v46, %v2033_v21 }
 0x535   :  { %v2211_v51 = vadd.f32 %v2210_v41, %v2122_v18 }
 0x537   :  { %2778 = vst.msk [vmem:[%s5332_s6 + $0x1f0] sm:$0xff] %vm1453_vm1, %v2211_v51 }
 0x538   :  { %v2034_v8 = vpop.f32.mrf.mxu2 }
 0x539   :  { %v2035_v59 = vadd.f32 %v2034_v8, %v1945_v0 }
 0x53b   :  { %v2124_v7 = vadd.f32 %v2123_v58, %v2035_v59 }
 0x53d   :  { %v2213_v25 = vadd.f32 %v2212_v4, %v2124_v7 }
 0x53f   :  { %2779 = vst.msk [vmem:[%s5332_s6 + $0x1f8] sm:$0xff] %vm1453_vm1, %v2213_v25 }

</bundles_post_ra>
